<compile_context>
chip_gen: v6e
topology: v6e:2x2x1
jax: 0.10.0
libtpu: 0.0.40
codegen_flags: <defaults>
</compile_context>

<pallas_src>
import math
import numpy as np

import jax
import jax.numpy as jnp
from jax.experimental import pallas as pl
from jax.experimental.pallas import tpu as pltpu

PAD_ID = 0
INFINITY_NUMBER = 1e12


# ----------------------------------------------------------------------------
# Kernel E: input_W_G  (bert @ Wb + pos_e @ Wp + b), row-tiled parallel grid
# ----------------------------------------------------------------------------
def _input_linear_kernel(bert_ref, pos_ref, wb_ref, wp_ref, b_ref, o_ref):
    o_ref[...] = (
        jnp.dot(bert_ref[...], wb_ref[...], preferred_element_type=jnp.float32)
        + jnp.dot(pos_ref[...], wp_ref[...], preferred_element_type=jnp.float32)
        + b_ref[...])


def input_linear(bert_flat, pos_flat, w, b, bert_dim):
    M = bert_flat.shape[0]
    D = w.shape[1]
    pdim = pos_flat.shape[1]
    wb = w[:bert_dim]          # (1024, D)  -- aligned contraction
    wp = w[bert_dim:]          # (pos_dim, D)
    if M % 128 == 0:
        tm = 128
    elif M % 8 == 0:
        tm = 8
    else:
        tm = M
    grid = (M // tm,)
    return pl.pallas_call(
        _input_linear_kernel,
        out_shape=jax.ShapeDtypeStruct((M, D), jnp.float32),
        grid=grid,
        in_specs=[
            pl.BlockSpec((tm, bert_dim), lambda i: (i, 0)),
            pl.BlockSpec((tm, pdim), lambda i: (i, 0)),
            pl.BlockSpec(wb.shape, lambda i: (0, 0)),
            pl.BlockSpec(wp.shape, lambda i: (0, 0)),
            pl.BlockSpec((1, D), lambda i: (0, 0)),
        ],
        out_specs=pl.BlockSpec((tm, D), lambda i: (i, 0)),
        compiler_params=pltpu.CompilerParams(
            dimension_semantics=("parallel",)),
    )(bert_flat, pos_flat, wb, wp, b.reshape(1, D))


# ----------------------------------------------------------------------------
# Kernel A: both GraphConvLayer blocks fused, grid over batch ("parallel")
# ----------------------------------------------------------------------------
def _make_gcn_blocks_kernel(layers_list, D, hd_list):
    def kernel(*refs):
        adj_ref, x_ref = refs[0], refs[1]
        idx = 2
        gcl_refs = []
        for layers in layers_list:
            ws = []
            for _ in range(layers):
                ws.append((refs[idx], refs[idx + 1]))
                idx += 2
            lin = (refs[idx], refs[idx + 1])
            idx += 2
            gcl_refs.append((ws, lin))
        o_ref = refs[idx]
        cat_ref = refs[idx + 1]            # VMEM scratch (L, 2*D)

        A = adj_ref[0]                     # (L, L)
        x0 = x_ref[0]                      # (L, D)
        denom = jnp.sum(A, axis=1, keepdims=True) + 1.0
        cur = x0
        for gi, ((ws, (wlin_ref, blin_ref)), hd) in enumerate(
                zip(gcl_refs, hd_list)):
            inp = cur
            cat_ref[:, :D] = inp           # dense-connection cache, slice 0
            nl = len(ws)
            for l in range(nl):
                width = D + l * hd
                prefix = cat_ref[:, :width]
                w_ref, b_ref = ws[l]
                # W(Ax) + W(x)  ==  ((A@x)+x) @ W + 2*b   (same math, 1 matmul)
                ax = jnp.dot(A, prefix,
                             preferred_element_type=jnp.float32) + prefix
                axw = (jnp.dot(ax, w_ref[...],
                               preferred_element_type=jnp.float32)
                       + 2.0 * b_ref[...])
                g = jnp.maximum(axw / denom, 0.0)
                cat_ref[:, D + l * hd: D + (l + 1) * hd] = g
            gcn_out = cat_ref[:, D: D + nl * hd] + inp
            cur = (jnp.dot(gcn_out, wlin_ref[...],
                           preferred_element_type=jnp.float32)
                   + blin_ref[...])
            o_ref[0, :, gi * D:(gi + 1) * D] = cur
    return kernel


def gcn_blocks(adj, x, gcl1, gcl2):
    """Fused layers[0] + layers[1].  Returns (B, L, 2*D) = [out1 | out2]."""
    B, L, D = x.shape
    layers1 = len(gcl1["weight_list"])
    layers2 = len(gcl2["weight_list"])
    hd1, hd2 = D // layers1, D // layers2

    args = [adj, x]
    in_specs = [pl.BlockSpec((1, L, L), lambda b: (b, 0, 0)),
                pl.BlockSpec((1, L, D), lambda b: (b, 0, 0))]
    for gcl in (gcl1, gcl2):
        for wl in gcl["weight_list"]:
            w = wl["w"]
            bvec = wl["b"].reshape(1, -1)
            args += [w, bvec]
            in_specs += [pl.BlockSpec(w.shape, lambda b: (0, 0)),
                         pl.BlockSpec(bvec.shape, lambda b: (0, 0))]
        wlin = gcl["linear"]["w"]
        blin = gcl["linear"]["b"].reshape(1, -1)
        args += [wlin, blin]
        in_specs += [pl.BlockSpec(wlin.shape, lambda b: (0, 0)),
                     pl.BlockSpec(blin.shape, lambda b: (0, 0))]

    return pl.pallas_call(
        _make_gcn_blocks_kernel((layers1, layers2), D, (hd1, hd2)),
        out_shape=jax.ShapeDtypeStruct((B, L, 2 * D), jnp.float32),
        grid=(B,),
        in_specs=in_specs,
        out_specs=pl.BlockSpec((1, L, 2 * D), lambda b: (b, 0, 0)),
        scratch_shapes=[pltpu.VMEM((L, 2 * D), jnp.float32)],
        compiler_params=pltpu.CompilerParams(
            dimension_semantics=("parallel",)),
    )(*args)


# ----------------------------------------------------------------------------
# Kernel B: all 4 Edge_GATConv convolutions + cg_linear, fused, index-based
# ----------------------------------------------------------------------------
def _make_gat_block_kernel(negative_slope=0.2):
    def kernel(x_ref, src_ref, dst_ref, valid_ref, ea_ref,
               w1_ref, ai1_ref, aj1_ref, ae1_ref, eux1_ref, eue1_ref, b1_ref,
               w2a_ref, w2b_ref, ai2_ref, aj2_ref, ae2_ref, eux2_ref,
               eue2_ref, b2_ref,
               w3_ref, ai3_ref, aj3_ref, ae3_ref, eux3_ref, eue3_ref, b3_ref,
               w4a_ref, w4b_ref, ai4_ref, aj4_ref, ae4_ref, eux4_ref,
               eue4_ref, b4_ref,
               wcg1a_ref, wcg1b_ref, wcg2a_ref, wcg2b_ref, wcgx_ref, bcg_ref,
               o_ref):
        x = x_ref[...]                                        # (N, D)
        N = x.shape[0]
        E = src_ref.shape[0]
        ids = jax.lax.broadcasted_iota(jnp.int32, (E, N), 1)
        valid = valid_ref[...]                                # (E, 1)
        # Transient one-hot gather/scatter tiles built in vregs from O(E)
        # indices -- nothing O(E*N) ever lives in HBM or is DMA'd.
        onehot_src = (ids == src_ref[...]).astype(jnp.float32)           # (E,N)
        onehot_dst = (ids == dst_ref[...]).astype(jnp.float32) * valid   # (E,N)
        ea = ea_ref[...]                                      # (E, ed)

        def conv(xw, ai_ref, aj_ref, ae_ref, eux_ref, eue_ref, bias_ref):
            # gather x_j / x_i
            xj = jnp.dot(onehot_src, xw, preferred_element_type=jnp.float32)
            xi = jnp.dot(onehot_dst, xw, preferred_element_type=jnp.float32)
            # alpha = <[x_i, x_j, e], att>  without lane concats
            alpha = (jnp.dot(xi, ai_ref[...],
                             preferred_element_type=jnp.float32)
                     + jnp.dot(xj, aj_ref[...],
                               preferred_element_type=jnp.float32)
                     + jnp.dot(ea, ae_ref[...],
                               preferred_element_type=jnp.float32))       # (E,1)
            alpha = jnp.where(alpha >= 0.0, alpha, negative_slope * alpha)
            # grouped softmax over destination node (numerically safe:
            # gmax >= alpha for every real edge since each dst has >=1 edge)
            masked = jnp.where(onehot_dst > 0.5, alpha, -1e30)            # (E,N)
            node_max = jnp.max(masked, axis=0, keepdims=True)             # (1,N)
            gmax = jax.lax.dot_general(
                onehot_dst, node_max, (((1,), (1,)), ((), ())),
                preferred_element_type=jnp.float32)                       # (E,1)
            ex = jnp.exp(alpha - gmax) * valid                            # (E,1)
            node_sum = jax.lax.dot_general(
                onehot_dst, ex, (((0,), (0,)), ((), ())),
                preferred_element_type=jnp.float32)                       # (N,1)
            gsum = jnp.dot(onehot_dst, node_sum,
                           preferred_element_type=jnp.float32)            # (E,1)
            alpha_n = ex / (gsum + 1e-16)
            # scatter-add by destination (contract dim 0 -- no transpose copy)
            agg_x = jax.lax.dot_general(
                onehot_dst, xj * alpha_n, (((0,), (0,)), ((), ())),
                preferred_element_type=jnp.float32)                       # (N,C)
            agg_e = jax.lax.dot_general(
                onehot_dst, ea * alpha_n, (((0,), (0,)), ((), ())),
                preferred_element_type=jnp.float32)                       # (N,ed)
            out = (jnp.dot(agg_x, eux_ref[...],
                           preferred_element_type=jnp.float32)
                   + jnp.dot(agg_e, eue_ref[...],
                             preferred_element_type=jnp.float32)
                   + bias_ref[...])
            return jnp.maximum(out, 0.0)    # F.relu applied in CGCNCGAT.forward

        # Dense GAT block 0: egat1 -> egat2 (input of egat2 = [x, x1])
        xw1 = jnp.dot(x, w1_ref[...], preferred_element_type=jnp.float32)
        x1 = conv(xw1, ai1_ref, aj1_ref, ae1_ref, eux1_ref, eue1_ref, b1_ref)
        xw2 = (jnp.dot(x, w2a_ref[...], preferred_element_type=jnp.float32)
               + jnp.dot(x1, w2b_ref[...], preferred_element_type=jnp.float32))
        x2 = conv(xw2, ai2_ref, aj2_ref, ae2_ref, eux2_ref, eue2_ref, b2_ref)
        # Dense GAT block 1: egat11 -> egat22
        xw3 = jnp.dot(x, w3_ref[...], preferred_element_type=jnp.float32)
        x11 = conv(xw3, ai3_ref, aj3_ref, ae3_ref, eux3_ref, eue3_ref, b3_ref)
        xw4 = (jnp.dot(x, w4a_ref[...], preferred_element_type=jnp.float32)
               + jnp.dot(x11, w4b_ref[...],
                         preferred_element_type=jnp.float32))
        x22 = conv(xw4, ai4_ref, aj4_ref, ae4_ref, eux4_ref, eue4_ref, b4_ref)

        # cg_linear(concat([cat([x1,x2])+x, cat([x11,x22])+x])) with pre-split W
        o_ref[...] = (
            jnp.dot(x1, wcg1a_ref[...], preferred_element_type=jnp.float32)
            + jnp.dot(x2, wcg1b_ref[...], preferred_element_type=jnp.float32)
            + jnp.dot(x11, wcg2a_ref[...], preferred_element_type=jnp.float32)
            + jnp.dot(x22, wcg2b_ref[...], preferred_element_type=jnp.float32)
            + jnp.dot(x, wcgx_ref[...], preferred_element_type=jnp.float32)
            + bcg_ref[...])
    return kernel


def gat_blocks(x_flat, src, dst, valid, edge_attr, params, D):
    N = x_flat.shape[0]
    C = D // 2

    def split_conv(p, dense_input):
        w = p["weight"]                   # (in, C)
        att = p["att"]                    # (1, 2C+ed)
        eu = p["edge_update"]             # (C+ed, C)
        ed = att.shape[1] - 2 * C
        ai = att[0, :C].reshape(C, 1)
        aj = att[0, C:2 * C].reshape(C, 1)
        ae = att[0, 2 * C:].reshape(ed, 1)
        eux = eu[:C]
        eue = eu[C:]
        b = p["bias"].reshape(1, C)
        if dense_input:
            return [w[:D], w[D:], ai, aj, ae, eux, eue, b]
        return [w, ai, aj, ae, eux, eue, b]

    wcg = params["cg_linear"]["w"]        # (2D, D)
    bcg = params["cg_linear"]["b"].reshape(1, D)
    wcg1, wcg2 = wcg[:D], wcg[D:]
    cg_args = [wcg1[:C], wcg1[C:], wcg2[:C], wcg2[C:], wcg1 + wcg2, bcg]

    args = ([x_flat, src, dst, valid, edge_attr]
            + split_conv(params["egat1"], False)
            + split_conv(params["egat2"], True)
            + split_conv(params["egat11"], False)
            + split_conv(params["egat22"], True)
            + cg_args)

    return pl.pallas_call(
        _make_gat_block_kernel(),
        out_shape=jax.ShapeDtypeStruct((N, D), jnp.float32),
    )(*args)


# ----------------------------------------------------------------------------
# Kernel H: aggregate_W + three masked max-pools + out_mlp + classifier fused
# ----------------------------------------------------------------------------
def _make_head_kernel(num_extra, B, L):
    def kernel(*refs):
        l12_ref, cg_ref, mask_ref = refs[0], refs[1], refs[2]
        w12_ref, wcg_ref, bagg_ref = refs[3], refs[4], refs[5]
        w1a_ref, w1b_ref, w1c_ref, b1_ref = refs[6], refs[7], refs[8], refs[9]
        idx = 10
        extra = []
        for _ in range(num_extra):
            extra.append((refs[idx], refs[idx + 1]))
            idx += 2
        wcls_ref, bcls_ref = refs[idx], refs[idx + 1]
        logits_ref, hout_ref = refs[idx + 2], refs[idx + 3]

        # aggregate_W over the whole flattened batch: one (B*L)-row MXU matmul.
        h_all = (jnp.dot(l12_ref[...], w12_ref[...],
                         preferred_element_type=jnp.float32)
                 + jnp.dot(cg_ref[...], wcg_ref[...],
                           preferred_element_type=jnp.float32)
                 + bagg_ref[...])                          # (B*L, D)
        m_all = mask_ref[...]                              # (B*L, 3)

        h_rows, s_rows, o_rows = [], [], []
        for b in range(B):                                 # B is small & static
            hb = h_all[b * L:(b + 1) * L]                  # (L, D)
            mb = m_all[b * L:(b + 1) * L]                  # (L, 3)

            def pool_k(k, hb=hb, mb=mb):                   # pool / subj / obj
                mk = mb[:, k:k + 1]
                filled = jnp.where(mk > 0.5, -INFINITY_NUMBER, hb)
                return jnp.max(filled, axis=0, keepdims=True)   # (1, D)

            h_rows.append(pool_k(0))
            s_rows.append(pool_k(1))
            o_rows.append(pool_k(2))
        h_out = jnp.concatenate(h_rows, axis=0)            # (B, D)
        subj_out = jnp.concatenate(s_rows, axis=0)
        obj_out = jnp.concatenate(o_rows, axis=0)
        hout_ref[...] = h_out

        # out_mlp[0] on the concat [h, subj, obj] without a lane concat
        out = (jnp.dot(h_out, w1a_ref[...], preferred_element_type=jnp.float32)
               + jnp.dot(subj_out, w1b_ref[...],
                         preferred_element_type=jnp.float32)
               + jnp.dot(obj_out, w1c_ref[...],
                         preferred_element_type=jnp.float32)
               + b1_ref[...])
        out = jnp.maximum(out, 0.0)
        for w_ref, b_ref in extra:
            out = jnp.maximum(
                jnp.dot(out, w_ref[...], preferred_element_type=jnp.float32)
                + b_ref[...], 0.0)
        logits_ref[...] = (jnp.dot(out, wcls_ref[...],
                                   preferred_element_type=jnp.float32)
                           + bcls_ref[...])
    return kernel


def head_fused(layer12_flat, cg_flat, masks_flat, agg_params, mlp_params,
               cls_params, B, L, D):
    w_agg = agg_params["w"]                 # (3D, D)
    w12, wcg = w_agg[:2 * D], w_agg[2 * D:]
    bagg = agg_params["b"].reshape(1, D)
    w1 = mlp_params[0]["w"]                 # (3D, D) split for [h, subj, obj]
    b1 = mlp_params[0]["b"].reshape(1, -1)
    args = [layer12_flat, cg_flat, masks_flat, w12, wcg, bagg,
            w1[:D], w1[D:2 * D], w1[2 * D:], b1]
    for mp in mlp_params[1:]:
        args += [mp["w"], mp["b"].reshape(1, -1)]
    args += [cls_params["w"], cls_params["b"].reshape(1, -1)]
    num_class = cls_params["w"].shape[1]
    return pl.pallas_call(
        _make_head_kernel(len(mlp_params) - 1, B, L),
        out_shape=(jax.ShapeDtypeStruct((B, num_class), jnp.float32),
                   jax.ShapeDtypeStruct((B, D), jnp.float32)),
    )(*args)


# ----------------------------------------------------------------------------
# Parameters (deterministic synthetic init, matches module structure)
# ----------------------------------------------------------------------------
def init_params(key, *, mem_dim, pos_dim, bert_dim, num_pos, sublayer_first,
                sublayer_second, mlp_layers, num_class):
    keys = list(jax.random.split(key, 64))
    kit = iter(keys)

    def glorot(shape):
        std = math.sqrt(6.0 / (shape[0] + shape[1]))
        return jax.random.uniform(next(kit), shape, jnp.float32, -std, std)

    def lin(in_d, out_d):
        return {"w": glorot((in_d, out_d)),
                "b": jnp.zeros((out_d,), jnp.float32)}

    def gcl(layers):
        head_dim = mem_dim // layers
        return {
            "weight_list": [lin(mem_dim + head_dim * i, head_dim)
                            for i in range(layers)],
            "linear": lin(mem_dim, mem_dim),
        }

    def egat(in_ch, out_ch, edge_dim):
        return {
            "weight": glorot((in_ch, out_ch)),               # heads = 1
            "att": glorot((1, 2 * out_ch + edge_dim)),
            "edge_update": glorot((out_ch + edge_dim, out_ch)),
            "bias": jnp.zeros((out_ch,), jnp.float32),
        }

    gat_hidden = mem_dim // 2
    in_dim = bert_dim + pos_dim
    params = {
        "pos_emb": glorot((num_pos, pos_dim)),
        "input_W_G": lin(in_dim, mem_dim),
        "gcl1": gcl(sublayer_first),
        "gcl2": gcl(sublayer_second),
        "egat1": egat(mem_dim, gat_hidden, 1),
        "egat2": egat(mem_dim + gat_hidden, gat_hidden, 1),
        "egat11": egat(mem_dim, gat_hidden, 1),
        "egat22": egat(mem_dim + gat_hidden, gat_hidden, 1),
        "cg_linear": lin(2 * mem_dim, mem_dim),
        "aggregate_W": lin(2 * mem_dim + mem_dim, mem_dim),
        "classifier": lin(mem_dim, num_class),
    }
    mlps = [lin(mem_dim * 3, mem_dim)]
    for _ in range(mlp_layers - 1):
        mlps.append(lin(mem_dim, mem_dim))
    params["out_mlp"] = mlps
    return params


# ----------------------------------------------------------------------------
# Full forward pass
# ----------------------------------------------------------------------------
def gcn_classifier_forward(params, bert_embs, pos, subj_pos, obj_pos,
                           adj, src, dst, valid, edge_attr):
    B, L, bert_dim = bert_embs.shape
    D = params["input_W_G"]["w"].shape[1]

    # input_W_G (in_drop is identity in eval mode)
    pos_e = jnp.take(params["pos_emb"], pos, axis=0)            # (B, L, pdim)
    gcn_in_flat = input_linear(bert_embs.reshape(B * L, bert_dim),
                               pos_e.reshape(B * L, -1),
                               params["input_W_G"]["w"],
                               params["input_W_G"]["b"], bert_dim)
    gcn_inputs = gcn_in_flat.reshape(B, L, D)

    # DCGCN blocks (layers[0], layers[1]) fused -> (B, L, 2D) = [out1 | out2]
    layer12 = gcn_blocks(adj, gcn_inputs, params["gcl1"], params["gcl2"])

    # Both dense Edge-GAT blocks + cg_linear fused -> (B*L, D), kept flat
    cg_flat = gat_blocks(gcn_in_flat, src, dst, valid, edge_attr, params, D)

    # pooling masks (1.0 == masked out), stacked so the head reads h once
    pool_mask = ((adj.sum(axis=2) + adj.sum(axis=1)) == 0).astype(jnp.float32)
    subj_mask = (subj_pos != 0).astype(jnp.float32)
    obj_mask = (obj_pos != 0).astype(jnp.float32)
    masks_flat = jnp.stack([pool_mask, subj_mask, obj_mask],
                           axis=2).reshape(B * L, 3)

    # aggregate_W + three max-pools + out_mlp + classifier fused
    logits, h_out = head_fused(layer12.reshape(B * L, 2 * D), cg_flat,
                               masks_flat, params["aggregate_W"],
                               params["out_mlp"], params["classifier"],
                               B, L, D)
    return logits, h_out


# ----------------------------------------------------------------------------
# Graph preprocessing (host-side glue, same role as in the PyTorch model)
# ----------------------------------------------------------------------------
def build_graph_inputs(words_np, heads_np, lens, p_i_dict, p_i_j_dict, B, L):
    node_index_dict = {}
    source, target, source1, target1 = [], [], [], []
    for i in range(B):
        words_list = [int(w) for w in words_np[i][:lens[i]]]
        head_list = [int(h) for h in heads_np[i][:lens[i]]]
        src_tmp, tgt_tmp = [], []
        for j in range(len(words_list)):
            if words_list[j] not in node_index_dict:
                node_index_dict[words_list[j]] = len(node_index_dict)
            if head_list[j] < len(words_list):
                if words_list[j] != words_list[head_list[j]]:
                    src_tmp.append(words_list[j])
                    source1.append(words_list[j])
                    tgt_tmp.append(words_list[head_list[j]])
                    target1.append(words_list[head_list[j]])
        for term in src_tmp:
            source.append(node_index_dict[term])
        for term in tgt_tmp:
            target.append(node_index_dict[term])

    edge_weights = []
    for j in range(len(source1)):
        pij = p_i_j_dict.get((source1[j], target1[j]))
        pi = p_i_dict.get(source1[j])
        pj = p_i_dict.get(target1[j])
        if pij is not None and pi is not None and (pj is not None):
            pmi = round(math.log(pij / pi * pj), 1)
            edge_weights.append([pmi] if pmi > 0 else [0])
        else:
            edge_weights.append([0])

    src = np.asarray(source, dtype=np.int64)
    dst = np.asarray(target, dtype=np.int64)
    # edge_weight is cast to LongTensor in the original model.
    ew = np.asarray(edge_weights, dtype=np.float64).astype(np.int64)
    ew = ew.astype(np.float32).reshape(-1, 1)

    # remove_self_loops + add_self_loops(num_nodes = B*L), self-loop attr = 0
    keep = src != dst
    src, dst, ew = src[keep], dst[keep], ew[keep]
    N = B * L
    src = np.concatenate([src, np.arange(N, dtype=np.int64)])
    dst = np.concatenate([dst, np.arange(N, dtype=np.int64)])
    edge_attr = np.concatenate([ew, np.zeros((N, 1), np.float32)], axis=0)

    # pad edge count to a multiple of 8; padded edges are masked out in-kernel
    E = src.shape[0]
    E_pad = ((E + 7) // 8) * 8
    pad = E_pad - E
    src_p = np.concatenate([src, np.zeros(pad, np.int64)]).astype(np.int32)
    dst_p = np.concatenate([dst, np.zeros(pad, np.int64)]).astype(np.int32)
    valid = np.concatenate([np.ones(E, np.float32),
                            np.zeros(pad, np.float32)])
    ea_p = np.concatenate([edge_attr, np.zeros((pad, 1), np.float32)], axis=0)

    # TODO(synk): head_to_tree/tree_to_adj are not in the provided source;
    # adjacency is built directly from 0-indexed heads (undirected, no loops).
    adj = np.zeros((B, L, L), dtype=np.float32)
    for i in range(B):
        for j in range(lens[i]):
            h = int(heads_np[i][j])
            if h != j and h < lens[i]:
                adj[i, j, h] = 1.0
                adj[i, h, j] = 1.0

    return (jnp.asarray(adj),
            jnp.asarray(src_p.reshape(-1, 1)),
            jnp.asarray(dst_p.reshape(-1, 1)),
            jnp.asarray(valid.reshape(-1, 1)),
            jnp.asarray(ea_p))


# ----------------------------------------------------------------------------
if __name__ == "__main__":
    B, L = 2, 8
    hidden_dim = 32          # mem_dim
    pos_dim = 4
    bert_dim = 1024          # hard-coded in CGCNCGAT
    num_pos = 10
    num_class = 5
    vocab_size = 20
    sublayer_first = 2
    sublayer_second = 2
    mlp_layers = 2

    key = jax.random.PRNGKey(0)
    k_params, k_bert, k_words, k_pos, k_heads = jax.random.split(key, 5)

    params = init_params(
        k_params, mem_dim=hidden_dim, pos_dim=pos_dim, bert_dim=bert_dim,
        num_pos=num_pos, sublayer_first=sublayer_first,
        sublayer_second=sublayer_second, mlp_layers=mlp_layers,
        num_class=num_class)

    # Synthetic inputs (deterministic).
    lens = [8, 6]
    words = np.array(jax.random.randint(k_words, (B, L), 1, vocab_size))
    pos = np.array(jax.random.randint(k_pos, (B, L), 0, num_pos))
    heads = np.array(jax.random.randint(k_heads, (B, L), 0, max(lens)))
    for i in range(B):
        heads[i, 0] = 0                              # root points to itself
        heads[i] = np.minimum(heads[i], lens[i] - 1)
        words[i, lens[i]:] = PAD_ID                  # pad
        pos[i, lens[i]:] = 0
    bert_embs = jax.random.normal(k_bert, (B, L, bert_dim), jnp.float32)

    subj_pos = np.tile(np.arange(L), (B, 1)) - 1     # subject at position 1
    obj_pos = np.tile(np.arange(L), (B, 1)) - 4      # object at position 4

    # Simple PMI statistics dictionaries.
    p_i_dict = {w: 0.1 for w in range(vocab_size)}
    p_i_j_dict = {(a, b): 3.0 for a in range(vocab_size)
                  for b in range(vocab_size)}

    adj, src, dst, valid, edge_attr = build_graph_inputs(
        words, heads, lens, p_i_dict, p_i_j_dict, B, L)

    fwd = jax.jit(gcn_classifier_forward)
    logits, pooling_output = fwd(
        params, bert_embs, jnp.asarray(pos), jnp.asarray(subj_pos),
        jnp.asarray(obj_pos), adj, src, dst, valid, edge_attr)

    logits = jax.block_until_ready(logits)
    pooling_output = jax.block_until_ready(pooling_output)

    assert logits.shape == (B, num_class)
    assert pooling_output.shape == (B, hidden_dim)
    assert np.all(np.isfinite(np.array(logits)))
    assert np.all(np.isfinite(np.array(pooling_output)))
    print("KERNEL_OK")
</pallas_src>

<mosaic_0001>
module attributes {stable_mosaic.version = 11 : i64} {
  func.func @_input_linear_kernel(%arg0: i32, %arg1: memref<8x1024xf32, #tpu.memory_space<vmem>>, %arg2: memref<8x4xf32, #tpu.memory_space<vmem>>, %arg3: memref<1024x32xf32, #tpu.memory_space<vmem>>, %arg4: memref<4x32xf32, #tpu.memory_space<vmem>>, %arg5: memref<1x32xf32, #tpu.memory_space<vmem>>, %arg6: memref<8x32xf32, #tpu.memory_space<vmem>>) attributes {dimension_semantics = [#tpu.dimension_semantics<parallel>], iteration_bounds = array<i64: 2>, scalar_prefetch = 0 : i64, scratch_operands = 0 : i64, tpu.core_type = #tpu.core_type<tc>, window_params = [{transform_indices = @transform_0, window_bounds = array<i64: 8, 1024>}, {transform_indices = @transform_1, window_bounds = array<i64: 8, 4>}, {pipeline_mode = #tpu.pipeline_mode<synchronous>, transform_indices = @transform_2, window_bounds = array<i64: 1024, 32>}, {pipeline_mode = #tpu.pipeline_mode<synchronous>, transform_indices = @transform_3, window_bounds = array<i64: 4, 32>}, {pipeline_mode = #tpu.pipeline_mode<synchronous>, transform_indices = @transform_4, window_bounds = array<i64: 1, 32>}, {transform_indices = @transform_5, window_bounds = array<i64: 8, 32>}]} {
    %c0 = arith.constant 0 : index
    %c0_0 = arith.constant 0 : index
    %0 = vector.load %arg1[%c0, %c0_0] : memref<8x1024xf32, #tpu.memory_space<vmem>>, vector<8x1024xf32>
    %c0_1 = arith.constant 0 : index
    %c0_2 = arith.constant 0 : index
    %1 = vector.load %arg3[%c0_1, %c0_2] : memref<1024x32xf32, #tpu.memory_space<vmem>>, vector<1024x32xf32>
    %cst = arith.constant dense<0.000000e+00> : vector<8x32xf32>
    %2 = tpu.matmul %0, %1, %cst {dimension_numbers = #tpu.dot_dimension_numbers<[1], [0], [0], [1], [0, 0, 1, 1], [], []>} : vector<8x1024xf32>, vector<1024x32xf32>, vector<8x32xf32> -> vector<8x32xf32>
    %c0_3 = arith.constant 0 : index
    %c0_4 = arith.constant 0 : index
    %3 = vector.load %arg2[%c0_3, %c0_4] : memref<8x4xf32, #tpu.memory_space<vmem>>, vector<8x4xf32>
    %c0_5 = arith.constant 0 : index
    %c0_6 = arith.constant 0 : index
    %4 = vector.load %arg4[%c0_5, %c0_6] : memref<4x32xf32, #tpu.memory_space<vmem>>, vector<4x32xf32>
    %cst_7 = arith.constant dense<0.000000e+00> : vector<8x32xf32>
    %5 = tpu.matmul %3, %4, %cst_7 {dimension_numbers = #tpu.dot_dimension_numbers<[1], [0], [0], [1], [0, 0, 1, 1], [], []>} : vector<8x4xf32>, vector<4x32xf32>, vector<8x32xf32> -> vector<8x32xf32>
    %6 = arith.addf %2, %5 : vector<8x32xf32>
    %c0_8 = arith.constant 0 : index
    %c0_9 = arith.constant 0 : index
    %7 = vector.load %arg5[%c0_8, %c0_9] : memref<1x32xf32, #tpu.memory_space<vmem>>, vector<1x32xf32>
    %8 = vector.broadcast %7 : vector<1x32xf32> to vector<8x32xf32>
    %9 = arith.addf %6, %8 : vector<8x32xf32>
    %c0_10 = arith.constant 0 : index
    %c0_11 = arith.constant 0 : index
    %10 = vector.load %arg6[%c0_10, %c0_11] : memref<8x32xf32, #tpu.memory_space<vmem>>, vector<8x32xf32>
    tpu.vector_store %arg6[%c0_10, %c0_11], %9 {strides = array<i32>} : memref<8x32xf32, #tpu.memory_space<vmem>>, vector<8x32xf32>,
    return
  }
  func.func @transform_0(%arg0: i32) -> (i32, i32) {
    %c0_i32 = arith.constant 0 : i32
    %c0_i32_0 = arith.constant 0 : i32
    return %arg0, %c0_i32 : i32, i32
  }
  func.func @transform_1(%arg0: i32) -> (i32, i32) {
    %c0_i32 = arith.constant 0 : i32
    %c0_i32_0 = arith.constant 0 : i32
    return %arg0, %c0_i32 : i32, i32
  }
  func.func @transform_2(%arg0: i32) -> (i32, i32) {
    %c0_i32 = arith.constant 0 : i32
    %c0_i32_0 = arith.constant 0 : i32
    %c0_i32_1 = arith.constant 0 : i32
    return %c0_i32, %c0_i32_0 : i32, i32
  }
  func.func @transform_3(%arg0: i32) -> (i32, i32) {
    %c0_i32 = arith.constant 0 : i32
    %c0_i32_0 = arith.constant 0 : i32
    %c0_i32_1 = arith.constant 0 : i32
    return %c0_i32, %c0_i32_0 : i32, i32
  }
  func.func @transform_4(%arg0: i32) -> (i32, i32) {
    %c0_i32 = arith.constant 0 : i32
    %c0_i32_0 = arith.constant 0 : i32
    %c0_i32_1 = arith.constant 0 : i32
    return %c0_i32, %c0_i32_0 : i32, i32
  }
  func.func @transform_5(%arg0: i32) -> (i32, i32) {
    %c0_i32 = arith.constant 0 : i32
    %c0_i32_0 = arith.constant 0 : i32
    return %arg0, %c0_i32 : i32, i32
  }
}

module attributes {stable_mosaic.version = 11 : i64} {
  func.func @kernel(%arg0: i32, %arg1: memref<1x8x8xf32, #tpu.memory_space<vmem>>, %arg2: memref<1x8x32xf32, #tpu.memory_space<vmem>>, %arg3: memref<32x16xf32, #tpu.memory_space<vmem>>, %arg4: memref<1x16xf32, #tpu.memory_space<vmem>>, %arg5: memref<48x16xf32, #tpu.memory_space<vmem>>, %arg6: memref<1x16xf32, #tpu.memory_space<vmem>>, %arg7: memref<32x32xf32, #tpu.memory_space<vmem>>, %arg8: memref<1x32xf32, #tpu.memory_space<vmem>>, %arg9: memref<32x16xf32, #tpu.memory_space<vmem>>, %arg10: memref<1x16xf32, #tpu.memory_space<vmem>>, %arg11: memref<48x16xf32, #tpu.memory_space<vmem>>, %arg12: memref<1x16xf32, #tpu.memory_space<vmem>>, %arg13: memref<32x32xf32, #tpu.memory_space<vmem>>, %arg14: memref<1x32xf32, #tpu.memory_space<vmem>>, %arg15: memref<1x8x64xf32, #tpu.memory_space<vmem>>, %arg16: memref<8x64xf32, #tpu.memory_space<vmem>>) attributes {dimension_semantics = [#tpu.dimension_semantics<parallel>], iteration_bounds = array<i64: 2>, scalar_prefetch = 0 : i64, scratch_operands = 1 : i64, tpu.core_type = #tpu.core_type<tc>, window_params = [{transform_indices = @transform_0, window_bounds = array<i64: 1, 8, 8>}, {transform_indices = @transform_1, window_bounds = array<i64: 1, 8, 32>}, {pipeline_mode = #tpu.pipeline_mode<synchronous>, transform_indices = @transform_2, window_bounds = array<i64: 32, 16>}, {pipeline_mode = #tpu.pipeline_mode<synchronous>, transform_indices = @transform_3, window_bounds = array<i64: 1, 16>}, {pipeline_mode = #tpu.pipeline_mode<synchronous>, transform_indices = @transform_4, window_bounds = array<i64: 48, 16>}, {pipeline_mode = #tpu.pipeline_mode<synchronous>, transform_indices = @transform_5, window_bounds = array<i64: 1, 16>}, {pipeline_mode = #tpu.pipeline_mode<synchronous>, transform_indices = @transform_6, window_bounds = array<i64: 32, 32>}, {pipeline_mode = #tpu.pipeline_mode<synchronous>, transform_indices = @transform_7, window_bounds = array<i64: 1, 32>}, {pipeline_mode = #tpu.pipeline_mode<synchronous>, transform_indices = @transform_8, window_bounds = array<i64: 32, 16>}, {pipeline_mode = #tpu.pipeline_mode<synchronous>, transform_indices = @transform_9, window_bounds = array<i64: 1, 16>}, {pipeline_mode = #tpu.pipeline_mode<synchronous>, transform_indices = @transform_10, window_bounds = array<i64: 48, 16>}, {pipeline_mode = #tpu.pipeline_mode<synchronous>, transform_indices = @transform_11, window_bounds = array<i64: 1, 16>}, {pipeline_mode = #tpu.pipeline_mode<synchronous>, transform_indices = @transform_12, window_bounds = array<i64: 32, 32>}, {pipeline_mode = #tpu.pipeline_mode<synchronous>, transform_indices = @transform_13, window_bounds = array<i64: 1, 32>}, {transform_indices = @transform_14, window_bounds = array<i64: 1, 8, 64>}]} {
    %c0 = arith.constant 0 : index
    %c0_0 = arith.constant 0 : index
    %c0_1 = arith.constant 0 : index
    %0 = vector.load %arg1[%c0, %c0_0, %c0_1] : memref<1x8x8xf32, #tpu.memory_space<vmem>>, vector<1x8x8xf32>
    %1 = vector.shape_cast %0 : vector<1x8x8xf32> to vector<8x8xf32>
    %c0_2 = arith.constant 0 : index
    %c0_3 = arith.constant 0 : index
    %c0_4 = arith.constant 0 : index
    %2 = vector.load %arg2[%c0_2, %c0_3, %c0_4] : memref<1x8x32xf32, #tpu.memory_space<vmem>>, vector<1x8x32xf32>
    %3 = vector.shape_cast %2 : vector<1x8x32xf32> to vector<8x32xf32>
    %cst = arith.constant dense<0.000000e+00> : vector<8xf32>
    %4 = vector.multi_reduction <add>, %1, %cst [1] : vector<8x8xf32> to vector<8xf32>
    %5 = vector.shape_cast %4 : vector<8xf32> to vector<8x1xf32>
    %cst_5 = arith.constant 1.000000e+00 : f32
    %6 = vector.broadcast %cst_5 : f32 to vector<8x1xf32>
    %7 = arith.addf %5, %6 : vector<8x1xf32>
    %c0_6 = arith.constant 0 : index
    %c0_7 = arith.constant 0 : index
    %8 = vector.load %arg16[%c0_6, %c0_7] : memref<8x64xf32, #tpu.memory_space<vmem>>, vector<8x32xf32>
    tpu.vector_store %arg16[%c0_6, %c0_7], %3 {strides = array<i32>} : memref<8x64xf32, #tpu.memory_space<vmem>>, vector<8x32xf32>,
    %c0_8 = arith.constant 0 : index
    %c0_9 = arith.constant 0 : index
    %9 = vector.load %arg16[%c0_8, %c0_9] : memref<8x64xf32, #tpu.memory_space<vmem>>, vector<8x32xf32>
    %cst_10 = arith.constant dense<0.000000e+00> : vector<8x32xf32>
    %10 = tpu.matmul %1, %9, %cst_10 {dimension_numbers = #tpu.dot_dimension_numbers<[1], [0], [0], [1], [0, 0, 1, 1], [], []>} : vector<8x8xf32>, vector<8x32xf32>, vector<8x32xf32> -> vector<8x32xf32>
    %11 = arith.addf %10, %9 : vector<8x32xf32>
    %c0_11 = arith.constant 0 : index
    %c0_12 = arith.constant 0 : index
    %12 = vector.load %arg3[%c0_11, %c0_12] : memref<32x16xf32, #tpu.memory_space<vmem>>, vector<32x16xf32>
    %cst_13 = arith.constant dense<0.000000e+00> : vector<8x16xf32>
    %13 = tpu.matmul %11, %12, %cst_13 {dimension_numbers = #tpu.dot_dimension_numbers<[1], [0], [0], [1], [0, 0, 1, 1], [], []>} : vector<8x32xf32>, vector<32x16xf32>, vector<8x16xf32> -> vector<8x16xf32>
    %c0_14 = arith.constant 0 : index
    %c0_15 = arith.constant 0 : index
    %14 = vector.load %arg4[%c0_14, %c0_15] : memref<1x16xf32, #tpu.memory_space<vmem>>, vector<1x16xf32>
    %cst_16 = arith.constant 2.000000e+00 : f32
    %15 = vector.broadcast %cst_16 : f32 to vector<1x16xf32>
    %16 = arith.mulf %15, %14 : vector<1x16xf32>
    %17 = vector.broadcast %16 : vector<1x16xf32> to vector<8x16xf32>
    %18 = arith.addf %13, %17 : vector<8x16xf32>
    %19 = vector.broadcast %7 : vector<8x1xf32> to vector<8x16xf32>
    %20 = arith.divf %18, %19 : vector<8x16xf32>
    %cst_17 = arith.constant 0.000000e+00 : f32
    %21 = vector.broadcast %cst_17 : f32 to vector<8x16xf32>
    %22 = arith.maximumf %20, %21 : vector<8x16xf32>
    %c0_18 = arith.constant 0 : index
    %c32 = arith.constant 32 : index
    %23 = vector.load %arg16[%c0_18, %c32] : memref<8x64xf32, #tpu.memory_space<vmem>>, vector<8x16xf32>
    tpu.vector_store %arg16[%c0_18, %c32], %22 {strides = array<i32>} : memref<8x64xf32, #tpu.memory_space<vmem>>, vector<8x16xf32>,
    %c0_19 = arith.constant 0 : index
    %c0_20 = arith.constant 0 : index
    %24 = vector.load %arg16[%c0_19, %c0_20] : memref<8x64xf32, #tpu.memory_space<vmem>>, vector<8x48xf32>
    %cst_21 = arith.constant dense<0.000000e+00> : vector<8x48xf32>
    %25 = tpu.matmul %1, %24, %cst_21 {dimension_numbers = #tpu.dot_dimension_numbers<[1], [0], [0], [1], [0, 0, 1, 1], [], []>} : vector<8x8xf32>, vector<8x48xf32>, vector<8x48xf32> -> vector<8x48xf32>
    %26 = arith.addf %25, %24 : vector<8x48xf32>
    %c0_22 = arith.constant 0 : index
    %c0_23 = arith.constant 0 : index
    %27 = vector.load %arg5[%c0_22, %c0_23] : memref<48x16xf32, #tpu.memory_space<vmem>>, vector<48x16xf32>
    %cst_24 = arith.constant dense<0.000000e+00> : vector<8x16xf32>
    %28 = tpu.matmul %26, %27, %cst_24 {dimension_numbers = #tpu.dot_dimension_numbers<[1], [0], [0], [1], [0, 0, 1, 1], [], []>} : vector<8x48xf32>, vector<48x16xf32>, vector<8x16xf32> -> vector<8x16xf32>
    %c0_25 = arith.constant 0 : index
    %c0_26 = arith.constant 0 : index
    %29 = vector.load %arg6[%c0_25, %c0_26] : memref<1x16xf32, #tpu.memory_space<vmem>>, vector<1x16xf32>
    %cst_27 = arith.constant 2.000000e+00 : f32
    %30 = vector.broadcast %cst_27 : f32 to vector<1x16xf32>
    %31 = arith.mulf %30, %29 : vector<1x16xf32>
    %32 = vector.broadcast %31 : vector<1x16xf32> to vector<8x16xf32>
    %33 = arith.addf %28, %32 : vector<8x16xf32>
    %34 = vector.broadcast %7 : vector<8x1xf32> to vector<8x16xf32>
    %35 = arith.divf %33, %34 : vector<8x16xf32>
    %cst_28 = arith.constant 0.000000e+00 : f32
    %36 = vector.broadcast %cst_28 : f32 to vector<8x16xf32>
    %37 = arith.maximumf %35, %36 : vector<8x16xf32>
    %c0_29 = arith.constant 0 : index
    %c48 = arith.constant 48 : index
    %38 = vector.load %arg16[%c0_29, %c48] : memref<8x64xf32, #tpu.memory_space<vmem>>, vector<8x16xf32>
    tpu.vector_store %arg16[%c0_29, %c48], %37 {strides = array<i32>} : memref<8x64xf32, #tpu.memory_space<vmem>>, vector<8x16xf32>,
    %c0_30 = arith.constant 0 : index
    %c32_31 = arith.constant 32 : index
    %39 = vector.load %arg16[%c0_30, %c32_31] : memref<8x64xf32, #tpu.memory_space<vmem>>, vector<8x32xf32>
    %40 = arith.addf %39, %3 : vector<8x32xf32>
    %c0_32 = arith.constant 0 : index
    %c0_33 = arith.constant 0 : index
    %41 = vector.load %arg7[%c0_32, %c0_33] : memref<32x32xf32, #tpu.memory_space<vmem>>, vector<32x32xf32>
    %cst_34 = arith.constant dense<0.000000e+00> : vector<8x32xf32>
    %42 = tpu.matmul %40, %41, %cst_34 {dimension_numbers = #tpu.dot_dimension_numbers<[1], [0], [0], [1], [0, 0, 1, 1], [], []>} : vector<8x32xf32>, vector<32x32xf32>, vector<8x32xf32> -> vector<8x32xf32>
    %c0_35 = arith.constant 0 : index
    %c0_36 = arith.constant 0 : index
    %43 = vector.load %arg8[%c0_35, %c0_36] : memref<1x32xf32, #tpu.memory_space<vmem>>, vector<1x32xf32>
    %44 = vector.broadcast %43 : vector<1x32xf32> to vector<8x32xf32>
    %45 = arith.addf %42, %44 : vector<8x32xf32>
    %c0_37 = arith.constant 0 : index
    %c0_38 = arith.constant 0 : index
    %c0_39 = arith.constant 0 : index
    %46 = vector.load %arg15[%c0_37, %c0_38, %c0_39] : memref<1x8x64xf32, #tpu.memory_space<vmem>>, vector<1x8x32xf32>
    %47 = vector.shape_cast %46 : vector<1x8x32xf32> to vector<8x32xf32>
    %48 = vector.shape_cast %45 : vector<8x32xf32> to vector<1x8x32xf32>
    tpu.vector_store %arg15[%c0_37, %c0_38, %c0_39], %48 {strides = array<i32>} : memref<1x8x64xf32, #tpu.memory_space<vmem>>, vector<1x8x32xf32>,
    %c0_40 = arith.constant 0 : index
    %c0_41 = arith.constant 0 : index
    %49 = vector.load %arg16[%c0_40, %c0_41] : memref<8x64xf32, #tpu.memory_space<vmem>>, vector<8x32xf32>
    tpu.vector_store %arg16[%c0_40, %c0_41], %45 {strides = array<i32>} : memref<8x64xf32, #tpu.memory_space<vmem>>, vector<8x32xf32>,
    %c0_42 = arith.constant 0 : index
    %c0_43 = arith.constant 0 : index
    %50 = vector.load %arg16[%c0_42, %c0_43] : memref<8x64xf32, #tpu.memory_space<vmem>>, vector<8x32xf32>
    %cst_44 = arith.constant dense<0.000000e+00> : vector<8x32xf32>
    %51 = tpu.matmul %1, %50, %cst_44 {dimension_numbers = #tpu.dot_dimension_numbers<[1], [0], [0], [1], [0, 0, 1, 1], [], []>} : vector<8x8xf32>, vector<8x32xf32>, vector<8x32xf32> -> vector<8x32xf32>
    %52 = arith.addf %51, %50 : vector<8x32xf32>
    %c0_45 = arith.constant 0 : index
    %c0_46 = arith.constant 0 : index
    %53 = vector.load %arg9[%c0_45, %c0_46] : memref<32x16xf32, #tpu.memory_space<vmem>>, vector<32x16xf32>
    %cst_47 = arith.constant dense<0.000000e+00> : vector<8x16xf32>
    %54 = tpu.matmul %52, %53, %cst_47 {dimension_numbers = #tpu.dot_dimension_numbers<[1], [0], [0], [1], [0, 0, 1, 1], [], []>} : vector<8x32xf32>, vector<32x16xf32>, vector<8x16xf32> -> vector<8x16xf32>
    %c0_48 = arith.constant 0 : index
    %c0_49 = arith.constant 0 : index
    %55 = vector.load %arg10[%c0_48, %c0_49] : memref<1x16xf32, #tpu.memory_space<vmem>>, vector<1x16xf32>
    %cst_50 = arith.constant 2.000000e+00 : f32
    %56 = vector.broadcast %cst_50 : f32 to vector<1x16xf32>
    %57 = arith.mulf %56, %55 : vector<1x16xf32>
    %58 = vector.broadcast %57 : vector<1x16xf32> to vector<8x16xf32>
    %59 = arith.addf %54, %58 : vector<8x16xf32>
    %60 = vector.broadcast %7 : vector<8x1xf32> to vector<8x16xf32>
    %61 = arith.divf %59, %60 : vector<8x16xf32>
    %cst_51 = arith.constant 0.000000e+00 : f32
    %62 = vector.broadcast %cst_51 : f32 to vector<8x16xf32>
    %63 = arith.maximumf %61, %62 : vector<8x16xf32>
    %c0_52 = arith.constant 0 : index
    %c32_53 = arith.constant 32 : index
    %64 = vector.load %arg16[%c0_52, %c32_53] : memref<8x64xf32, #tpu.memory_space<vmem>>, vector<8x16xf32>
    tpu.vector_store %arg16[%c0_52, %c32_53], %63 {strides = array<i32>} : memref<8x64xf32, #tpu.memory_space<vmem>>, vector<8x16xf32>,
    %c0_54 = arith.constant 0 : index
    %c0_55 = arith.constant 0 : index
    %65 = vector.load %arg16[%c0_54, %c0_55] : memref<8x64xf32, #tpu.memory_space<vmem>>, vector<8x48xf32>
    %cst_56 = arith.constant dense<0.000000e+00> : vector<8x48xf32>
    %66 = tpu.matmul %1, %65, %cst_56 {dimension_numbers = #tpu.dot_dimension_numbers<[1], [0], [0], [1], [0, 0, 1, 1], [], []>} : vector<8x8xf32>, vector<8x48xf32>, vector<8x48xf32> -> vector<8x48xf32>
    %67 = arith.addf %66, %65 : vector<8x48xf32>
    %c0_57 = arith.constant 0 : index
    %c0_58 = arith.constant 0 : index
    %68 = vector.load %arg11[%c0_57, %c0_58] : memref<48x16xf32, #tpu.memory_space<vmem>>, vector<48x16xf32>
    %cst_59 = arith.constant dense<0.000000e+00> : vector<8x16xf32>
    %69 = tpu.matmul %67, %68, %cst_59 {dimension_numbers = #tpu.dot_dimension_numbers<[1], [0], [0], [1], [0, 0, 1, 1], [], []>} : vector<8x48xf32>, vector<48x16xf32>, vector<8x16xf32> -> vector<8x16xf32>
    %c0_60 = arith.constant 0 : index
    %c0_61 = arith.constant 0 : index
    %70 = vector.load %arg12[%c0_60, %c0_61] : memref<1x16xf32, #tpu.memory_space<vmem>>, vector<1x16xf32>
    %cst_62 = arith.constant 2.000000e+00 : f32
    %71 = vector.broadcast %cst_62 : f32 to vector<1x16xf32>
    %72 = arith.mulf %71, %70 : vector<1x16xf32>
    %73 = vector.broadcast %72 : vector<1x16xf32> to vector<8x16xf32>
    %74 = arith.addf %69, %73 : vector<8x16xf32>
    %75 = vector.broadcast %7 : vector<8x1xf32> to vector<8x16xf32>
    %76 = arith.divf %74, %75 : vector<8x16xf32>
    %cst_63 = arith.constant 0.000000e+00 : f32
    %77 = vector.broadcast %cst_63 : f32 to vector<8x16xf32>
    %78 = arith.maximumf %76, %77 : vector<8x16xf32>
    %c0_64 = arith.constant 0 : index
    %c48_65 = arith.constant 48 : index
    %79 = vector.load %arg16[%c0_64, %c48_65] : memref<8x64xf32, #tpu.memory_space<vmem>>, vector<8x16xf32>
    tpu.vector_store %arg16[%c0_64, %c48_65], %78 {strides = array<i32>} : memref<8x64xf32, #tpu.memory_space<vmem>>, vector<8x16xf32>,
    %c0_66 = arith.constant 0 : index
    %c32_67 = arith.constant 32 : index
    %80 = vector.load %arg16[%c0_66, %c32_67] : memref<8x64xf32, #tpu.memory_space<vmem>>, vector<8x32xf32>
    %81 = arith.addf %80, %45 : vector<8x32xf32>
    %c0_68 = arith.constant 0 : index
    %c0_69 = arith.constant 0 : index
    %82 = vector.load %arg13[%c0_68, %c0_69] : memref<32x32xf32, #tpu.memory_space<vmem>>, vector<32x32xf32>
    %cst_70 = arith.constant dense<0.000000e+00> : vector<8x32xf32>
    %83 = tpu.matmul %81, %82, %cst_70 {dimension_numbers = #tpu.dot_dimension_numbers<[1], [0], [0], [1], [0, 0, 1, 1], [], []>} : vector<8x32xf32>, vector<32x32xf32>, vector<8x32xf32> -> vector<8x32xf32>
    %c0_71 = arith.constant 0 : index
    %c0_72 = arith.constant 0 : index
    %84 = vector.load %arg14[%c0_71, %c0_72] : memref<1x32xf32, #tpu.memory_space<vmem>>, vector<1x32xf32>
    %85 = vector.broadcast %84 : vector<1x32xf32> to vector<8x32xf32>
    %86 = arith.addf %83, %85 : vector<8x32xf32>
    %c0_73 = arith.constant 0 : index
    %c0_74 = arith.constant 0 : index
    %c32_75 = arith.constant 32 : index
    %87 = vector.load %arg15[%c0_73, %c0_74, %c32_75] : memref<1x8x64xf32, #tpu.memory_space<vmem>>, vector<1x8x32xf32>
    %88 = vector.shape_cast %87 : vector<1x8x32xf32> to vector<8x32xf32>
    %89 = vector.shape_cast %86 : vector<8x32xf32> to vector<1x8x32xf32>
    tpu.vector_store %arg15[%c0_73, %c0_74, %c32_75], %89 {strides = array<i32>} : memref<1x8x64xf32, #tpu.memory_space<vmem>>, vector<1x8x32xf32>,
    return
  }
  func.func @transform_0(%arg0: i32) -> (i32, i32, i32) {
    %c0_i32 = arith.constant 0 : i32
    %c0_i32_0 = arith.constant 0 : i32
    %c0_i32_1 = arith.constant 0 : i32
    return %arg0, %c0_i32, %c0_i32_0 : i32, i32, i32
  }
  func.func @transform_1(%arg0: i32) -> (i32, i32, i32) {
    %c0_i32 = arith.constant 0 : i32
    %c0_i32_0 = arith.constant 0 : i32
    %c0_i32_1 = arith.constant 0 : i32
    return %arg0, %c0_i32, %c0_i32_0 : i32, i32, i32
  }
  func.func @transform_2(%arg0: i32) -> (i32, i32) {
    %c0_i32 = arith.constant 0 : i32
    %c0_i32_0 = arith.constant 0 : i32
    %c0_i32_1 = arith.constant 0 : i32
    return %c0_i32, %c0_i32_0 : i32, i32
  }
  func.func @transform_3(%arg0: i32) -> (i32, i32) {
    %c0_i32 = arith.constant 0 : i32
    %c0_i32_0 = arith.constant 0 : i32
    %c0_i32_1 = arith.constant 0 : i32
    return %c0_i32, %c0_i32_0 : i32, i32
  }
  func.func @transform_4(%arg0: i32) -> (i32, i32) {
    %c0_i32 = arith.constant 0 : i32
    %c0_i32_0 = arith.constant 0 : i32
    %c0_i32_1 = arith.constant 0 : i32
    return %c0_i32, %c0_i32_0 : i32, i32
  }
  func.func @transform_5(%arg0: i32) -> (i32, i32) {
    %c0_i32 = arith.constant 0 : i32
    %c0_i32_0 = arith.constant 0 : i32
    %c0_i32_1 = arith.constant 0 : i32
    return %c0_i32, %c0_i32_0 : i32, i32
  }
  func.func @transform_6(%arg0: i32) -> (i32, i32) {
    %c0_i32 = arith.constant 0 : i32
    %c0_i32_0 = arith.constant 0 : i32
    %c0_i32_1 = arith.constant 0 : i32
    return %c0_i32, %c0_i32_0 : i32, i32
  }
  func.func @transform_7(%arg0: i32) -> (i32, i32) {
    %c0_i32 = arith.constant 0 : i32
    %c0_i32_0 = arith.constant 0 : i32
    %c0_i32_1 = arith.constant 0 : i32
    return %c0_i32, %c0_i32_0 : i32, i32
  }
  func.func @transform_8(%arg0: i32) -> (i32, i32) {
    %c0_i32 = arith.constant 0 : i32
    %c0_i32_0 = arith.constant 0 : i32
    %c0_i32_1 = arith.constant 0 : i32
    return %c0_i32, %c0_i32_0 : i32, i32
  }
  func.func @transform_9(%arg0: i32) -> (i32, i32) {
    %c0_i32 = arith.constant 0 : i32
    %c0_i32_0 = arith.constant 0 : i32
    %c0_i32_1 = arith.constant 0 : i32
    return %c0_i32, %c0_i32_0 : i32, i32
  }
  func.func @transform_10(%arg0: i32) -> (i32, i32) {
    %c0_i32 = arith.constant 0 : i32
    %c0_i32_0 = arith.constant 0 : i32
    %c0_i32_1 = arith.constant 0 : i32
    return %c0_i32, %c0_i32_0 : i32, i32
  }
  func.func @transform_11(%arg0: i32) -> (i32, i32) {
    %c0_i32 = arith.constant 0 : i32
    %c0_i32_0 = arith.constant 0 : i32
    %c0_i32_1 = arith.constant 0 : i32
    return %c0_i32, %c0_i32_0 : i32, i32
  }
  func.func @transform_12(%arg0: i32) -> (i32, i32) {
    %c0_i32 = arith.constant 0 : i32
    %c0_i32_0 = arith.constant 0 : i32
    %c0_i32_1 = arith.constant 0 : i32
    return %c0_i32, %c0_i32_0 : i32, i32
  }
  func.func @transform_13(%arg0: i32) -> (i32, i32) {
    %c0_i32 = arith.constant 0 : i32
    %c0_i32_0 = arith.constant 0 : i32
    %c0_i32_1 = arith.constant 0 : i32
    return %c0_i32, %c0_i32_0 : i32, i32
  }
  func.func @transform_14(%arg0: i32) -> (i32, i32, i32) {
    %c0_i32 = arith.constant 0 : i32
    %c0_i32_0 = arith.constant 0 : i32
    %c0_i32_1 = arith.constant 0 : i32
    return %arg0, %c0_i32, %c0_i32_0 : i32, i32, i32
  }
}

module attributes {stable_mosaic.version = 11 : i64} {
  func.func @kernel(%arg0: memref<16x32xf32, #tpu.memory_space<vmem>>, %arg1: memref<24x1xi32, #tpu.memory_space<vmem>>, %arg2: memref<24x1xi32, #tpu.memory_space<vmem>>, %arg3: memref<24x1xf32, #tpu.memory_space<vmem>>, %arg4: memref<24x1xf32, #tpu.memory_space<vmem>>, %arg5: memref<32x16xf32, #tpu.memory_space<vmem>>, %arg6: memref<16x1xf32, #tpu.memory_space<vmem>>, %arg7: memref<16x1xf32, #tpu.memory_space<vmem>>, %arg8: memref<1x1xf32, #tpu.memory_space<vmem>>, %arg9: memref<16x16xf32, #tpu.memory_space<vmem>>, %arg10: memref<1x16xf32, #tpu.memory_space<vmem>>, %arg11: memref<1x16xf32, #tpu.memory_space<vmem>>, %arg12: memref<32x16xf32, #tpu.memory_space<vmem>>, %arg13: memref<16x16xf32, #tpu.memory_space<vmem>>, %arg14: memref<16x1xf32, #tpu.memory_space<vmem>>, %arg15: memref<16x1xf32, #tpu.memory_space<vmem>>, %arg16: memref<1x1xf32, #tpu.memory_space<vmem>>, %arg17: memref<16x16xf32, #tpu.memory_space<vmem>>, %arg18: memref<1x16xf32, #tpu.memory_space<vmem>>, %arg19: memref<1x16xf32, #tpu.memory_space<vmem>>, %arg20: memref<32x16xf32, #tpu.memory_space<vmem>>, %arg21: memref<16x1xf32, #tpu.memory_space<vmem>>, %arg22: memref<16x1xf32, #tpu.memory_space<vmem>>, %arg23: memref<1x1xf32, #tpu.memory_space<vmem>>, %arg24: memref<16x16xf32, #tpu.memory_space<vmem>>, %arg25: memref<1x16xf32, #tpu.memory_space<vmem>>, %arg26: memref<1x16xf32, #tpu.memory_space<vmem>>, %arg27: memref<32x16xf32, #tpu.memory_space<vmem>>, %arg28: memref<16x16xf32, #tpu.memory_space<vmem>>, %arg29: memref<16x1xf32, #tpu.memory_space<vmem>>, %arg30: memref<16x1xf32, #tpu.memory_space<vmem>>, %arg31: memref<1x1xf32, #tpu.memory_space<vmem>>, %arg32: memref<16x16xf32, #tpu.memory_space<vmem>>, %arg33: memref<1x16xf32, #tpu.memory_space<vmem>>, %arg34: memref<1x16xf32, #tpu.memory_space<vmem>>, %arg35: memref<16x32xf32, #tpu.memory_space<vmem>>, %arg36: memref<16x32xf32, #tpu.memory_space<vmem>>, %arg37: memref<16x32xf32, #tpu.memory_space<vmem>>, %arg38: memref<16x32xf32, #tpu.memory_space<vmem>>, %arg39: memref<32x32xf32, #tpu.memory_space<vmem>>, %arg40: memref<1x32xf32, #tpu.memory_space<vmem>>, %arg41: memref<16x32xf32, #tpu.memory_space<vmem>>) attributes {dimension_semantics = [], scalar_prefetch = 0 : i64, scratch_operands = 0 : i64, tpu.core_type = #tpu.core_type<tc>} {
    %c0 = arith.constant 0 : index
    %c0_0 = arith.constant 0 : index
    %0 = vector.load %arg0[%c0, %c0_0] : memref<16x32xf32, #tpu.memory_space<vmem>>, vector<16x32xf32>
    %1 = tpu.iota {dimensions = array<i32: 1>} : vector<24x16xi32>
    %c0_1 = arith.constant 0 : index
    %c0_2 = arith.constant 0 : index
    %2 = vector.load %arg3[%c0_1, %c0_2] : memref<24x1xf32, #tpu.memory_space<vmem>>, vector<24x1xf32>
    %c0_3 = arith.constant 0 : index
    %c0_4 = arith.constant 0 : index
    %3 = vector.load %arg1[%c0_3, %c0_4] : memref<24x1xi32, #tpu.memory_space<vmem>>, vector<24x1xi32>
    %4 = vector.broadcast %3 : vector<24x1xi32> to vector<24x16xi32>
    %5 = arith.cmpi eq, %1, %4 : vector<24x16xi32>
    %6 = arith.extui %5 : vector<24x16xi1> to vector<24x16xi32>
    %7 = arith.sitofp %6 : vector<24x16xi32> to vector<24x16xf32>
    %c0_5 = arith.constant 0 : index
    %c0_6 = arith.constant 0 : index
    %8 = vector.load %arg2[%c0_5, %c0_6] : memref<24x1xi32, #tpu.memory_space<vmem>>, vector<24x1xi32>
    %9 = vector.broadcast %8 : vector<24x1xi32> to vector<24x16xi32>
    %10 = arith.cmpi eq, %1, %9 : vector<24x16xi32>
    %11 = arith.extui %10 : vector<24x16xi1> to vector<24x16xi32>
    %12 = arith.sitofp %11 : vector<24x16xi32> to vector<24x16xf32>
    %13 = vector.broadcast %2 : vector<24x1xf32> to vector<24x16xf32>
    %14 = arith.mulf %12, %13 : vector<24x16xf32>
    %c0_7 = arith.constant 0 : index
    %c0_8 = arith.constant 0 : index
    %15 = vector.load %arg4[%c0_7, %c0_8] : memref<24x1xf32, #tpu.memory_space<vmem>>, vector<24x1xf32>
    %c0_9 = arith.constant 0 : index
    %c0_10 = arith.constant 0 : index
    %16 = vector.load %arg5[%c0_9, %c0_10] : memref<32x16xf32, #tpu.memory_space<vmem>>, vector<32x16xf32>
    %cst = arith.constant dense<0.000000e+00> : vector<16x16xf32>
    %17 = tpu.matmul %0, %16, %cst {dimension_numbers = #tpu.dot_dimension_numbers<[1], [0], [0], [1], [0, 0, 1, 1], [], []>} : vector<16x32xf32>, vector<32x16xf32>, vector<16x16xf32> -> vector<16x16xf32>
    %cst_11 = arith.constant dense<0.000000e+00> : vector<24x16xf32>
    %18 = tpu.matmul %7, %17, %cst_11 {dimension_numbers = #tpu.dot_dimension_numbers<[1], [0], [0], [1], [0, 0, 1, 1], [], []>} : vector<24x16xf32>, vector<16x16xf32>, vector<24x16xf32> -> vector<24x16xf32>
    %cst_12 = arith.constant dense<0.000000e+00> : vector<24x16xf32>
    %19 = tpu.matmul %14, %17, %cst_12 {dimension_numbers = #tpu.dot_dimension_numbers<[1], [0], [0], [1], [0, 0, 1, 1], [], []>} : vector<24x16xf32>, vector<16x16xf32>, vector<24x16xf32> -> vector<24x16xf32>
    %c0_13 = arith.constant 0 : index
    %c0_14 = arith.constant 0 : index
    %20 = vector.load %arg6[%c0_13, %c0_14] : memref<16x1xf32, #tpu.memory_space<vmem>>, vector<16x1xf32>
    %cst_15 = arith.constant dense<0.000000e+00> : vector<24x1xf32>
    %21 = tpu.matmul %19, %20, %cst_15 {dimension_numbers = #tpu.dot_dimension_numbers<[1], [0], [0], [1], [0, 0, 1, 1], [], []>} : vector<24x16xf32>, vector<16x1xf32>, vector<24x1xf32> -> vector<24x1xf32>
    %c0_16 = arith.constant 0 : index
    %c0_17 = arith.constant 0 : index
    %22 = vector.load %arg7[%c0_16, %c0_17] : memref<16x1xf32, #tpu.memory_space<vmem>>, vector<16x1xf32>
    %cst_18 = arith.constant dense<0.000000e+00> : vector<24x1xf32>
    %23 = tpu.matmul %18, %22, %cst_18 {dimension_numbers = #tpu.dot_dimension_numbers<[1], [0], [0], [1], [0, 0, 1, 1], [], []>} : vector<24x16xf32>, vector<16x1xf32>, vector<24x1xf32> -> vector<24x1xf32>
    %24 = arith.addf %21, %23 : vector<24x1xf32>
    %c0_19 = arith.constant 0 : index
    %c0_20 = arith.constant 0 : index
    %25 = vector.load %arg8[%c0_19, %c0_20] : memref<1x1xf32, #tpu.memory_space<vmem>>, vector<1x1xf32>
    %cst_21 = arith.constant dense<0.000000e+00> : vector<24x1xf32>
    %26 = tpu.matmul %15, %25, %cst_21 {dimension_numbers = #tpu.dot_dimension_numbers<[1], [0], [0], [1], [0, 0, 1, 1], [], []>} : vector<24x1xf32>, vector<1x1xf32>, vector<24x1xf32> -> vector<24x1xf32>
    %27 = arith.addf %24, %26 : vector<24x1xf32>
    %cst_22 = arith.constant 0.000000e+00 : f32
    %28 = vector.broadcast %cst_22 : f32 to vector<24x1xf32>
    %29 = arith.cmpf oge, %27, %28 : vector<24x1xf32>
    %cst_23 = arith.constant 2.000000e-01 : f32
    %30 = vector.broadcast %cst_23 : f32 to vector<24x1xf32>
    %31 = arith.mulf %30, %27 : vector<24x1xf32>
    %32 = arith.select %29, %27, %31 : vector<24x1xi1>, vector<24x1xf32>
    %cst_24 = arith.constant 5.000000e-01 : f32
    %33 = vector.broadcast %cst_24 : f32 to vector<24x16xf32>
    %34 = arith.cmpf ogt, %14, %33 : vector<24x16xf32>
    %cst_25 = arith.constant -1.000000e+30 : f32
    %35 = vector.shape_cast %32 : vector<24x1xf32> to vector<24x1xf32>
    %36 = vector.broadcast %35 : vector<24x1xf32> to vector<24x16xf32>
    %37 = vector.broadcast %cst_25 : f32 to vector<24x16xf32>
    %38 = arith.select %34, %36, %37 : vector<24x16xi1>, vector<24x16xf32>
    %cst_26 = arith.constant dense<0xFF800000> : vector<16xf32>
    %39 = vector.multi_reduction <maximumf>, %38, %cst_26 [0] : vector<24x16xf32> to vector<16xf32>
    %40 = vector.shape_cast %39 : vector<16xf32> to vector<1x16xf32>
    %cst_27 = arith.constant dense<0.000000e+00> : vector<24x1xf32>
    %41 = tpu.matmul %14, %40, %cst_27 {dimension_numbers = #tpu.dot_dimension_numbers<[1], [1], [0], [0], [0, 0, 1, 0], [], []>} : vector<24x16xf32>, vector<1x16xf32>, vector<24x1xf32> -> vector<24x1xf32>
    %42 = arith.subf %32, %41 : vector<24x1xf32>
    %43 = math.exp %42 : vector<24x1xf32>
    %44 = arith.mulf %43, %2 : vector<24x1xf32>
    %cst_28 = arith.constant dense<0.000000e+00> : vector<16x1xf32>
    %45 = tpu.matmul %14, %44, %cst_28 {dimension_numbers = #tpu.dot_dimension_numbers<[0], [0], [1], [1], [0, 1, 1, 1], [], []>} : vector<24x16xf32>, vector<24x1xf32>, vector<16x1xf32> -> vector<16x1xf32>
    %cst_29 = arith.constant dense<0.000000e+00> : vector<24x1xf32>
    %46 = tpu.matmul %14, %45, %cst_29 {dimension_numbers = #tpu.dot_dimension_numbers<[1], [0], [0], [1], [0, 0, 1, 1], [], []>} : vector<24x16xf32>, vector<16x1xf32>, vector<24x1xf32> -> vector<24x1xf32>
    %cst_30 = arith.constant 1.000000e-16 : f32
    %47 = vector.broadcast %cst_30 : f32 to vector<24x1xf32>
    %48 = arith.addf %46, %47 : vector<24x1xf32>
    %49 = arith.divf %44, %48 : vector<24x1xf32>
    %50 = vector.broadcast %49 : vector<24x1xf32> to vector<24x16xf32>
    %51 = arith.mulf %18, %50 : vector<24x16xf32>
    %cst_31 = arith.constant dense<0.000000e+00> : vector<16x16xf32>
    %52 = tpu.matmul %14, %51, %cst_31 {dimension_numbers = #tpu.dot_dimension_numbers<[0], [0], [1], [1], [0, 1, 1, 1], [], []>} : vector<24x16xf32>, vector<24x16xf32>, vector<16x16xf32> -> vector<16x16xf32>
    %53 = arith.mulf %15, %49 : vector<24x1xf32>
    %cst_32 = arith.constant dense<0.000000e+00> : vector<16x1xf32>
    %54 = tpu.matmul %14, %53, %cst_32 {dimension_numbers = #tpu.dot_dimension_numbers<[0], [0], [1], [1], [0, 1, 1, 1], [], []>} : vector<24x16xf32>, vector<24x1xf32>, vector<16x1xf32> -> vector<16x1xf32>
    %c0_33 = arith.constant 0 : index
    %c0_34 = arith.constant 0 : index
    %55 = vector.load %arg9[%c0_33, %c0_34] : memref<16x16xf32, #tpu.memory_space<vmem>>, vector<16x16xf32>
    %cst_35 = arith.constant dense<0.000000e+00> : vector<16x16xf32>
    %56 = tpu.matmul %52, %55, %cst_35 {dimension_numbers = #tpu.dot_dimension_numbers<[1], [0], [0], [1], [0, 0, 1, 1], [], []>} : vector<16x16xf32>, vector<16x16xf32>, vector<16x16xf32> -> vector<16x16xf32>
    %c0_36 = arith.constant 0 : index
    %c0_37 = arith.constant 0 : index
    %57 = vector.load %arg10[%c0_36, %c0_37] : memref<1x16xf32, #tpu.memory_space<vmem>>, vector<1x16xf32>
    %cst_38 = arith.constant dense<0.000000e+00> : vector<16x16xf32>
    %58 = tpu.matmul %54, %57, %cst_38 {dimension_numbers = #tpu.dot_dimension_numbers<[1], [0], [0], [1], [0, 0, 1, 1], [], []>} : vector<16x1xf32>, vector<1x16xf32>, vector<16x16xf32> -> vector<16x16xf32>
    %59 = arith.addf %56, %58 : vector<16x16xf32>
    %c0_39 = arith.constant 0 : index
    %c0_40 = arith.constant 0 : index
    %60 = vector.load %arg11[%c0_39, %c0_40] : memref<1x16xf32, #tpu.memory_space<vmem>>, vector<1x16xf32>
    %61 = vector.broadcast %60 : vector<1x16xf32> to vector<16x16xf32>
    %62 = arith.addf %59, %61 : vector<16x16xf32>
    %cst_41 = arith.constant 0.000000e+00 : f32
    %63 = vector.broadcast %cst_41 : f32 to vector<16x16xf32>
    %64 = arith.maximumf %62, %63 : vector<16x16xf32>
    %c0_42 = arith.constant 0 : index
    %c0_43 = arith.constant 0 : index
    %65 = vector.load %arg12[%c0_42, %c0_43] : memref<32x16xf32, #tpu.memory_space<vmem>>, vector<32x16xf32>
    %cst_44 = arith.constant dense<0.000000e+00> : vector<16x16xf32>
    %66 = tpu.matmul %0, %65, %cst_44 {dimension_numbers = #tpu.dot_dimension_numbers<[1], [0], [0], [1], [0, 0, 1, 1], [], []>} : vector<16x32xf32>, vector<32x16xf32>, vector<16x16xf32> -> vector<16x16xf32>
    %c0_45 = arith.constant 0 : index
    %c0_46 = arith.constant 0 : index
    %67 = vector.load %arg13[%c0_45, %c0_46] : memref<16x16xf32, #tpu.memory_space<vmem>>, vector<16x16xf32>
    %cst_47 = arith.constant dense<0.000000e+00> : vector<16x16xf32>
    %68 = tpu.matmul %64, %67, %cst_47 {dimension_numbers = #tpu.dot_dimension_numbers<[1], [0], [0], [1], [0, 0, 1, 1], [], []>} : vector<16x16xf32>, vector<16x16xf32>, vector<16x16xf32> -> vector<16x16xf32>
    %69 = arith.addf %66, %68 : vector<16x16xf32>
    %cst_48 = arith.constant dense<0.000000e+00> : vector<24x16xf32>
    %70 = tpu.matmul %7, %69, %cst_48 {dimension_numbers = #tpu.dot_dimension_numbers<[1], [0], [0], [1], [0, 0, 1, 1], [], []>} : vector<24x16xf32>, vector<16x16xf32>, vector<24x16xf32> -> vector<24x16xf32>
    %cst_49 = arith.constant dense<0.000000e+00> : vector<24x16xf32>
    %71 = tpu.matmul %14, %69, %cst_49 {dimension_numbers = #tpu.dot_dimension_numbers<[1], [0], [0], [1], [0, 0, 1, 1], [], []>} : vector<24x16xf32>, vector<16x16xf32>, vector<24x16xf32> -> vector<24x16xf32>
    %c0_50 = arith.constant 0 : index
    %c0_51 = arith.constant 0 : index
    %72 = vector.load %arg14[%c0_50, %c0_51] : memref<16x1xf32, #tpu.memory_space<vmem>>, vector<16x1xf32>
    %cst_52 = arith.constant dense<0.000000e+00> : vector<24x1xf32>
    %73 = tpu.matmul %71, %72, %cst_52 {dimension_numbers = #tpu.dot_dimension_numbers<[1], [0], [0], [1], [0, 0, 1, 1], [], []>} : vector<24x16xf32>, vector<16x1xf32>, vector<24x1xf32> -> vector<24x1xf32>
    %c0_53 = arith.constant 0 : index
    %c0_54 = arith.constant 0 : index
    %74 = vector.load %arg15[%c0_53, %c0_54] : memref<16x1xf32, #tpu.memory_space<vmem>>, vector<16x1xf32>
    %cst_55 = arith.constant dense<0.000000e+00> : vector<24x1xf32>
    %75 = tpu.matmul %70, %74, %cst_55 {dimension_numbers = #tpu.dot_dimension_numbers<[1], [0], [0], [1], [0, 0, 1, 1], [], []>} : vector<24x16xf32>, vector<16x1xf32>, vector<24x1xf32> -> vector<24x1xf32>
    %76 = arith.addf %73, %75 : vector<24x1xf32>
    %c0_56 = arith.constant 0 : index
    %c0_57 = arith.constant 0 : index
    %77 = vector.load %arg16[%c0_56, %c0_57] : memref<1x1xf32, #tpu.memory_space<vmem>>, vector<1x1xf32>
    %cst_58 = arith.constant dense<0.000000e+00> : vector<24x1xf32>
    %78 = tpu.matmul %15, %77, %cst_58 {dimension_numbers = #tpu.dot_dimension_numbers<[1], [0], [0], [1], [0, 0, 1, 1], [], []>} : vector<24x1xf32>, vector<1x1xf32>, vector<24x1xf32> -> vector<24x1xf32>
    %79 = arith.addf %76, %78 : vector<24x1xf32>
    %cst_59 = arith.constant 0.000000e+00 : f32
    %80 = vector.broadcast %cst_59 : f32 to vector<24x1xf32>
    %81 = arith.cmpf oge, %79, %80 : vector<24x1xf32>
    %cst_60 = arith.constant 2.000000e-01 : f32
    %82 = vector.broadcast %cst_60 : f32 to vector<24x1xf32>
    %83 = arith.mulf %82, %79 : vector<24x1xf32>
    %84 = arith.select %81, %79, %83 : vector<24x1xi1>, vector<24x1xf32>
    %cst_61 = arith.constant 5.000000e-01 : f32
    %85 = vector.broadcast %cst_61 : f32 to vector<24x16xf32>
    %86 = arith.cmpf ogt, %14, %85 : vector<24x16xf32>
    %cst_62 = arith.constant -1.000000e+30 : f32
    %87 = vector.shape_cast %84 : vector<24x1xf32> to vector<24x1xf32>
    %88 = vector.broadcast %87 : vector<24x1xf32> to vector<24x16xf32>
    %89 = vector.broadcast %cst_62 : f32 to vector<24x16xf32>
    %90 = arith.select %86, %88, %89 : vector<24x16xi1>, vector<24x16xf32>
    %cst_63 = arith.constant dense<0xFF800000> : vector<16xf32>
    %91 = vector.multi_reduction <maximumf>, %90, %cst_63 [0] : vector<24x16xf32> to vector<16xf32>
    %92 = vector.shape_cast %91 : vector<16xf32> to vector<1x16xf32>
    %cst_64 = arith.constant dense<0.000000e+00> : vector<24x1xf32>
    %93 = tpu.matmul %14, %92, %cst_64 {dimension_numbers = #tpu.dot_dimension_numbers<[1], [1], [0], [0], [0, 0, 1, 0], [], []>} : vector<24x16xf32>, vector<1x16xf32>, vector<24x1xf32> -> vector<24x1xf32>
    %94 = arith.subf %84, %93 : vector<24x1xf32>
    %95 = math.exp %94 : vector<24x1xf32>
    %96 = arith.mulf %95, %2 : vector<24x1xf32>
    %cst_65 = arith.constant dense<0.000000e+00> : vector<16x1xf32>
    %97 = tpu.matmul %14, %96, %cst_65 {dimension_numbers = #tpu.dot_dimension_numbers<[0], [0], [1], [1], [0, 1, 1, 1], [], []>} : vector<24x16xf32>, vector<24x1xf32>, vector<16x1xf32> -> vector<16x1xf32>
    %cst_66 = arith.constant dense<0.000000e+00> : vector<24x1xf32>
    %98 = tpu.matmul %14, %97, %cst_66 {dimension_numbers = #tpu.dot_dimension_numbers<[1], [0], [0], [1], [0, 0, 1, 1], [], []>} : vector<24x16xf32>, vector<16x1xf32>, vector<24x1xf32> -> vector<24x1xf32>
    %cst_67 = arith.constant 1.000000e-16 : f32
    %99 = vector.broadcast %cst_67 : f32 to vector<24x1xf32>
    %100 = arith.addf %98, %99 : vector<24x1xf32>
    %101 = arith.divf %96, %100 : vector<24x1xf32>
    %102 = vector.broadcast %101 : vector<24x1xf32> to vector<24x16xf32>
    %103 = arith.mulf %70, %102 : vector<24x16xf32>
    %cst_68 = arith.constant dense<0.000000e+00> : vector<16x16xf32>
    %104 = tpu.matmul %14, %103, %cst_68 {dimension_numbers = #tpu.dot_dimension_numbers<[0], [0], [1], [1], [0, 1, 1, 1], [], []>} : vector<24x16xf32>, vector<24x16xf32>, vector<16x16xf32> -> vector<16x16xf32>
    %105 = arith.mulf %15, %101 : vector<24x1xf32>
    %cst_69 = arith.constant dense<0.000000e+00> : vector<16x1xf32>
    %106 = tpu.matmul %14, %105, %cst_69 {dimension_numbers = #tpu.dot_dimension_numbers<[0], [0], [1], [1], [0, 1, 1, 1], [], []>} : vector<24x16xf32>, vector<24x1xf32>, vector<16x1xf32> -> vector<16x1xf32>
    %c0_70 = arith.constant 0 : index
    %c0_71 = arith.constant 0 : index
    %107 = vector.load %arg17[%c0_70, %c0_71] : memref<16x16xf32, #tpu.memory_space<vmem>>, vector<16x16xf32>
    %cst_72 = arith.constant dense<0.000000e+00> : vector<16x16xf32>
    %108 = tpu.matmul %104, %107, %cst_72 {dimension_numbers = #tpu.dot_dimension_numbers<[1], [0], [0], [1], [0, 0, 1, 1], [], []>} : vector<16x16xf32>, vector<16x16xf32>, vector<16x16xf32> -> vector<16x16xf32>
    %c0_73 = arith.constant 0 : index
    %c0_74 = arith.constant 0 : index
    %109 = vector.load %arg18[%c0_73, %c0_74] : memref<1x16xf32, #tpu.memory_space<vmem>>, vector<1x16xf32>
    %cst_75 = arith.constant dense<0.000000e+00> : vector<16x16xf32>
    %110 = tpu.matmul %106, %109, %cst_75 {dimension_numbers = #tpu.dot_dimension_numbers<[1], [0], [0], [1], [0, 0, 1, 1], [], []>} : vector<16x1xf32>, vector<1x16xf32>, vector<16x16xf32> -> vector<16x16xf32>
    %111 = arith.addf %108, %110 : vector<16x16xf32>
    %c0_76 = arith.constant 0 : index
    %c0_77 = arith.constant 0 : index
    %112 = vector.load %arg19[%c0_76, %c0_77] : memref<1x16xf32, #tpu.memory_space<vmem>>, vector<1x16xf32>
    %113 = vector.broadcast %112 : vector<1x16xf32> to vector<16x16xf32>
    %114 = arith.addf %111, %113 : vector<16x16xf32>
    %cst_78 = arith.constant 0.000000e+00 : f32
    %115 = vector.broadcast %cst_78 : f32 to vector<16x16xf32>
    %116 = arith.maximumf %114, %115 : vector<16x16xf32>
    %c0_79 = arith.constant 0 : index
    %c0_80 = arith.constant 0 : index
    %117 = vector.load %arg20[%c0_79, %c0_80] : memref<32x16xf32, #tpu.memory_space<vmem>>, vector<32x16xf32>
    %cst_81 = arith.constant dense<0.000000e+00> : vector<16x16xf32>
    %118 = tpu.matmul %0, %117, %cst_81 {dimension_numbers = #tpu.dot_dimension_numbers<[1], [0], [0], [1], [0, 0, 1, 1], [], []>} : vector<16x32xf32>, vector<32x16xf32>, vector<16x16xf32> -> vector<16x16xf32>
    %cst_82 = arith.constant dense<0.000000e+00> : vector<24x16xf32>
    %119 = tpu.matmul %7, %118, %cst_82 {dimension_numbers = #tpu.dot_dimension_numbers<[1], [0], [0], [1], [0, 0, 1, 1], [], []>} : vector<24x16xf32>, vector<16x16xf32>, vector<24x16xf32> -> vector<24x16xf32>
    %cst_83 = arith.constant dense<0.000000e+00> : vector<24x16xf32>
    %120 = tpu.matmul %14, %118, %cst_83 {dimension_numbers = #tpu.dot_dimension_numbers<[1], [0], [0], [1], [0, 0, 1, 1], [], []>} : vector<24x16xf32>, vector<16x16xf32>, vector<24x16xf32> -> vector<24x16xf32>
    %c0_84 = arith.constant 0 : index
    %c0_85 = arith.constant 0 : index
    %121 = vector.load %arg21[%c0_84, %c0_85] : memref<16x1xf32, #tpu.memory_space<vmem>>, vector<16x1xf32>
    %cst_86 = arith.constant dense<0.000000e+00> : vector<24x1xf32>
    %122 = tpu.matmul %120, %121, %cst_86 {dimension_numbers = #tpu.dot_dimension_numbers<[1], [0], [0], [1], [0, 0, 1, 1], [], []>} : vector<24x16xf32>, vector<16x1xf32>, vector<24x1xf32> -> vector<24x1xf32>
    %c0_87 = arith.constant 0 : index
    %c0_88 = arith.constant 0 : index
    %123 = vector.load %arg22[%c0_87, %c0_88] : memref<16x1xf32, #tpu.memory_space<vmem>>, vector<16x1xf32>
    %cst_89 = arith.constant dense<0.000000e+00> : vector<24x1xf32>
    %124 = tpu.matmul %119, %123, %cst_89 {dimension_numbers = #tpu.dot_dimension_numbers<[1], [0], [0], [1], [0, 0, 1, 1], [], []>} : vector<24x16xf32>, vector<16x1xf32>, vector<24x1xf32> -> vector<24x1xf32>
    %125 = arith.addf %122, %124 : vector<24x1xf32>
    %c0_90 = arith.constant 0 : index
    %c0_91 = arith.constant 0 : index
    %126 = vector.load %arg23[%c0_90, %c0_91] : memref<1x1xf32, #tpu.memory_space<vmem>>, vector<1x1xf32>
    %cst_92 = arith.constant dense<0.000000e+00> : vector<24x1xf32>
    %127 = tpu.matmul %15, %126, %cst_92 {dimension_numbers = #tpu.dot_dimension_numbers<[1], [0], [0], [1], [0, 0, 1, 1], [], []>} : vector<24x1xf32>, vector<1x1xf32>, vector<24x1xf32> -> vector<24x1xf32>
    %128 = arith.addf %125, %127 : vector<24x1xf32>
    %cst_93 = arith.constant 0.000000e+00 : f32
    %129 = vector.broadcast %cst_93 : f32 to vector<24x1xf32>
    %130 = arith.cmpf oge, %128, %129 : vector<24x1xf32>
    %cst_94 = arith.constant 2.000000e-01 : f32
    %131 = vector.broadcast %cst_94 : f32 to vector<24x1xf32>
    %132 = arith.mulf %131, %128 : vector<24x1xf32>
    %133 = arith.select %130, %128, %132 : vector<24x1xi1>, vector<24x1xf32>
    %cst_95 = arith.constant 5.000000e-01 : f32
    %134 = vector.broadcast %cst_95 : f32 to vector<24x16xf32>
    %135 = arith.cmpf ogt, %14, %134 : vector<24x16xf32>
    %cst_96 = arith.constant -1.000000e+30 : f32
    %136 = vector.shape_cast %133 : vector<24x1xf32> to vector<24x1xf32>
    %137 = vector.broadcast %136 : vector<24x1xf32> to vector<24x16xf32>
    %138 = vector.broadcast %cst_96 : f32 to vector<24x16xf32>
    %139 = arith.select %135, %137, %138 : vector<24x16xi1>, vector<24x16xf32>
    %cst_97 = arith.constant dense<0xFF800000> : vector<16xf32>
    %140 = vector.multi_reduction <maximumf>, %139, %cst_97 [0] : vector<24x16xf32> to vector<16xf32>
    %141 = vector.shape_cast %140 : vector<16xf32> to vector<1x16xf32>
    %cst_98 = arith.constant dense<0.000000e+00> : vector<24x1xf32>
    %142 = tpu.matmul %14, %141, %cst_98 {dimension_numbers = #tpu.dot_dimension_numbers<[1], [1], [0], [0], [0, 0, 1, 0], [], []>} : vector<24x16xf32>, vector<1x16xf32>, vector<24x1xf32> -> vector<24x1xf32>
    %143 = arith.subf %133, %142 : vector<24x1xf32>
    %144 = math.exp %143 : vector<24x1xf32>
    %145 = arith.mulf %144, %2 : vector<24x1xf32>
    %cst_99 = arith.constant dense<0.000000e+00> : vector<16x1xf32>
    %146 = tpu.matmul %14, %145, %cst_99 {dimension_numbers = #tpu.dot_dimension_numbers<[0], [0], [1], [1], [0, 1, 1, 1], [], []>} : vector<24x16xf32>, vector<24x1xf32>, vector<16x1xf32> -> vector<16x1xf32>
    %cst_100 = arith.constant dense<0.000000e+00> : vector<24x1xf32>
    %147 = tpu.matmul %14, %146, %cst_100 {dimension_numbers = #tpu.dot_dimension_numbers<[1], [0], [0], [1], [0, 0, 1, 1], [], []>} : vector<24x16xf32>, vector<16x1xf32>, vector<24x1xf32> -> vector<24x1xf32>
    %cst_101 = arith.constant 1.000000e-16 : f32
    %148 = vector.broadcast %cst_101 : f32 to vector<24x1xf32>
    %149 = arith.addf %147, %148 : vector<24x1xf32>
    %150 = arith.divf %145, %149 : vector<24x1xf32>
    %151 = vector.broadcast %150 : vector<24x1xf32> to vector<24x16xf32>
    %152 = arith.mulf %119, %151 : vector<24x16xf32>
    %cst_102 = arith.constant dense<0.000000e+00> : vector<16x16xf32>
    %153 = tpu.matmul %14, %152, %cst_102 {dimension_numbers = #tpu.dot_dimension_numbers<[0], [0], [1], [1], [0, 1, 1, 1], [], []>} : vector<24x16xf32>, vector<24x16xf32>, vector<16x16xf32> -> vector<16x16xf32>
    %154 = arith.mulf %15, %150 : vector<24x1xf32>
    %cst_103 = arith.constant dense<0.000000e+00> : vector<16x1xf32>
    %155 = tpu.matmul %14, %154, %cst_103 {dimension_numbers = #tpu.dot_dimension_numbers<[0], [0], [1], [1], [0, 1, 1, 1], [], []>} : vector<24x16xf32>, vector<24x1xf32>, vector<16x1xf32> -> vector<16x1xf32>
    %c0_104 = arith.constant 0 : index
    %c0_105 = arith.constant 0 : index
    %156 = vector.load %arg24[%c0_104, %c0_105] : memref<16x16xf32, #tpu.memory_space<vmem>>, vector<16x16xf32>
    %cst_106 = arith.constant dense<0.000000e+00> : vector<16x16xf32>
    %157 = tpu.matmul %153, %156, %cst_106 {dimension_numbers = #tpu.dot_dimension_numbers<[1], [0], [0], [1], [0, 0, 1, 1], [], []>} : vector<16x16xf32>, vector<16x16xf32>, vector<16x16xf32> -> vector<16x16xf32>
    %c0_107 = arith.constant 0 : index
    %c0_108 = arith.constant 0 : index
    %158 = vector.load %arg25[%c0_107, %c0_108] : memref<1x16xf32, #tpu.memory_space<vmem>>, vector<1x16xf32>
    %cst_109 = arith.constant dense<0.000000e+00> : vector<16x16xf32>
    %159 = tpu.matmul %155, %158, %cst_109 {dimension_numbers = #tpu.dot_dimension_numbers<[1], [0], [0], [1], [0, 0, 1, 1], [], []>} : vector<16x1xf32>, vector<1x16xf32>, vector<16x16xf32> -> vector<16x16xf32>
    %160 = arith.addf %157, %159 : vector<16x16xf32>
    %c0_110 = arith.constant 0 : index
    %c0_111 = arith.constant 0 : index
    %161 = vector.load %arg26[%c0_110, %c0_111] : memref<1x16xf32, #tpu.memory_space<vmem>>, vector<1x16xf32>
    %162 = vector.broadcast %161 : vector<1x16xf32> to vector<16x16xf32>
    %163 = arith.addf %160, %162 : vector<16x16xf32>
    %cst_112 = arith.constant 0.000000e+00 : f32
    %164 = vector.broadcast %cst_112 : f32 to vector<16x16xf32>
    %165 = arith.maximumf %163, %164 : vector<16x16xf32>
    %c0_113 = arith.constant 0 : index
    %c0_114 = arith.constant 0 : index
    %166 = vector.load %arg27[%c0_113, %c0_114] : memref<32x16xf32, #tpu.memory_space<vmem>>, vector<32x16xf32>
    %cst_115 = arith.constant dense<0.000000e+00> : vector<16x16xf32>
    %167 = tpu.matmul %0, %166, %cst_115 {dimension_numbers = #tpu.dot_dimension_numbers<[1], [0], [0], [1], [0, 0, 1, 1], [], []>} : vector<16x32xf32>, vector<32x16xf32>, vector<16x16xf32> -> vector<16x16xf32>
    %c0_116 = arith.constant 0 : index
    %c0_117 = arith.constant 0 : index
    %168 = vector.load %arg28[%c0_116, %c0_117] : memref<16x16xf32, #tpu.memory_space<vmem>>, vector<16x16xf32>
    %cst_118 = arith.constant dense<0.000000e+00> : vector<16x16xf32>
    %169 = tpu.matmul %165, %168, %cst_118 {dimension_numbers = #tpu.dot_dimension_numbers<[1], [0], [0], [1], [0, 0, 1, 1], [], []>} : vector<16x16xf32>, vector<16x16xf32>, vector<16x16xf32> -> vector<16x16xf32>
    %170 = arith.addf %167, %169 : vector<16x16xf32>
    %cst_119 = arith.constant dense<0.000000e+00> : vector<24x16xf32>
    %171 = tpu.matmul %7, %170, %cst_119 {dimension_numbers = #tpu.dot_dimension_numbers<[1], [0], [0], [1], [0, 0, 1, 1], [], []>} : vector<24x16xf32>, vector<16x16xf32>, vector<24x16xf32> -> vector<24x16xf32>
    %cst_120 = arith.constant dense<0.000000e+00> : vector<24x16xf32>
    %172 = tpu.matmul %14, %170, %cst_120 {dimension_numbers = #tpu.dot_dimension_numbers<[1], [0], [0], [1], [0, 0, 1, 1], [], []>} : vector<24x16xf32>, vector<16x16xf32>, vector<24x16xf32> -> vector<24x16xf32>
    %c0_121 = arith.constant 0 : index
    %c0_122 = arith.constant 0 : index
    %173 = vector.load %arg29[%c0_121, %c0_122] : memref<16x1xf32, #tpu.memory_space<vmem>>, vector<16x1xf32>
    %cst_123 = arith.constant dense<0.000000e+00> : vector<24x1xf32>
    %174 = tpu.matmul %172, %173, %cst_123 {dimension_numbers = #tpu.dot_dimension_numbers<[1], [0], [0], [1], [0, 0, 1, 1], [], []>} : vector<24x16xf32>, vector<16x1xf32>, vector<24x1xf32> -> vector<24x1xf32>
    %c0_124 = arith.constant 0 : index
    %c0_125 = arith.constant 0 : index
    %175 = vector.load %arg30[%c0_124, %c0_125] : memref<16x1xf32, #tpu.memory_space<vmem>>, vector<16x1xf32>
    %cst_126 = arith.constant dense<0.000000e+00> : vector<24x1xf32>
    %176 = tpu.matmul %171, %175, %cst_126 {dimension_numbers = #tpu.dot_dimension_numbers<[1], [0], [0], [1], [0, 0, 1, 1], [], []>} : vector<24x16xf32>, vector<16x1xf32>, vector<24x1xf32> -> vector<24x1xf32>
    %177 = arith.addf %174, %176 : vector<24x1xf32>
    %c0_127 = arith.constant 0 : index
    %c0_128 = arith.constant 0 : index
    %178 = vector.load %arg31[%c0_127, %c0_128] : memref<1x1xf32, #tpu.memory_space<vmem>>, vector<1x1xf32>
    %cst_129 = arith.constant dense<0.000000e+00> : vector<24x1xf32>
    %179 = tpu.matmul %15, %178, %cst_129 {dimension_numbers = #tpu.dot_dimension_numbers<[1], [0], [0], [1], [0, 0, 1, 1], [], []>} : vector<24x1xf32>, vector<1x1xf32>, vector<24x1xf32> -> vector<24x1xf32>
    %180 = arith.addf %177, %179 : vector<24x1xf32>
    %cst_130 = arith.constant 0.000000e+00 : f32
    %181 = vector.broadcast %cst_130 : f32 to vector<24x1xf32>
    %182 = arith.cmpf oge, %180, %181 : vector<24x1xf32>
    %cst_131 = arith.constant 2.000000e-01 : f32
    %183 = vector.broadcast %cst_131 : f32 to vector<24x1xf32>
    %184 = arith.mulf %183, %180 : vector<24x1xf32>
    %185 = arith.select %182, %180, %184 : vector<24x1xi1>, vector<24x1xf32>
    %cst_132 = arith.constant 5.000000e-01 : f32
    %186 = vector.broadcast %cst_132 : f32 to vector<24x16xf32>
    %187 = arith.cmpf ogt, %14, %186 : vector<24x16xf32>
    %cst_133 = arith.constant -1.000000e+30 : f32
    %188 = vector.shape_cast %185 : vector<24x1xf32> to vector<24x1xf32>
    %189 = vector.broadcast %188 : vector<24x1xf32> to vector<24x16xf32>
    %190 = vector.broadcast %cst_133 : f32 to vector<24x16xf32>
    %191 = arith.select %187, %189, %190 : vector<24x16xi1>, vector<24x16xf32>
    %cst_134 = arith.constant dense<0xFF800000> : vector<16xf32>
    %192 = vector.multi_reduction <maximumf>, %191, %cst_134 [0] : vector<24x16xf32> to vector<16xf32>
    %193 = vector.shape_cast %192 : vector<16xf32> to vector<1x16xf32>
    %cst_135 = arith.constant dense<0.000000e+00> : vector<24x1xf32>
    %194 = tpu.matmul %14, %193, %cst_135 {dimension_numbers = #tpu.dot_dimension_numbers<[1], [1], [0], [0], [0, 0, 1, 0], [], []>} : vector<24x16xf32>, vector<1x16xf32>, vector<24x1xf32> -> vector<24x1xf32>
    %195 = arith.subf %185, %194 : vector<24x1xf32>
    %196 = math.exp %195 : vector<24x1xf32>
    %197 = arith.mulf %196, %2 : vector<24x1xf32>
    %cst_136 = arith.constant dense<0.000000e+00> : vector<16x1xf32>
    %198 = tpu.matmul %14, %197, %cst_136 {dimension_numbers = #tpu.dot_dimension_numbers<[0], [0], [1], [1], [0, 1, 1, 1], [], []>} : vector<24x16xf32>, vector<24x1xf32>, vector<16x1xf32> -> vector<16x1xf32>
    %cst_137 = arith.constant dense<0.000000e+00> : vector<24x1xf32>
    %199 = tpu.matmul %14, %198, %cst_137 {dimension_numbers = #tpu.dot_dimension_numbers<[1], [0], [0], [1], [0, 0, 1, 1], [], []>} : vector<24x16xf32>, vector<16x1xf32>, vector<24x1xf32> -> vector<24x1xf32>
    %cst_138 = arith.constant 1.000000e-16 : f32
    %200 = vector.broadcast %cst_138 : f32 to vector<24x1xf32>
    %201 = arith.addf %199, %200 : vector<24x1xf32>
    %202 = arith.divf %197, %201 : vector<24x1xf32>
    %203 = vector.broadcast %202 : vector<24x1xf32> to vector<24x16xf32>
    %204 = arith.mulf %171, %203 : vector<24x16xf32>
    %cst_139 = arith.constant dense<0.000000e+00> : vector<16x16xf32>
    %205 = tpu.matmul %14, %204, %cst_139 {dimension_numbers = #tpu.dot_dimension_numbers<[0], [0], [1], [1], [0, 1, 1, 1], [], []>} : vector<24x16xf32>, vector<24x16xf32>, vector<16x16xf32> -> vector<16x16xf32>
    %206 = arith.mulf %15, %202 : vector<24x1xf32>
    %cst_140 = arith.constant dense<0.000000e+00> : vector<16x1xf32>
    %207 = tpu.matmul %14, %206, %cst_140 {dimension_numbers = #tpu.dot_dimension_numbers<[0], [0], [1], [1], [0, 1, 1, 1], [], []>} : vector<24x16xf32>, vector<24x1xf32>, vector<16x1xf32> -> vector<16x1xf32>
    %c0_141 = arith.constant 0 : index
    %c0_142 = arith.constant 0 : index
    %208 = vector.load %arg32[%c0_141, %c0_142] : memref<16x16xf32, #tpu.memory_space<vmem>>, vector<16x16xf32>
    %cst_143 = arith.constant dense<0.000000e+00> : vector<16x16xf32>
    %209 = tpu.matmul %205, %208, %cst_143 {dimension_numbers = #tpu.dot_dimension_numbers<[1], [0], [0], [1], [0, 0, 1, 1], [], []>} : vector<16x16xf32>, vector<16x16xf32>, vector<16x16xf32> -> vector<16x16xf32>
    %c0_144 = arith.constant 0 : index
    %c0_145 = arith.constant 0 : index
    %210 = vector.load %arg33[%c0_144, %c0_145] : memref<1x16xf32, #tpu.memory_space<vmem>>, vector<1x16xf32>
    %cst_146 = arith.constant dense<0.000000e+00> : vector<16x16xf32>
    %211 = tpu.matmul %207, %210, %cst_146 {dimension_numbers = #tpu.dot_dimension_numbers<[1], [0], [0], [1], [0, 0, 1, 1], [], []>} : vector<16x1xf32>, vector<1x16xf32>, vector<16x16xf32> -> vector<16x16xf32>
    %212 = arith.addf %209, %211 : vector<16x16xf32>
    %c0_147 = arith.constant 0 : index
    %c0_148 = arith.constant 0 : index
    %213 = vector.load %arg34[%c0_147, %c0_148] : memref<1x16xf32, #tpu.memory_space<vmem>>, vector<1x16xf32>
    %214 = vector.broadcast %213 : vector<1x16xf32> to vector<16x16xf32>
    %215 = arith.addf %212, %214 : vector<16x16xf32>
    %cst_149 = arith.constant 0.000000e+00 : f32
    %216 = vector.broadcast %cst_149 : f32 to vector<16x16xf32>
    %217 = arith.maximumf %215, %216 : vector<16x16xf32>
    %c0_150 = arith.constant 0 : index
    %c0_151 = arith.constant 0 : index
    %218 = vector.load %arg35[%c0_150, %c0_151] : memref<16x32xf32, #tpu.memory_space<vmem>>, vector<16x32xf32>
    %cst_152 = arith.constant dense<0.000000e+00> : vector<16x32xf32>
    %219 = tpu.matmul %64, %218, %cst_152 {dimension_numbers = #tpu.dot_dimension_numbers<[1], [0], [0], [1], [0, 0, 1, 1], [], []>} : vector<16x16xf32>, vector<16x32xf32>, vector<16x32xf32> -> vector<16x32xf32>
    %c0_153 = arith.constant 0 : index
    %c0_154 = arith.constant 0 : index
    %220 = vector.load %arg36[%c0_153, %c0_154] : memref<16x32xf32, #tpu.memory_space<vmem>>, vector<16x32xf32>
    %cst_155 = arith.constant dense<0.000000e+00> : vector<16x32xf32>
    %221 = tpu.matmul %116, %220, %cst_155 {dimension_numbers = #tpu.dot_dimension_numbers<[1], [0], [0], [1], [0, 0, 1, 1], [], []>} : vector<16x16xf32>, vector<16x32xf32>, vector<16x32xf32> -> vector<16x32xf32>
    %222 = arith.addf %219, %221 : vector<16x32xf32>
    %c0_156 = arith.constant 0 : index
    %c0_157 = arith.constant 0 : index
    %223 = vector.load %arg37[%c0_156, %c0_157] : memref<16x32xf32, #tpu.memory_space<vmem>>, vector<16x32xf32>
    %cst_158 = arith.constant dense<0.000000e+00> : vector<16x32xf32>
    %224 = tpu.matmul %165, %223, %cst_158 {dimension_numbers = #tpu.dot_dimension_numbers<[1], [0], [0], [1], [0, 0, 1, 1], [], []>} : vector<16x16xf32>, vector<16x32xf32>, vector<16x32xf32> -> vector<16x32xf32>
    %225 = arith.addf %222, %224 : vector<16x32xf32>
    %c0_159 = arith.constant 0 : index
    %c0_160 = arith.constant 0 : index
    %226 = vector.load %arg38[%c0_159, %c0_160] : memref<16x32xf32, #tpu.memory_space<vmem>>, vector<16x32xf32>
    %cst_161 = arith.constant dense<0.000000e+00> : vector<16x32xf32>
    %227 = tpu.matmul %217, %226, %cst_161 {dimension_numbers = #tpu.dot_dimension_numbers<[1], [0], [0], [1], [0, 0, 1, 1], [], []>} : vector<16x16xf32>, vector<16x32xf32>, vector<16x32xf32> -> vector<16x32xf32>
    %228 = arith.addf %225, %227 : vector<16x32xf32>
    %c0_162 = arith.constant 0 : index
    %c0_163 = arith.constant 0 : index
    %229 = vector.load %arg39[%c0_162, %c0_163] : memref<32x32xf32, #tpu.memory_space<vmem>>, vector<32x32xf32>
    %cst_164 = arith.constant dense<0.000000e+00> : vector<16x32xf32>
    %230 = tpu.matmul %0, %229, %cst_164 {dimension_numbers = #tpu.dot_dimension_numbers<[1], [0], [0], [1], [0, 0, 1, 1], [], []>} : vector<16x32xf32>, vector<32x32xf32>, vector<16x32xf32> -> vector<16x32xf32>
    %231 = arith.addf %228, %230 : vector<16x32xf32>
    %c0_165 = arith.constant 0 : index
    %c0_166 = arith.constant 0 : index
    %232 = vector.load %arg40[%c0_165, %c0_166] : memref<1x32xf32, #tpu.memory_space<vmem>>, vector<1x32xf32>
    %233 = vector.broadcast %232 : vector<1x32xf32> to vector<16x32xf32>
    %234 = arith.addf %231, %233 : vector<16x32xf32>
    %c0_167 = arith.constant 0 : index
    %c0_168 = arith.constant 0 : index
    %235 = vector.load %arg41[%c0_167, %c0_168] : memref<16x32xf32, #tpu.memory_space<vmem>>, vector<16x32xf32>
    tpu.vector_store %arg41[%c0_167, %c0_168], %234 {strides = array<i32>} : memref<16x32xf32, #tpu.memory_space<vmem>>, vector<16x32xf32>,
    return
  }
}

module attributes {stable_mosaic.version = 11 : i64} {
  func.func @kernel(%arg0: memref<16x64xf32, #tpu.memory_space<vmem>>, %arg1: memref<16x32xf32, #tpu.memory_space<vmem>>, %arg2: memref<16x3xf32, #tpu.memory_space<vmem>>, %arg3: memref<64x32xf32, #tpu.memory_space<vmem>>, %arg4: memref<32x32xf32, #tpu.memory_space<vmem>>, %arg5: memref<1x32xf32, #tpu.memory_space<vmem>>, %arg6: memref<32x32xf32, #tpu.memory_space<vmem>>, %arg7: memref<32x32xf32, #tpu.memory_space<vmem>>, %arg8: memref<32x32xf32, #tpu.memory_space<vmem>>, %arg9: memref<1x32xf32, #tpu.memory_space<vmem>>, %arg10: memref<32x32xf32, #tpu.memory_space<vmem>>, %arg11: memref<1x32xf32, #tpu.memory_space<vmem>>, %arg12: memref<32x5xf32, #tpu.memory_space<vmem>>, %arg13: memref<1x5xf32, #tpu.memory_space<vmem>>, %arg14: memref<2x5xf32, #tpu.memory_space<vmem>>, %arg15: memref<2x32xf32, #tpu.memory_space<vmem>>) attributes {dimension_semantics = [], scalar_prefetch = 0 : i64, scratch_operands = 0 : i64, tpu.core_type = #tpu.core_type<tc>} {
    %c0 = arith.constant 0 : index
    %c0_0 = arith.constant 0 : index
    %0 = vector.load %arg0[%c0, %c0_0] : memref<16x64xf32, #tpu.memory_space<vmem>>, vector<16x64xf32>
    %c0_1 = arith.constant 0 : index
    %c0_2 = arith.constant 0 : index
    %1 = vector.load %arg3[%c0_1, %c0_2] : memref<64x32xf32, #tpu.memory_space<vmem>>, vector<64x32xf32>
    %cst = arith.constant dense<0.000000e+00> : vector<16x32xf32>
    %2 = tpu.matmul %0, %1, %cst {dimension_numbers = #tpu.dot_dimension_numbers<[1], [0], [0], [1], [0, 0, 1, 1], [], []>} : vector<16x64xf32>, vector<64x32xf32>, vector<16x32xf32> -> vector<16x32xf32>
    %c0_3 = arith.constant 0 : index
    %c0_4 = arith.constant 0 : index
    %3 = vector.load %arg1[%c0_3, %c0_4] : memref<16x32xf32, #tpu.memory_space<vmem>>, vector<16x32xf32>
    %c0_5 = arith.constant 0 : index
    %c0_6 = arith.constant 0 : index
    %4 = vector.load %arg4[%c0_5, %c0_6] : memref<32x32xf32, #tpu.memory_space<vmem>>, vector<32x32xf32>
    %cst_7 = arith.constant dense<0.000000e+00> : vector<16x32xf32>
    %5 = tpu.matmul %3, %4, %cst_7 {dimension_numbers = #tpu.dot_dimension_numbers<[1], [0], [0], [1], [0, 0, 1, 1], [], []>} : vector<16x32xf32>, vector<32x32xf32>, vector<16x32xf32> -> vector<16x32xf32>
    %6 = arith.addf %2, %5 : vector<16x32xf32>
    %c0_8 = arith.constant 0 : index
    %c0_9 = arith.constant 0 : index
    %7 = vector.load %arg5[%c0_8, %c0_9] : memref<1x32xf32, #tpu.memory_space<vmem>>, vector<1x32xf32>
    %8 = vector.broadcast %7 : vector<1x32xf32> to vector<16x32xf32>
    %9 = arith.addf %6, %8 : vector<16x32xf32>
    %c0_10 = arith.constant 0 : index
    %c0_11 = arith.constant 0 : index
    %10 = vector.load %arg2[%c0_10, %c0_11] : memref<16x3xf32, #tpu.memory_space<vmem>>, vector<16x3xf32>
    %11 = vector.extract_strided_slice %9 {offsets = [0, 0], sizes = [8, 32], strides = [1, 1]} : vector<16x32xf32> to vector<8x32xf32>
    %12 = vector.extract_strided_slice %10 {offsets = [0, 0], sizes = [8, 3], strides = [1, 1]} : vector<16x3xf32> to vector<8x3xf32>
    %13 = vector.extract_strided_slice %12 {offsets = [0, 0], sizes = [8, 1], strides = [1, 1]} : vector<8x3xf32> to vector<8x1xf32>
    %cst_12 = arith.constant 5.000000e-01 : f32
    %14 = vector.broadcast %cst_12 : f32 to vector<8x1xf32>
    %15 = arith.cmpf ogt, %13, %14 : vector<8x1xf32>
    %cst_13 = arith.constant -9.99999995E+11 : f32
    %16 = vector.shape_cast %15 : vector<8x1xi1> to vector<8x1xi1>
    %17 = vector.broadcast %16 : vector<8x1xi1> to vector<8x32xi1>
    %18 = vector.broadcast %cst_13 : f32 to vector<8x32xf32>
    %19 = arith.select %17, %18, %11 : vector<8x32xi1>, vector<8x32xf32>
    %cst_14 = arith.constant dense<0xFF800000> : vector<32xf32>
    %20 = vector.multi_reduction <maximumf>, %19, %cst_14 [0] : vector<8x32xf32> to vector<32xf32>
    %21 = vector.shape_cast %20 : vector<32xf32> to vector<1x32xf32>
    %22 = vector.extract_strided_slice %12 {offsets = [0, 1], sizes = [8, 1], strides = [1, 1]} : vector<8x3xf32> to vector<8x1xf32>
    %cst_15 = arith.constant 5.000000e-01 : f32
    %23 = vector.broadcast %cst_15 : f32 to vector<8x1xf32>
    %24 = arith.cmpf ogt, %22, %23 : vector<8x1xf32>
    %cst_16 = arith.constant -9.99999995E+11 : f32
    %25 = vector.shape_cast %24 : vector<8x1xi1> to vector<8x1xi1>
    %26 = vector.broadcast %25 : vector<8x1xi1> to vector<8x32xi1>
    %27 = vector.broadcast %cst_16 : f32 to vector<8x32xf32>
    %28 = arith.select %26, %27, %11 : vector<8x32xi1>, vector<8x32xf32>
    %cst_17 = arith.constant dense<0xFF800000> : vector<32xf32>
    %29 = vector.multi_reduction <maximumf>, %28, %cst_17 [0] : vector<8x32xf32> to vector<32xf32>
    %30 = vector.shape_cast %29 : vector<32xf32> to vector<1x32xf32>
    %31 = vector.extract_strided_slice %12 {offsets = [0, 2], sizes = [8, 1], strides = [1, 1]} : vector<8x3xf32> to vector<8x1xf32>
    %cst_18 = arith.constant 5.000000e-01 : f32
    %32 = vector.broadcast %cst_18 : f32 to vector<8x1xf32>
    %33 = arith.cmpf ogt, %31, %32 : vector<8x1xf32>
    %cst_19 = arith.constant -9.99999995E+11 : f32
    %34 = vector.shape_cast %33 : vector<8x1xi1> to vector<8x1xi1>
    %35 = vector.broadcast %34 : vector<8x1xi1> to vector<8x32xi1>
    %36 = vector.broadcast %cst_19 : f32 to vector<8x32xf32>
    %37 = arith.select %35, %36, %11 : vector<8x32xi1>, vector<8x32xf32>
    %cst_20 = arith.constant dense<0xFF800000> : vector<32xf32>
    %38 = vector.multi_reduction <maximumf>, %37, %cst_20 [0] : vector<8x32xf32> to vector<32xf32>
    %39 = vector.shape_cast %38 : vector<32xf32> to vector<1x32xf32>
    %40 = vector.extract_strided_slice %9 {offsets = [8, 0], sizes = [8, 32], strides = [1, 1]} : vector<16x32xf32> to vector<8x32xf32>
    %41 = vector.extract_strided_slice %10 {offsets = [8, 0], sizes = [8, 3], strides = [1, 1]} : vector<16x3xf32> to vector<8x3xf32>
    %42 = vector.extract_strided_slice %41 {offsets = [0, 0], sizes = [8, 1], strides = [1, 1]} : vector<8x3xf32> to vector<8x1xf32>
    %cst_21 = arith.constant 5.000000e-01 : f32
    %43 = vector.broadcast %cst_21 : f32 to vector<8x1xf32>
    %44 = arith.cmpf ogt, %42, %43 : vector<8x1xf32>
    %cst_22 = arith.constant -9.99999995E+11 : f32
    %45 = vector.shape_cast %44 : vector<8x1xi1> to vector<8x1xi1>
    %46 = vector.broadcast %45 : vector<8x1xi1> to vector<8x32xi1>
    %47 = vector.broadcast %cst_22 : f32 to vector<8x32xf32>
    %48 = arith.select %46, %47, %40 : vector<8x32xi1>, vector<8x32xf32>
    %cst_23 = arith.constant dense<0xFF800000> : vector<32xf32>
    %49 = vector.multi_reduction <maximumf>, %48, %cst_23 [0] : vector<8x32xf32> to vector<32xf32>
    %50 = vector.shape_cast %49 : vector<32xf32> to vector<1x32xf32>
    %51 = vector.extract_strided_slice %41 {offsets = [0, 1], sizes = [8, 1], strides = [1, 1]} : vector<8x3xf32> to vector<8x1xf32>
    %cst_24 = arith.constant 5.000000e-01 : f32
    %52 = vector.broadcast %cst_24 : f32 to vector<8x1xf32>
    %53 = arith.cmpf ogt, %51, %52 : vector<8x1xf32>
    %cst_25 = arith.constant -9.99999995E+11 : f32
    %54 = vector.shape_cast %53 : vector<8x1xi1> to vector<8x1xi1>
    %55 = vector.broadcast %54 : vector<8x1xi1> to vector<8x32xi1>
    %56 = vector.broadcast %cst_25 : f32 to vector<8x32xf32>
    %57 = arith.select %55, %56, %40 : vector<8x32xi1>, vector<8x32xf32>
    %cst_26 = arith.constant dense<0xFF800000> : vector<32xf32>
    %58 = vector.multi_reduction <maximumf>, %57, %cst_26 [0] : vector<8x32xf32> to vector<32xf32>
    %59 = vector.shape_cast %58 : vector<32xf32> to vector<1x32xf32>
    %60 = vector.extract_strided_slice %41 {offsets = [0, 2], sizes = [8, 1], strides = [1, 1]} : vector<8x3xf32> to vector<8x1xf32>
    %cst_27 = arith.constant 5.000000e-01 : f32
    %61 = vector.broadcast %cst_27 : f32 to vector<8x1xf32>
    %62 = arith.cmpf ogt, %60, %61 : vector<8x1xf32>
    %cst_28 = arith.constant -9.99999995E+11 : f32
    %63 = vector.shape_cast %62 : vector<8x1xi1> to vector<8x1xi1>
    %64 = vector.broadcast %63 : vector<8x1xi1> to vector<8x32xi1>
    %65 = vector.broadcast %cst_28 : f32 to vector<8x32xf32>
    %66 = arith.select %64, %65, %40 : vector<8x32xi1>, vector<8x32xf32>
    %cst_29 = arith.constant dense<0xFF800000> : vector<32xf32>
    %67 = vector.multi_reduction <maximumf>, %66, %cst_29 [0] : vector<8x32xf32> to vector<32xf32>
    %68 = vector.shape_cast %67 : vector<32xf32> to vector<1x32xf32>
    %69 = tpu.concatenate %21, %50 in 0 : vector<1x32xf32>, vector<1x32xf32> -> vector<2x32xf32>
    %70 = tpu.concatenate %30, %59 in 0 : vector<1x32xf32>, vector<1x32xf32> -> vector<2x32xf32>
    %71 = tpu.concatenate %39, %68 in 0 : vector<1x32xf32>, vector<1x32xf32> -> vector<2x32xf32>
    %c0_30 = arith.constant 0 : index
    %c0_31 = arith.constant 0 : index
    %72 = vector.load %arg15[%c0_30, %c0_31] : memref<2x32xf32, #tpu.memory_space<vmem>>, vector<2x32xf32>
    tpu.vector_store %arg15[%c0_30, %c0_31], %69 {strides = array<i32>} : memref<2x32xf32, #tpu.memory_space<vmem>>, vector<2x32xf32>,
    %c0_32 = arith.constant 0 : index
    %c0_33 = arith.constant 0 : index
    %73 = vector.load %arg6[%c0_32, %c0_33] : memref<32x32xf32, #tpu.memory_space<vmem>>, vector<32x32xf32>
    %cst_34 = arith.constant dense<0.000000e+00> : vector<2x32xf32>
    %74 = tpu.matmul %69, %73, %cst_34 {dimension_numbers = #tpu.dot_dimension_numbers<[1], [0], [0], [1], [0, 0, 1, 1], [], []>} : vector<2x32xf32>, vector<32x32xf32>, vector<2x32xf32> -> vector<2x32xf32>
    %c0_35 = arith.constant 0 : index
    %c0_36 = arith.constant 0 : index
    %75 = vector.load %arg7[%c0_35, %c0_36] : memref<32x32xf32, #tpu.memory_space<vmem>>, vector<32x32xf32>
    %cst_37 = arith.constant dense<0.000000e+00> : vector<2x32xf32>
    %76 = tpu.matmul %70, %75, %cst_37 {dimension_numbers = #tpu.dot_dimension_numbers<[1], [0], [0], [1], [0, 0, 1, 1], [], []>} : vector<2x32xf32>, vector<32x32xf32>, vector<2x32xf32> -> vector<2x32xf32>
    %77 = arith.addf %74, %76 : vector<2x32xf32>
    %c0_38 = arith.constant 0 : index
    %c0_39 = arith.constant 0 : index
    %78 = vector.load %arg8[%c0_38, %c0_39] : memref<32x32xf32, #tpu.memory_space<vmem>>, vector<32x32xf32>
    %cst_40 = arith.constant dense<0.000000e+00> : vector<2x32xf32>
    %79 = tpu.matmul %71, %78, %cst_40 {dimension_numbers = #tpu.dot_dimension_numbers<[1], [0], [0], [1], [0, 0, 1, 1], [], []>} : vector<2x32xf32>, vector<32x32xf32>, vector<2x32xf32> -> vector<2x32xf32>
    %80 = arith.addf %77, %79 : vector<2x32xf32>
    %c0_41 = arith.constant 0 : index
    %c0_42 = arith.constant 0 : index
    %81 = vector.load %arg9[%c0_41, %c0_42] : memref<1x32xf32, #tpu.memory_space<vmem>>, vector<1x32xf32>
    %82 = vector.broadcast %81 : vector<1x32xf32> to vector<2x32xf32>
    %83 = arith.addf %80, %82 : vector<2x32xf32>
    %cst_43 = arith.constant 0.000000e+00 : f32
    %84 = vector.broadcast %cst_43 : f32 to vector<2x32xf32>
    %85 = arith.maximumf %83, %84 : vector<2x32xf32>
    %c0_44 = arith.constant 0 : index
    %c0_45 = arith.constant 0 : index
    %86 = vector.load %arg10[%c0_44, %c0_45] : memref<32x32xf32, #tpu.memory_space<vmem>>, vector<32x32xf32>
    %cst_46 = arith.constant dense<0.000000e+00> : vector<2x32xf32>
    %87 = tpu.matmul %85, %86, %cst_46 {dimension_numbers = #tpu.dot_dimension_numbers<[1], [0], [0], [1], [0, 0, 1, 1], [], []>} : vector<2x32xf32>, vector<32x32xf32>, vector<2x32xf32> -> vector<2x32xf32>
    %c0_47 = arith.constant 0 : index
    %c0_48 = arith.constant 0 : index
    %88 = vector.load %arg11[%c0_47, %c0_48] : memref<1x32xf32, #tpu.memory_space<vmem>>, vector<1x32xf32>
    %89 = vector.broadcast %88 : vector<1x32xf32> to vector<2x32xf32>
    %90 = arith.addf %87, %89 : vector<2x32xf32>
    %cst_49 = arith.constant 0.000000e+00 : f32
    %91 = vector.broadcast %cst_49 : f32 to vector<2x32xf32>
    %92 = arith.maximumf %90, %91 : vector<2x32xf32>
    %c0_50 = arith.constant 0 : index
    %c0_51 = arith.constant 0 : index
    %93 = vector.load %arg12[%c0_50, %c0_51] : memref<32x5xf32, #tpu.memory_space<vmem>>, vector<32x5xf32>
    %cst_52 = arith.constant dense<0.000000e+00> : vector<2x5xf32>
    %94 = tpu.matmul %92, %93, %cst_52 {dimension_numbers = #tpu.dot_dimension_numbers<[1], [0], [0], [1], [0, 0, 1, 1], [], []>} : vector<2x32xf32>, vector<32x5xf32>, vector<2x5xf32> -> vector<2x5xf32>
    %c0_53 = arith.constant 0 : index
    %c0_54 = arith.constant 0 : index
    %95 = vector.load %arg13[%c0_53, %c0_54] : memref<1x5xf32, #tpu.memory_space<vmem>>, vector<1x5xf32>
    %96 = vector.broadcast %95 : vector<1x5xf32> to vector<2x5xf32>
    %97 = arith.addf %94, %96 : vector<2x5xf32>
    %c0_55 = arith.constant 0 : index
    %c0_56 = arith.constant 0 : index
    %98 = vector.load %arg14[%c0_55, %c0_56] : memref<2x5xf32, #tpu.memory_space<vmem>>, vector<2x5xf32>
    tpu.vector_store %arg14[%c0_55, %c0_56], %97 {strides = array<i32>} : memref<2x5xf32, #tpu.memory_space<vmem>>, vector<2x5xf32>,
    return
  }
}

</mosaic_0001>

<bundles_post_ra>
// kernel: gcn_classifier_forward.4
= control target key start
LH: loop header
LB: loop body
LE: loop exit
PB: predicated region body
PF: predicated region fallthrough
CT: control target
= control target key end

     0   :  { %s1023_s18 = smov 0   ;;  %s1451_s0 = inlined_call_operand.vmem [shape: f32[16,1024], index: 0, kind: input, shape index: {}]   ;;  %s1452_s1 = inlined_call_operand.vmem [shape: f32[16,4], index: 1, kind: input, shape index: {}]   ;;  %s1453_s2 = inlined_call_operand.vmem [shape: f32[1024,32], index: 2, kind: input, shape index: {}]   ;;  %s1454_s3 = inlined_call_operand.vmem [shape: f32[4,32], index: 3, kind: input, shape index: {}]   ;;  %s1455_s4 = inlined_call_operand.vmem [shape: f32[1,32], index: 4, kind: input, shape index: {}]   ;;  %s1456_s5 = inlined_call_operand.vmem [shape: f32[16,32], index: 5, kind: output, shape index: {}]  }
   0x1 LB: > { %s811_s19 = sadd.s32 4294967295, %s989_s18   ;;  %p815_p0 = scmp.ge.s32.totalorder %s989_s18, 1  ;;  %s989_s18 = sphi %s1023_s18, %s15_s18  }
   0x2   : > { %p196_p1 = scmp.lt.s32.totalorder %s989_s18, 3 }
   0x4   : > { %p197_p2 = pnand %p815_p0, %p196_p1 }
   0x5   : > { %p227_p3 = scmp.lt.s32.totalorder (!%p197_p2), %s811_s19, 1 }
   0x6   : > { %200 = sbr.rel (%p197_p2) target bundleno = 285 (0x11d), region = 40 }
   0xb   : > { %v279_v0 = vld [vmem:[%s1453_s2 + $0xf8] sm:$0xff]  ;;  %v278_v2 = vld [vmem:[%s1453_s2 + $0xf0] sm:$0xff]  ;;  %vm382_vm0 = vcmask 1043456   ;;  %v991_v3 = vmov 0.0   ;;  %v377_v5 = vld [vmem:[%s1454_s3] sm:$0xf] }
   0xc   : > { %v263_v1 = vld [vmem:[%s1453_s2 + $0x78] sm:$0xff]  ;;  %828 = vmatprep.subr.mxu1 %v279_v0  ;;  %968 = vmatprep.subr.mxu0 %v991_v3  ;;  %v262_v4 = vld [vmem:[%s1453_s2 + $0x70] sm:$0xff]  ;;  %v277_v6 = vld [vmem:[%s1453_s2 + $0xe8] sm:$0xff]  ;;  %vm992_vm1 = vmmov 0   ;;  %s1458_s19 = smov (!%p227_p3, %s811_s19), 1  ;;  %vm378_vm2 = vcmask 31744  }
   0xd   : > { %829 = vmatpush3.msra.mxu1 %v263_v1  ;;  %969 = vmatpush3.msk.msra.mxu0 %vm382_vm0, %v377_v5  ;;  %v311_v7 = vld [vmem:[%s1453_s2 + $0x1f8] sm:$0xff]  ;;  %v261_v8 = vld [vmem:[%s1453_s2 + $0x68] sm:$0xff]  ;;  %v276_v9 = vld [vmem:[%s1453_s2 + $0xe0] sm:$0xff]  ;;  %s818_s13 = sshll.u32 %s1458_s19, 3  ;;  %s825_s27 = sshll.u32 %s1458_s19, 6  ;;  %vm744_vm3 = vcmask 261120  }
   0xe   : > { %830 = vmatprep.subr.mxu1 %v278_v2  ;;  %970 = vmatprep.mubr.msk.f32.mxu0 %vm992_vm1, %v991_v3  ;;  %v260_v10 = vld [vmem:[%s1453_s2 + $0x60] sm:$0xff]  ;;  %s235_s20 = scalar_lea.vmem %s1452_s1, %s818_s13  ;;  %v295_v11 = vld [vmem:[%s1453_s2 + $0x178] sm:$0xff]  ;;  %v310_v14 = vld [vmem:[%s1453_s2 + $0x1f0] sm:$0xff]  ;;  %s239_s6 = scalar_lea.vmem %s1456_s5, %s818_s13 }
   0xf   : > { %831 = vmatpush3.msra.mxu1 %v262_v4  ;;  %863 = vmatprep.subr.mxu0 %v311_v7  ;;  %v275_v12 = vld [vmem:[%s1453_s2 + $0xd8] sm:$0xff]  ;;  %v376_v13 = vld [vmem:[%s235_s20] sm:$0xff]  ;;  %v294_v16 = vld [vmem:[%s1453_s2 + $0x170] sm:$0xff]  ;;  %s1199_s20 = scalar_lea.vmem %s1451_s0, %s825_s27 }
  0x10   : > { %832 = vmatprep.subr.mxu1 %v277_v6  ;;  %v259_v15 = vld [vmem:[%s1453_s2 + $0x58] sm:$0xff]  ;;  %971 = vmatmul.mubr.msk.f32.vlgmr.msra.gmra.mxu0 %vm378_vm2, %v376_v13  ;;  %v274_v17 = vld [vmem:[%s1453_s2 + $0xd0] sm:$0xff]  ;;  %v309_v18 = vld [vmem:[%s1453_s2 + $0x1e8] sm:$0xff] }
  0x11   : > { %833 = vmatpush3.msra.mxu1 %v261_v8  ;;  %864 = vmatpush3.msra.mxu0 %v295_v11  ;;  %v258_v19 = vld [vmem:[%s1453_s2 + $0x50] sm:$0xff]  ;;  %v293_v20 = vld [vmem:[%s1453_s2 + $0x168] sm:$0xff]  ;;  %v308_v22 = vld [vmem:[%s1453_s2 + $0x1e0] sm:$0xff] }
  0x12   : > { %834 = vmatprep.subr.mxu1 %v276_v9  ;;  %865 = vmatprep.subr.mxu0 %v310_v14  ;;  %v273_v21 = vld [vmem:[%s1453_s2 + $0xc8] sm:$0xff]  ;;  %v292_v24 = vld [vmem:[%s1453_s2 + $0x160] sm:$0xff]  ;;  %v307_v26 = vld [vmem:[%s1453_s2 + $0x1d8] sm:$0xff] }
  0x13   : > { %835 = vmatpush3.msra.mxu1 %v260_v10  ;;  %866 = vmatpush3.msra.mxu0 %v294_v16  ;;  %v257_v23 = vld [vmem:[%s1453_s2 + $0x48] sm:$0xff]  ;;  %v272_v25 = vld [vmem:[%s1453_s2 + $0xc0] sm:$0xff]  ;;  %v291_v28 = vld [vmem:[%s1453_s2 + $0x158] sm:$0xff] }
  0x14   : > { %836 = vmatprep.subr.mxu1 %v275_v12  ;;  %867 = vmatprep.subr.mxu0 %v309_v18  ;;  %v256_v27 = vld [vmem:[%s1453_s2 + $0x40] sm:$0xff]  ;;  %v271_v29 = vld [vmem:[%s1453_s2 + $0xb8] sm:$0xff]  ;;  %v306_v30 = vld [vmem:[%s1453_s2 + $0x1d0] sm:$0xff] }
  0x15   : > { %837 = vmatpush3.msra.mxu1 %v259_v15  ;;  %868 = vmatpush3.msra.mxu0 %v293_v20  ;;  %v255_v31 = vld [vmem:[%s1453_s2 + $0x38] sm:$0xff]  ;;  %v290_v32 = vld [vmem:[%s1453_s2 + $0x150] sm:$0xff]  ;;  %v305_v34 = vld [vmem:[%s1453_s2 + $0x1c8] sm:$0xff] }
  0x16   : > { %838 = vmatprep.subr.mxu1 %v274_v17  ;;  %869 = vmatprep.subr.mxu0 %v308_v22  ;;  %v270_v33 = vld [vmem:[%s1453_s2 + $0xb0] sm:$0xff]  ;;  %v289_v36 = vld [vmem:[%s1453_s2 + $0x148] sm:$0xff]  ;;  %v304_v38 = vld [vmem:[%s1453_s2 + $0x1c0] sm:$0xff] }
  0x17   : > { %839 = vmatpush3.msra.mxu1 %v258_v19  ;;  %870 = vmatpush3.msra.mxu0 %v292_v24  ;;  %v254_v35 = vld [vmem:[%s1453_s2 + $0x30] sm:$0xff]  ;;  %v269_v37 = vld [vmem:[%s1453_s2 + $0xa8] sm:$0xff]  ;;  %v288_v40 = vld [vmem:[%s1453_s2 + $0x140] sm:$0xff] }
  0x18   : > { %840 = vmatprep.subr.mxu1 %v273_v21  ;;  %871 = vmatprep.subr.mxu0 %v307_v26  ;;  %v253_v39 = vld [vmem:[%s1453_s2 + $0x28] sm:$0xff]  ;;  %v268_v41 = vld [vmem:[%s1453_s2 + $0xa0] sm:$0xff]  ;;  %v303_v42 = vld [vmem:[%s1453_s2 + $0x1b8] sm:$0xff] }
  0x19   : > { %841 = vmatpush3.msra.mxu1 %v257_v23  ;;  %872 = vmatpush3.msra.mxu0 %v291_v28  ;;  %v252_v43 = vld [vmem:[%s1453_s2 + $0x20] sm:$0xff]  ;;  %v287_v44 = vld [vmem:[%s1453_s2 + $0x138] sm:$0xff]  ;;  %v302_v46 = vld [vmem:[%s1453_s2 + $0x1b0] sm:$0xff] }
  0x1a   : > { %842 = vmatprep.subr.mxu1 %v272_v25  ;;  %873 = vmatprep.subr.mxu0 %v306_v30  ;;  %v267_v45 = vld [vmem:[%s1453_s2 + $0x98] sm:$0xff]  ;;  %v286_v48 = vld [vmem:[%s1453_s2 + $0x130] sm:$0xff]  ;;  %v301_v50 = vld [vmem:[%s1453_s2 + $0x1a8] sm:$0xff] }
  0x1b   : > { %843 = vmatpush3.msra.mxu1 %v256_v27  ;;  %874 = vmatpush3.msra.mxu0 %v290_v32  ;;  %v251_v47 = vld [vmem:[%s1453_s2 + $0x18] sm:$0xff]  ;;  %v266_v49 = vld [vmem:[%s1453_s2 + $0x90] sm:$0xff]  ;;  %v285_v52 = vld [vmem:[%s1453_s2 + $0x128] sm:$0xff] }
  0x1c   : > { %844 = vmatprep.subr.mxu1 %v271_v29  ;;  %875 = vmatprep.subr.mxu0 %v305_v34  ;;  %v250_v51 = vld [vmem:[%s1453_s2 + $0x10] sm:$0xff]  ;;  %v265_v53 = vld [vmem:[%s1453_s2 + $0x88] sm:$0xff]  ;;  %v300_v54 = vld [vmem:[%s1453_s2 + $0x1a0] sm:$0xff] }
  0x1d   : > { %845 = vmatpush3.msra.mxu1 %v255_v31  ;;  %876 = vmatpush3.msra.mxu0 %v289_v36  ;;  %v249_v55 = vld [vmem:[%s1453_s2 + $0x8] sm:$0xff]  ;;  %v284_v56 = vld [vmem:[%s1453_s2 + $0x120] sm:$0xff]  ;;  %v299_v58 = vld [vmem:[%s1453_s2 + $0x198] sm:$0xff] }
  0x1e   : > { %846 = vmatprep.subr.mxu1 %v270_v33  ;;  %877 = vmatprep.subr.mxu0 %v304_v38  ;;  %v264_v57 = vld [vmem:[%s1453_s2 + $0x80] sm:$0xff]  ;;  %v283_v60 = vld [vmem:[%s1453_s2 + $0x118] sm:$0xff]  ;;  %v241_v61 = vld [vmem:[%s1199_s20 + $0x8] sm:$0xff] }
  0x1f   : > { %847 = vmatpush3.msra.mxu1 %v254_v35  ;;  %878 = vmatpush3.msra.mxu0 %v288_v40  ;;  %v248_v59 = vld [vmem:[%s1453_s2] sm:$0xff]  ;;  %v298_v62 = vld [vmem:[%s1453_s2 + $0x190] sm:$0xff]  ;;  %v343_v1 = vld [vmem:[%s1453_s2 + $0x2f8] sm:$0xff] }
  0x20   : > { %848 = vmatprep.subr.mxu1 %v269_v37  ;;  %879 = vmatprep.subr.mxu0 %v303_v42  ;;  %v240_v63 = vld [vmem:[%s1199_s20] sm:$0xff]  ;;  %v282_v0 = vld [vmem:[%s1453_s2 + $0x110] sm:$0xff]  ;;  %v297_v2 = vld [vmem:[%s1453_s2 + $0x188] sm:$0xff] }
  0x21   : > { %849 = vmatpush3.msra.mxu1 %v253_v39  ;;  %880 = vmatpush3.msra.mxu0 %v287_v44  ;;  %v327_v3 = vld [vmem:[%s1453_s2 + $0x278] sm:$0xff]  ;;  %v281_v4 = vld [vmem:[%s1453_s2 + $0x108] sm:$0xff]  ;;  %v342_v5 = vld [vmem:[%s1453_s2 + $0x2f0] sm:$0xff] }
  0x22   : > { %850 = vmatprep.subr.mxu1 %v268_v41  ;;  %881 = vmatprep.subr.mxu0 %v302_v46  ;;  %v296_v6 = vld [vmem:[%s1453_s2 + $0x180] sm:$0xff]  ;;  %v326_v7 = vld [vmem:[%s1453_s2 + $0x270] sm:$0xff]  ;;  %v243_v9 = vld [vmem:[%s1199_s20 + $0x18] sm:$0xff] }
  0x23   : > { %851 = vmatpush3.msra.mxu1 %v252_v43  ;;  %882 = vmatpush3.msra.mxu0 %v286_v48  ;;  %v280_v8 = vld [vmem:[%s1453_s2 + $0x100] sm:$0xff]  ;;  %v341_v10 = vld [vmem:[%s1453_s2 + $0x2e8] sm:$0xff]  ;;  %v242_v11 = vld [vmem:[%s1199_s20 + $0x10] sm:$0xff] }
  0x24   : > { %852 = vmatprep.subr.mxu1 %v267_v45  ;;  %883 = vmatprep.subr.mxu0 %v301_v50  ;;  %v325_v12 = vld [vmem:[%s1453_s2 + $0x268] sm:$0xff]  ;;  %v375_v13 = vld [vmem:[%s1453_s2 + $0x3f8] sm:$0xff]  ;;  %v340_v14 = vld [vmem:[%s1453_s2 + $0x2e0] sm:$0xff] }
  0x25   : > { %853 = vmatpush3.msra.mxu1 %v251_v47  ;;  %884 = vmatpush3.msra.mxu0 %v285_v52  ;;  %v359_v15 = vld [vmem:[%s1453_s2 + $0x378] sm:$0xff]  ;;  %v324_v16 = vld [vmem:[%s1453_s2 + $0x260] sm:$0xff]  ;;  %v374_v17 = vld [vmem:[%s1453_s2 + $0x3f0] sm:$0xff] }
  0x26   : > { %854 = vmatprep.subr.mxu1 %v266_v49  ;;  %885 = vmatprep.subr.mxu0 %v300_v54  ;;  %v339_v18 = vld [vmem:[%s1453_s2 + $0x2d8] sm:$0xff]  ;;  %v358_v19 = vld [vmem:[%s1453_s2 + $0x370] sm:$0xff]  ;;  %v373_v21 = vld [vmem:[%s1453_s2 + $0x3e8] sm:$0xff] }
  0x27   : > { %855 = vmatpush3.msra.mxu1 %v250_v51  ;;  %886 = vmatpush3.msra.mxu0 %v284_v56  ;;  %v323_v20 = vld [vmem:[%s1453_s2 + $0x258] sm:$0xff]  ;;  %v338_v22 = vld [vmem:[%s1453_s2 + $0x2d0] sm:$0xff]  ;;  %v357_v23 = vld [vmem:[%s1453_s2 + $0x368] sm:$0xff] }
  0x28   : > { %856 = vmatprep.subr.mxu1 %v265_v53  ;;  %887 = vmatprep.subr.mxu0 %v299_v58  ;;  %v322_v24 = vld [vmem:[%s1453_s2 + $0x250] sm:$0xff]  ;;  %v372_v25 = vld [vmem:[%s1453_s2 + $0x3e0] sm:$0xff]  ;;  %v337_v26 = vld [vmem:[%s1453_s2 + $0x2c8] sm:$0xff] }
  0x29   : > { %857 = vmatpush3.msra.mxu1 %v249_v55  ;;  %888 = vmatpush3.msra.mxu0 %v283_v60  ;;  %v356_v27 = vld [vmem:[%s1453_s2 + $0x360] sm:$0xff]  ;;  %v321_v28 = vld [vmem:[%s1453_s2 + $0x248] sm:$0xff]  ;;  %v371_v29 = vld [vmem:[%s1453_s2 + $0x3d8] sm:$0xff] }
  0x2a   : > { %858 = vmatprep.subr.mxu1 %v264_v57  ;;  %520 = vmatprep.mubr.f32.mxu1 %v241_v61  ;;  %v336_v30 = vld [vmem:[%s1453_s2 + $0x2c0] sm:$0xff]  ;;  %v355_v31 = vld [vmem:[%s1453_s2 + $0x358] sm:$0xff]  ;;  %v370_v33 = vld [vmem:[%s1453_s2 + $0x3d0] sm:$0xff] }
  0x2b   : > { %859 = vmatpush3.msra.mxu1 %v248_v59  ;;  %889 = vmatprep.subr.mxu0 %v298_v62  ;;  %v320_v32 = vld [vmem:[%s1453_s2 + $0x240] sm:$0xff]  ;;  %v335_v34 = vld [vmem:[%s1453_s2 + $0x2b8] sm:$0xff]  ;;  %v354_v35 = vld [vmem:[%s1453_s2 + $0x350] sm:$0xff] }
  0x2c   : > { %521 = vmatmul.mubr.f32.vlgmr.msra.gmra.mxu1 %v240_v63  ;;  %890 = vmatpush3.msra.mxu0 %v282_v0  ;;  %v319_v36 = vld [vmem:[%s1453_s2 + $0x238] sm:$0xff]  ;;  %v369_v37 = vld [vmem:[%s1453_s2 + $0x3c8] sm:$0xff]  ;;  %v334_v38 = vld [vmem:[%s1453_s2 + $0x2b0] sm:$0xff] }
  0x2d   : > { %898 = vmatprep.subr.mxu1 %v343_v1  ;;  %891 = vmatprep.subr.mxu0 %v297_v2  ;;  %v353_v39 = vld [vmem:[%s1453_s2 + $0x348] sm:$0xff]  ;;  %v318_v40 = vld [vmem:[%s1453_s2 + $0x230] sm:$0xff]  ;;  %v368_v41 = vld [vmem:[%s1453_s2 + $0x3c0] sm:$0xff] }
  0x2e   : > { %899 = vmatpush3.msra.mxu1 %v327_v3  ;;  %892 = vmatpush3.msra.mxu0 %v281_v4  ;;  %v333_v42 = vld [vmem:[%s1453_s2 + $0x2a8] sm:$0xff]  ;;  %v352_v43 = vld [vmem:[%s1453_s2 + $0x340] sm:$0xff]  ;;  %v367_v45 = vld [vmem:[%s1453_s2 + $0x3b8] sm:$0xff] }
  0x2f   : > { %900 = vmatprep.subr.mxu1 %v342_v5  ;;  %893 = vmatprep.subr.mxu0 %v296_v6  ;;  %v317_v44 = vld [vmem:[%s1453_s2 + $0x228] sm:$0xff]  ;;  %v332_v46 = vld [vmem:[%s1453_s2 + $0x2a0] sm:$0xff]  ;;  %v351_v47 = vld [vmem:[%s1453_s2 + $0x338] sm:$0xff] }
  0x30   : > { %901 = vmatpush3.msra.mxu1 %v326_v7  ;;  %894 = vmatpush3.msra.mxu0 %v280_v8  ;;  %v316_v48 = vld [vmem:[%s1453_s2 + $0x220] sm:$0xff]  ;;  %v366_v49 = vld [vmem:[%s1453_s2 + $0x3b0] sm:$0xff]  ;;  %v331_v50 = vld [vmem:[%s1453_s2 + $0x298] sm:$0xff] }
  0x31   : > { %590 = vmatprep.mubr.f32.mxu0 %v243_v9  ;;  %902 = vmatprep.subr.mxu1 %v341_v10  ;;  %v350_v51 = vld [vmem:[%s1453_s2 + $0x330] sm:$0xff]  ;;  %v315_v52 = vld [vmem:[%s1453_s2 + $0x218] sm:$0xff]  ;;  %v365_v53 = vld [vmem:[%s1453_s2 + $0x3a8] sm:$0xff] }
  0x32   : > { %591 = vmatmul.mubr.f32.vlgmr.msra.gmra.mxu0 %v242_v11  ;;  %903 = vmatpush3.msra.mxu1 %v325_v12  ;;  %v330_v54 = vld [vmem:[%s1453_s2 + $0x290] sm:$0xff]  ;;  %v349_v55 = vld [vmem:[%s1453_s2 + $0x328] sm:$0xff]  ;;  %v364_v57 = vld [vmem:[%s1453_s2 + $0x3a0] sm:$0xff] }
  0x33   : > { %933 = vmatprep.subr.mxu0 %v375_v13  ;;  %904 = vmatprep.subr.mxu1 %v340_v14  ;;  %v314_v56 = vld [vmem:[%s1453_s2 + $0x210] sm:$0xff]  ;;  %v329_v58 = vld [vmem:[%s1453_s2 + $0x288] sm:$0xff]  ;;  %v348_v59 = vld [vmem:[%s1453_s2 + $0x320] sm:$0xff] }
  0x34   : > { %934 = vmatpush3.msra.mxu0 %v359_v15  ;;  %905 = vmatpush3.msra.mxu1 %v324_v16  ;;  %v313_v60 = vld [vmem:[%s1453_s2 + $0x208] sm:$0xff]  ;;  %v363_v61 = vld [vmem:[%s1453_s2 + $0x398] sm:$0xff]  ;;  %v328_v62 = vld [vmem:[%s1453_s2 + $0x280] sm:$0xff] }
  0x35   : > { %935 = vmatprep.subr.mxu0 %v374_v17  ;;  %906 = vmatprep.subr.mxu1 %v339_v18  ;;  %v347_v63 = vld [vmem:[%s1453_s2 + $0x318] sm:$0xff]  ;;  %v312_v0 = vld [vmem:[%s1453_s2 + $0x200] sm:$0xff]  ;;  %v245_v1 = vld [vmem:[%s1199_s20 + $0x28] sm:$0xff] }
  0x36   : > { %936 = vmatpush3.msra.mxu0 %v358_v19  ;;  %907 = vmatpush3.msra.mxu1 %v323_v20  ;;  %v362_v2 = vld [vmem:[%s1453_s2 + $0x390] sm:$0xff]  ;;  %v244_v3 = vld [vmem:[%s1199_s20 + $0x20] sm:$0xff]  ;;  %v247_v5 = vld [vmem:[%s1199_s20 + $0x38] sm:$0xff] }
  0x37   : > { %937 = vmatprep.subr.mxu0 %v373_v21  ;;  %908 = vmatprep.subr.mxu1 %v338_v22  ;;  %v346_v4 = vld [vmem:[%s1453_s2 + $0x310] sm:$0xff]  ;;  %v361_v6 = vld [vmem:[%s1453_s2 + $0x388] sm:$0xff]  ;;  %v360_v8 = vld [vmem:[%s1453_s2 + $0x380] sm:$0xff] }
  0x38   : > { %938 = vmatpush3.msra.mxu0 %v357_v23  ;;  %909 = vmatpush3.msra.mxu1 %v322_v24  ;;  %v345_v7 = vld [vmem:[%s1453_s2 + $0x308] sm:$0xff]  ;;  %v344_v9 = vld [vmem:[%s1453_s2 + $0x300] sm:$0xff]  ;;  %v246_v10 = vld [vmem:[%s1199_s20 + $0x30] sm:$0xff] }
  0x39   : > { %939 = vmatprep.subr.mxu0 %v372_v25  ;;  %910 = vmatprep.subr.mxu1 %v337_v26 }
  0x3a   : > { %940 = vmatpush3.msra.mxu0 %v356_v27  ;;  %911 = vmatpush3.msra.mxu1 %v321_v28  ;;  %v822_v28 = vld [vmem:[%s1455_s4] ss:$0 sm:$0xff] }
  0x3b   : > { %941 = vmatprep.subr.mxu0 %v371_v29  ;;  %912 = vmatprep.subr.mxu1 %v336_v30 }
  0x3c   : > { %942 = vmatpush3.msra.mxu0 %v355_v31  ;;  %913 = vmatpush3.msra.mxu1 %v320_v32 }
  0x3d   : > { %943 = vmatprep.subr.mxu0 %v370_v33  ;;  %914 = vmatprep.subr.mxu1 %v335_v34 }
  0x3e   : > { %944 = vmatpush3.msra.mxu0 %v354_v35  ;;  %915 = vmatpush3.msra.mxu1 %v319_v36 }
  0x3f   : > { %945 = vmatprep.subr.mxu0 %v369_v37  ;;  %916 = vmatprep.subr.mxu1 %v334_v38 }
  0x40   : > { %946 = vmatpush3.msra.mxu0 %v353_v39  ;;  %917 = vmatpush3.msra.mxu1 %v318_v40 }
  0x41   : > { %947 = vmatprep.subr.mxu0 %v368_v41  ;;  %918 = vmatprep.subr.mxu1 %v333_v42 }
  0x42   : > { %948 = vmatpush3.msra.mxu0 %v352_v43  ;;  %919 = vmatpush3.msra.mxu1 %v317_v44 }
  0x43   : > { %949 = vmatprep.subr.mxu0 %v367_v45  ;;  %920 = vmatprep.subr.mxu1 %v332_v46 }
  0x44   : > { %950 = vmatpush3.msra.mxu0 %v351_v47  ;;  %921 = vmatpush3.msra.mxu1 %v316_v48 }
  0x45   : > { %951 = vmatprep.subr.mxu0 %v366_v49  ;;  %922 = vmatprep.subr.mxu1 %v331_v50 }
  0x46   : > { %952 = vmatpush3.msra.mxu0 %v350_v51  ;;  %923 = vmatpush3.msra.mxu1 %v315_v52 }
  0x47   : > { %953 = vmatprep.subr.mxu0 %v365_v53  ;;  %924 = vmatprep.subr.mxu1 %v330_v54 }
  0x48   : > { %954 = vmatpush3.msra.mxu0 %v349_v55  ;;  %925 = vmatpush3.msra.mxu1 %v314_v56 }
  0x49   : > { %955 = vmatprep.subr.mxu0 %v364_v57  ;;  %926 = vmatprep.subr.mxu1 %v329_v58 }
  0x4a   : > { %956 = vmatpush3.msra.mxu0 %v348_v59  ;;  %927 = vmatpush3.msra.mxu1 %v313_v60 }
  0x4b   : > { %957 = vmatprep.subr.mxu0 %v363_v61  ;;  %928 = vmatprep.subr.mxu1 %v328_v62 }
  0x4c   : > { %958 = vmatpush3.msra.mxu0 %v347_v63  ;;  %929 = vmatpush3.msra.mxu1 %v312_v0 }
  0x4d   : > { %660 = vmatprep.mubr.f32.mxu1 %v245_v1  ;;  %959 = vmatprep.subr.mxu0 %v362_v2 }
  0x4e   : > { %661 = vmatmul.mubr.f32.vlgmr.msra.gmra.mxu1 %v244_v3  ;;  %960 = vmatpush3.msra.mxu0 %v346_v4 }
  0x4f   : > { %730 = vmatprep.mubr.f32.mxu0 %v247_v5  ;;  %961 = vmatprep.subr.mxu0 %v361_v6 }
  0x50   : > { %962 = vmatpush3.msra.mxu0 %v345_v7 }
  0x51   : > { %963 = vmatprep.subr.mxu0 %v360_v8 }
  0x52   : > { %964 = vmatpush3.msra.mxu0 %v344_v9 }
  0x53   : > { %731 = vmatmul.mubr.f32.vlgmr.msra.gmra.mxu0 %v246_v10 }
  0xd0   : > { %v452_v11 = vpop.f32.mrf.mxu0 }
  0xd2   : > { %v972_v12 = vpop.f32.mrf.mxu0 }
  0xec   : > { %v860_v13 = vpop.f32.mrf.mxu1 }
  0xee   : > { %v861_v15 = vpop.f32.mrf.mxu1 }
  0xef   : > { %v862_v18 = vadd.f32 %v861_v15, %v860_v13 }
  0xf1   : > { %v523_v21 = vadd.f32 %v862_v18, %v452_v11 }
  0xf2   : > { %v895_v14 = vpop.f32.mrf.mxu0 }
  0xf4   : > { %v896_v16 = vpop.f32.mrf.mxu0 }
  0xf5   : > { %v897_v20 = vadd.f32 %v896_v16, %v895_v14 }
  0xf7   : > { %v593_v24 = vadd.f32 %v897_v20, %v523_v21 }
 0x10e   : > { %v930_v17 = vpop.f32.mrf.mxu1 }
 0x110   : > { %v931_v19 = vpop.f32.mrf.mxu1 }
 0x111   : > { %v932_v22 = vadd.f32 %v931_v19, %v930_v17 }
 0x113   : > { %v965_v23 = vpop.f32.mrf.mxu0  ;;  %v663_v26 = vadd.f32 %v932_v22, %v593_v24 }
 0x115   : > { %v966_v25 = vpop.f32.mrf.mxu0 }
 0x116   : > { %v967_v27 = vadd.f32 %v966_v25, %v965_v23 }
 0x118   : > { %v733_v29 = vadd.f32 %v967_v27, %v663_v26 }
 0x11a   : > { %v743_v30 = vadd.f32 %v822_v28, %v733_v29 }
 0x11c   : > { %745 = vst.msk [vmem:[%s239_s6] sm:$0xff] %vm744_vm3, %v743_v30 }
 0x11d PF: > { %s15_s18 = sadd.s32 1, %s989_s18  }
 0x11e   : > { %p12_p4 = scmp.ge.s32.totalorder %s15_s18, 4  }
 0x120   :  { %14 = sbr.rel (!%p12_p4) target bundleno = 1 (0x1), region = 73 }

// kernel: gcn_classifier_forward.5
= control target key start
LH: loop header
LB: loop body
LE: loop exit
PB: predicated region body
PF: predicated region fallthrough
CT: control target
= control target key end

     0   :  { %s1670_s29 = smov 0   ;;  %s1908_s0 = inlined_call_operand.vmem [shape: f32[2,8,8], index: 0, kind: input, shape index: {}]   ;;  %s1909_s1 = inlined_call_operand.vmem [shape: f32[2,8,32], index: 1, kind: input, shape index: {}]   ;;  %s1910_s2 = inlined_call_operand.vmem [shape: f32[32,16], index: 2, kind: input, shape index: {}]   ;;  %s1911_s3 = inlined_call_operand.vmem [shape: f32[1,16], index: 3, kind: input, shape index: {}]   ;;  %s1912_s4 = inlined_call_operand.vmem [shape: f32[48,16], index: 4, kind: input, shape index: {}]   ;;  %s1913_s5 = inlined_call_operand.vmem [shape: f32[1,16], index: 5, kind: input, shape index: {}]   ;;  %s1914_s6 = inlined_call_operand.vmem [shape: f32[32,32], index: 6, kind: input, shape index: {}]   ;;  %s1915_s7 = inlined_call_operand.vmem [shape: f32[1,32], index: 7, kind: input, shape index: {}]   ;;  %s1916_s8 = inlined_call_operand.vmem [shape: f32[32,16], index: 8, kind: input, shape index: {}]   ;;  %s1917_s9 = inlined_call_operand.vmem [shape: f32[1,16], index: 9, kind: input, shape index: {}]   ;;  %s1918_s10 = inlined_call_operand.vmem [shape: f32[48,16], index: 10, kind: input, shape index: {}]   ;;  %s1919_s11 = inlined_call_operand.vmem [shape: f32[1,16], index: 11, kind: input, shape index: {}]   ;;  %s1920_s12 = inlined_call_operand.vmem [shape: f32[32,32], index: 12, kind: input, shape index: {}]   ;;  %s1921_s13 = inlined_call_operand.vmem [shape: f32[1,32], index: 13, kind: input, shape index: {}]   ;;  %s1922_s14 = inlined_call_operand.vmem [shape: f32[2,8,64], index: 14, kind: output, shape index: {}]  }
   0x1 LB: > { %s1409_s30 = sadd.s32 4294967295, %s1588_s29   ;;  %p1413_p0 = scmp.ge.s32.totalorder %s1588_s29, 1  ;;  %s1588_s29 = sphi %s1670_s29, %s24_s29  }
   0x2   : > { %p420_p1 = scmp.lt.s32.totalorder %s1588_s29, 3 }
   0x4   : > { %p421_p2 = pnand %p1413_p0, %p420_p1 }
   0x5   : > { %p468_p3 = scmp.lt.s32.totalorder (!%p421_p2), %s1409_s30, 1  ;;  %s1592_s17 = smov (!%p421_p2), 32  }
   0x6   : > { %424 = sbr.rel (%p421_p2) target bundleno = 2843 (0xb1b), region = 76  ;;  %s1593_s26 = smov (!%p421_p2), 48  }
   0xb   : > { %v566_v0 = vld [vmem:[%s1910_s2 + $0x18] sm:$0xff]  ;;  %v1590_v1 = vmov 0.0   ;;  %vm1591_vm0 = vmmov 0   ;;  %s1924_s30 = smov (!%p468_p3, %s1409_s30), 1  ;;  %v565_v2 = vld [vmem:[%s1910_s2 + $0x10] sm:$0xff]  ;;  %vm487_vm1 = vcmask 261120   ;;  %v570_v14 = vlaneseq }
   0xc   : > { %1473 = vmatprep.subr.mxu0 %v1590_v1  ;;  %1475 = vmatprep.mubr.msk.f32.mxu0 %vm1591_vm0, %v1590_v1  ;;  %s1690_s19 = sshll.u32 %s1924_s30, 3  ;;  %vm482_vm2 = vcmask 64512   ;;  %v564_v6 = vld [vmem:[%s1910_s2 + $0x8] sm:$0xff]  ;;  %v563_v7 = vld [vmem:[%s1910_s2] sm:$0xff]  ;;  %vm655_vm3 = vcmask 392448   ;;  %v731_v30 = vld [vmem:[%s1912_s4 + $0x18] sm:$0xff] }
   0xd   : > { %1478 = vmatprep.subr.mxu1 %v1590_v1  ;;  %1486 = vmatprep.mubr.msk.f32.mxu1 %vm1591_vm0, %v1590_v1  ;;  %s475_s22 = scalar_lea.vmem %s1909_s1, %s1690_s19  ;;  %s471_s25 = scalar_lea.vmem %s1908_s0, %s1690_s19  ;;  %v571_v15 = vshrl.u32 %v570_v14, 7  ;;  %v567_v16 = vld [vmem:[%s1911_s3] sm:$0x1]  ;;  %v733_v28 = vld [vmem:[%s1912_s4 + $0x28] sm:$0xff]  ;;  %v730_v31 = vld [vmem:[%s1912_s4 + $0x10] sm:$0xff]  ;;  %vm742_vm4 = vcmask 392192  }
   0xe   : > { %1479 = vmatpush3.msra.mxu1 %v566_v0  ;;  %v1697_v3 = vld [vmem:[%s475_s22] sm:$0xff]  ;;  %v568_v17 = vmul.f32 2.0, %v567_v16  ;;  %v729_v32 = vld [vmem:[%s1912_s4 + $0x8] sm:$0xff]  ;;  %v833_v44 = vld [vmem:[%s1914_s6 + $0x18] sm:$0xff]  ;;  %vm822_vm5 = vcmask 523648   ;;  %s1594_s30 = smov 96  }
   0xf   : > { %1480 = vmatprep.subr.mxu1 %v1590_v1  ;;  %488 = vst.msk [vmem:[#allocation2] sm:$0xff] %vm487_vm1, %v1697_v3  ;;  %v1706_v4 = vld [vmem:[%s471_s25] sm:$0xff]  ;;  %v1729_v18 = vsub.s32 0, %v571_v15  ;;  %v832_v45 = vld [vmem:[%s1914_s6 + $0x10] sm:$0xff]  ;;  %v831_v47 = vld [vmem:[%s1914_s6 + $0x8] sm:$0xff]  ;;  %s1813_s25 = scalar_lea.vmem %s1922_s14, %s1690_s19  ;;  %vm1342_vm6 = vcmask 523520  }
  0x10   : > { %1481 = vmatpush3.msra.mxu1 %v565_v2  ;;  %v483_v8 = vsel %vm482_vm2, %v1706_v4, 0.0  ;;  %v732_v29 = vld [vmem:[%s1912_s4 + $0x20] sm:$0xff]  ;;  %v992_v54 = vld [vmem:[%s1916_s8 + $0x18] sm:$0xff]  ;;  %v991_v55 = vld [vmem:[%s1916_s8 + $0x10] sm:$0xff] }
  0x11   : > { %1482 = vmatprep.subr.mxu1 %v1590_v1  ;;  %484 = vadd.xlane.f32.xlu0 %v483_v8  ;;  %v573_v19 = vrot.slane %v568_v17, %v1729_v18  ;;  %v728_v33 = vld [vmem:[%s1912_s4] sm:$0xff]  ;;  %v990_v61 = vld [vmem:[%s1916_s8 + $0x8] sm:$0xff]  ;;  %v1155_v16 = vld [vmem:[%s1918_s10 + $0x18] sm:$0xff] }
  0x12   : > { %1483 = vmatpush3.msra.mxu1 %v564_v6  ;;  %v734_v37 = vld [vmem:[%s1913_s5] sm:$0x1]  ;;  %v1157_v14 = vld [vmem:[%s1918_s10 + $0x28] sm:$0xff] }
  0x13   : > { %1484 = vmatprep.subr.mxu1 %v1590_v1  ;;  %v735_v38 = vmul.f32 2.0, %v734_v37  ;;  %v830_v48 = vld [vmem:[%s1914_s6] sm:$0xff]  ;;  %v1153_v17 = vld [vmem:[%s1918_s10 + $0x8] sm:$0xff] }
  0x14   : > { %1485 = vmatpush3.msra.mxu1 %v563_v7  ;;  %v1421_v56 = vld [vmem:[%s1915_s7] ss:$0 sm:$0xff] }
  0x15   : > { %1509 = vmatprep.subr.mxu1 %v1590_v1  ;;  %v740_v39 = vrot.slane %v735_v38, %v1729_v18  ;;  %v989_v62 = vld [vmem:[%s1916_s8] sm:$0xff] }
  0x16   : > { %v489_v5 = vld [vmem:[#allocation2] sm:$0xff] }
  0x17   : > { %1474 = vmatpush3.msra.mxu0 %v489_v5  ;;  %v1156_v15 = vld [vmem:[%s1918_s10 + $0x20] sm:$0xff] }
  0x18   : > { %1476 = vmatmul.mubr.msk.f32.vlgmr.msra.gmra.mxu0 %vm482_vm2, %v1706_v4  ;;  %1489 = vmatprep.subr.mxu0 %v1590_v1 }
  0x19   : > { %1491 = vmatprep.mubr.msk.f32.mxu0 %vm1591_vm0, %v1590_v1 }
  0x9a   : > { %v485_v12 = vpop.xlane.xlu0 %484 }
  0x9b   : > { %v486_v13 = vadd.f32 1.0, %v485_v12 }
  0x9d   : > { %1580 = vrcp.f32 %v486_v13 }
  0xaa   : > { %v1732_v20 = vpop.eup %1580 }
  0xd8   : > { %v559_v9 = vpop.f32.mrf.mxu0 }
  0xd9   : > { %v560_v10 = vadd.f32 %v559_v9, %v489_v5 }
  0xda   : > { %v1477_v11 = vpop.f32.mrf.mxu0 }
  0xdb   : > { %1487 = vmatmul.mubr.msk.f32.vlgmr.msra.gmra.mxu1 %vm487_vm1, %v560_v10 }
  0xdc   : > { %1517 = vmatprep.mubr.msk.f32.mxu1 %vm1591_vm0, %v1590_v1  ;;  %1510 = vmatpush3.msra.mxu1 %v833_v44 }
  0xdd   : > { %1511 = vmatprep.subr.mxu1 %v1590_v1 }
  0xde   : > { %1512 = vmatpush3.msra.mxu1 %v832_v45 }
  0xdf   : > { %1513 = vmatprep.subr.mxu1 %v1590_v1 }
  0xe0   : > { %1514 = vmatpush3.msra.mxu1 %v831_v47 }
  0xe1   : > { %1515 = vmatprep.subr.mxu1 %v1590_v1 }
  0xe2   : > { %1516 = vmatpush3.msra.mxu1 %v830_v48 }
  0xe3   : > { %1520 = vmatprep.subr.mxu1 %v1590_v1 }
 0x19b   : > { %v644_v21 = vpop.f32.mrf.mxu1 }
 0x19c   : > { %v645_v22 = vadd.f32 %v644_v21, %v573_v19  ;;  %v1152_v19 = vld [vmem:[%s1918_s10] sm:$0xff] }
 0x19d   : > { %v1488_v23 = vpop.f32.mrf.mxu1 }
 0x19e   : > { %v649_v24 = vmul.f32 %v1732_v20, %v645_v22 }
 0x1a0   : > { %v650_v25 = vmax.f32 %v649_v24, 0.0  ;;  %v1158_v24 = vld [vmem:[%s1919_s11] sm:$0x1] }
 0x1a2   : > { %652 = vrot.lane.b32.xlu0 %v650_v25, %s1592_s17  ;;  %v1159_v25 = vmul.f32 2.0, %v1158_v24 }
 0x214   : > { %v653_v26 = vpop.permute.xlu0 %652 }
 0x215   : > { %656 = vst.msk [vmem:[#allocation2] sm:$0xff] %vm655_vm3, %v653_v26  ;;  %v1164_v26 = vrot.slane %v1159_v25, %v1729_v18 }
 0x21c   : > { %v657_v27 = vld [vmem:[#allocation2] sm:$0xff] }
 0x21d   : > { %1490 = vmatpush3.msra.mxu0 %v657_v27 }
 0x21e   : > { %1492 = vmatmul.mubr.msk.f32.vlgmr.msra.gmra.mxu0 %vm482_vm2, %v1706_v4  ;;  %1494 = vmatprep.subr.mxu0 %v1590_v1 }
 0x21f   : > { %1495 = vmatpush3.msra.mxu0 %v733_v28  ;;  %1506 = vmatprep.mubr.msk.f32.mxu0 %vm1591_vm0, %v1590_v1 }
 0x220   : > { %1496 = vmatprep.subr.mxu0 %v1590_v1 }
 0x221   : > { %1497 = vmatpush3.msra.mxu0 %v732_v29 }
 0x222   : > { %1498 = vmatprep.subr.mxu0 %v1590_v1 }
 0x223   : > { %1499 = vmatpush3.msra.mxu0 %v731_v30 }
 0x224   : > { %1500 = vmatprep.subr.mxu0 %v1590_v1 }
 0x225   : > { %1501 = vmatpush3.msra.mxu0 %v730_v31  ;;  %v1255_v31 = vld [vmem:[%s1920_s12 + $0x18] sm:$0xff] }
 0x226   : > { %1502 = vmatprep.subr.mxu0 %v1590_v1 }
 0x227   : > { %1503 = vmatpush3.msra.mxu0 %v729_v32  ;;  %v1254_v32 = vld [vmem:[%s1920_s12 + $0x10] sm:$0xff] }
 0x228   : > { %1504 = vmatprep.subr.mxu0 %v1590_v1 }
 0x229   : > { %1505 = vmatpush3.msra.mxu0 %v728_v33 }
 0x22a   : > { %1525 = vmatprep.subr.mxu0 %v1590_v1 }
 0x2de   : > { %v724_v34 = vpop.f32.mrf.mxu0 }
 0x2df   : > { %v725_v35 = vadd.f32 %v724_v34, %v657_v27 }
 0x2e0   : > { %v1493_v36 = vpop.f32.mrf.mxu0 }
 0x2e1   : > { %1507 = vmatmul.mubr.msk.f32.vlgmr.msra.gmra.mxu0 %vm742_vm4, %v725_v35 }
 0x2e2   : > { %1533 = vmatprep.mubr.msk.f32.mxu0 %vm1591_vm0, %v1590_v1  ;;  %1526 = vmatpush3.msra.mxu0 %v992_v54 }
 0x2e3   : > { %1527 = vmatprep.subr.mxu0 %v1590_v1 }
 0x2e4   : > { %1528 = vmatpush3.msra.mxu0 %v991_v55 }
 0x2e5   : > { %1529 = vmatprep.subr.mxu0 %v1590_v1 }
 0x2e6   : > { %1530 = vmatpush3.msra.mxu0 %v990_v61 }
 0x2e7   : > { %1531 = vmatprep.subr.mxu0 %v1590_v1 }
 0x2e8   : > { %1532 = vmatpush3.msra.mxu0 %v989_v62 }
 0x2e9   : > { %1556 = vmatprep.subr.mxu0 %v1590_v1 }
 0x3a1   : > { %v812_v40 = vpop.f32.mrf.mxu0 }
 0x3a2   : > { %v813_v41 = vadd.f32 %v812_v40, %v740_v39 }
 0x3a3   : > { %v1508_v42 = vpop.f32.mrf.mxu0 }
 0x3a4   : > { %v816_v43 = vmul.f32 %v1732_v20, %v813_v41 }
 0x3a6   : > { %v817_v46 = vmax.f32 %v816_v43, 0.0 }
 0x3a8   : > { %819 = vrot.lane.b32.xlu1 %v817_v46, %s1593_s26 }
 0x3ac   : > { %826 = vrot.lane.b32.xlu1 %v1697_v3, %s1592_s17  ;;  %v993_v3 = vld [vmem:[%s1917_s9] sm:$0x1] }
 0x3ad   : > { %v994_v5 = vmul.f32 2.0, %v993_v3 }
 0x3af   : > { %v999_v6 = vrot.slane %v994_v5, %v1729_v18  ;;  %v1253_v18 = vld [vmem:[%s1920_s12 + $0x8] sm:$0xff] }
 0x41a   : > { %v820_v49 = vpop.permute.xlu1 %819 }
 0x41b   : > { %823 = vst.msk [vmem:[#allocation2] sm:$0xff] %vm822_vm5, %v820_v49 }
 0x41e   : > { %v827_v50 = vpop.permute.xlu1 %826 }
 0x422   : > { %v824_v51 = vld [vmem:[#allocation2] sm:$0xff] }
 0x423   : > { %v829_v52 = vadd.f32 %v827_v50, %v824_v51 }
 0x425   : > { %842 = vrot.lane.b32.xlu1 %v829_v52, %s1594_s30 }
 0x497   : > { %v843_v53 = vpop.permute.xlu1 %842 }
 0x498   : > { %1518 = vmatmul.mubr.msk.f32.vlgmr.msra.gmra.mxu1 %vm487_vm1, %v843_v53 }
 0x499   : > { %1522 = vmatprep.mubr.msk.f32.mxu1 %vm1591_vm0, %v1590_v1 }
 0x558   : > { %v912_v57 = vpop.f32.mrf.mxu1 }
 0x559   : > { %v1815_v58 = vadd.f32 %v1421_v56, %v912_v57 }
 0x55a   : > { %v1519_v59 = vpop.f32.mrf.mxu1 }
 0x55b   : > { %916 = vst.msk [vmem:[%s1813_s25] sm:$0xff] %vm487_vm1, %v1815_v58  ;;  %917 = vst.msk [vmem:[#allocation2] sm:$0xff] %vm487_vm1, %v1815_v58 }
 0x562   : > { %v918_v60 = vld [vmem:[#allocation2] sm:$0xff] }
 0x563   : > { %1521 = vmatpush3.msra.mxu1 %v918_v60 }
 0x564   : > { %1523 = vmatmul.mubr.msk.f32.vlgmr.msra.gmra.mxu1 %vm482_vm2, %v1706_v4  ;;  %1536 = vmatprep.subr.mxu1 %v1590_v1 }
 0x565   : > { %1538 = vmatprep.mubr.msk.f32.mxu1 %vm1591_vm0, %v1590_v1 }
 0x624   : > { %v985_v63 = vpop.f32.mrf.mxu1 }
 0x625   : > { %v986_v0 = vadd.f32 %v985_v63, %v918_v60 }
 0x626   : > { %v1524_v2 = vpop.f32.mrf.mxu1 }
 0x627   : > { %1534 = vmatmul.mubr.msk.f32.vlgmr.msra.gmra.mxu0 %vm487_vm1, %v986_v0 }
 0x628   : > { %1564 = vmatprep.mubr.msk.f32.mxu0 %vm1591_vm0, %v1590_v1  ;;  %1557 = vmatpush3.msra.mxu0 %v1255_v31 }
 0x629   : > { %1558 = vmatprep.subr.mxu0 %v1590_v1 }
 0x62a   : > { %1559 = vmatpush3.msra.mxu0 %v1254_v32 }
 0x62b   : > { %1560 = vmatprep.subr.mxu0 %v1590_v1 }
 0x62c   : > { %1561 = vmatpush3.msra.mxu0 %v1253_v18 }
 0x62d   : > { %1562 = vmatprep.subr.mxu0 %v1590_v1 }
 0x6e7   : > { %v1070_v7 = vpop.f32.mrf.mxu0 }
 0x6e8   : > { %v1071_v8 = vadd.f32 %v1070_v7, %v999_v6 }
 0x6e9   : > { %v1535_v9 = vpop.f32.mrf.mxu0 }
 0x6ea   : > { %v1074_v10 = vmul.f32 %v1732_v20, %v1071_v8 }
 0x6ec   : > { %v1075_v11 = vmax.f32 %v1074_v10, 0.0 }
 0x6ee   : > { %1077 = vrot.lane.b32.xlu1 %v1075_v11, %s1592_s17 }
 0x760   : > { %v1078_v12 = vpop.permute.xlu1 %1077 }
 0x761   : > { %1080 = vst.msk [vmem:[#allocation2] sm:$0xff] %vm655_vm3, %v1078_v12 }
 0x768   : > { %v1081_v13 = vld [vmem:[#allocation2] sm:$0xff] }
 0x769   : > { %1537 = vmatpush3.msra.mxu1 %v1081_v13 }
 0x76a   : > { %1539 = vmatmul.mubr.msk.f32.vlgmr.msra.gmra.mxu1 %vm482_vm2, %v1706_v4  ;;  %1541 = vmatprep.subr.mxu1 %v1590_v1  ;;  %v1154_v4 = vld [vmem:[%s1918_s10 + $0x10] sm:$0xff] }
 0x76b   : > { %1542 = vmatpush3.msra.mxu1 %v1157_v14  ;;  %1553 = vmatprep.mubr.msk.f32.mxu1 %vm1591_vm0, %v1590_v1 }
 0x76c   : > { %1543 = vmatprep.subr.mxu1 %v1590_v1 }
 0x76d   : > { %1544 = vmatpush3.msra.mxu1 %v1156_v15 }
 0x76e   : > { %1545 = vmatprep.subr.mxu1 %v1590_v1 }
 0x76f   : > { %1546 = vmatpush3.msra.mxu1 %v1155_v16 }
 0x770   : > { %1547 = vmatprep.subr.mxu1 %v1590_v1 }
 0x771   : > { %1548 = vmatpush3.msra.mxu1 %v1154_v4 }
 0x772   : > { %1549 = vmatprep.subr.mxu1 %v1590_v1 }
 0x773   : > { %1550 = vmatpush3.msra.mxu1 %v1153_v17 }
 0x774   : > { %1551 = vmatprep.subr.mxu1 %v1590_v1  ;;  %v1427_v1 = vld [vmem:[%s1921_s13] ss:$0 sm:$0xff] }
 0x775   : > { %1552 = vmatpush3.msra.mxu1 %v1152_v19 }
 0x82a   : > { %v1148_v21 = vpop.f32.mrf.mxu1 }
 0x82b   : > { %v1149_v22 = vadd.f32 %v1148_v21, %v1081_v13 }
 0x82c   : > { %v1540_v23 = vpop.f32.mrf.mxu1 }
 0x82d   : > { %1554 = vmatmul.mubr.msk.f32.vlgmr.msra.gmra.mxu1 %vm742_vm4, %v1149_v22 }
 0x8ed   : > { %v1235_v27 = vpop.f32.mrf.mxu1 }
 0x8ee   : > { %v1236_v28 = vadd.f32 %v1235_v27, %v1164_v26 }
 0x8ef   : > { %v1555_v29 = vpop.f32.mrf.mxu1 }
 0x8f0   : > { %v1239_v30 = vmul.f32 %v1732_v20, %v1236_v28  ;;  %v1252_v20 = vld [vmem:[%s1920_s12] sm:$0xff] }
 0x8f1   : > { %1563 = vmatpush3.msra.mxu0 %v1252_v20 }
 0x8f2   : > { %v1240_v33 = vmax.f32 %v1239_v30, 0.0 }
 0x8f4   : > { %1242 = vrot.lane.b32.xlu1 %v1240_v33, %s1593_s26 }
 0x8f8   : > { %1248 = vrot.lane.b32.xlu1 %v1815_v58, %s1592_s17 }
 0x966   : > { %v1243_v34 = vpop.permute.xlu1 %1242 }
 0x967   : > { %1245 = vst.msk [vmem:[#allocation2] sm:$0xff] %vm822_vm5, %v1243_v34 }
 0x96a   : > { %v1249_v36 = vpop.permute.xlu1 %1248 }
 0x96e   : > { %v1246_v35 = vld [vmem:[#allocation2] sm:$0xff] }
 0x96f   : > { %v1251_v37 = vadd.f32 %v1249_v36, %v1246_v35 }
 0x971   : > { %1264 = vrot.lane.b32.xlu1 %v1251_v37, %s1594_s30 }
 0x9e3   : > { %v1265_v38 = vpop.permute.xlu1 %1264 }
 0x9e4   : > { %1565 = vmatmul.mubr.msk.f32.vlgmr.msra.gmra.mxu0 %vm487_vm1, %v1265_v38 }
 0xaa4   : > { %v1334_v39 = vpop.f32.mrf.mxu0 }
 0xaa5   : > { %v1335_v40 = vadd.f32 %v1427_v1, %v1334_v39 }
 0xaa6   : > { %v1566_v41 = vpop.f32.mrf.mxu0 }
 0xaa7   : > { %1339 = vrot.lane.b32.xlu0 %v1335_v40, %s1592_s17 }
 0xb19   : > { %v1340_v42 = vpop.permute.xlu0 %1339 }
 0xb1a   : > { %1343 = vst.msk [vmem:[%s1813_s25] sm:$0xff] %vm1342_vm6, %v1340_v42 }
 0xb1b PF: > { %s24_s29 = sadd.s32 1, %s1588_s29  }
 0xb1c   : > { %p21_p4 = scmp.ge.s32.totalorder %s24_s29, 4  }
 0xb1e   :  { %23 = sbr.rel (!%p21_p4) target bundleno = 1 (0x1), region = 109 }

// kernel: gcn_classifier_forward.7
= control target key start
LH: loop header
LB: loop body
LE: loop exit
PB: predicated region body
PF: predicated region fallthrough
CT: control target
= control target key end

     0   :  { %21 = vsyncpa [#allocation3], 0  ;;  %v958_v4 = vmov 0   ;;  %s1226_s0 = inlined_call_operand.vmem [shape: f32[16,64], index: 0, kind: input, shape index: {}]   ;;  %s1227_s1 = inlined_call_operand.vmem [shape: f32[16,32], index: 1, kind: input, shape index: {}]   ;;  %s1228_s2 = inlined_call_operand.vmem [shape: f32[16,3], index: 2, kind: input, shape index: {}]   ;;  %s1229_s3 = inlined_call_operand.vmem [shape: f32[64,32], index: 3, kind: input, shape index: {}]   ;;  %s1230_s4 = inlined_call_operand.vmem [shape: f32[32,32], index: 4, kind: input, shape index: {}]   ;;  %s1231_s5 = inlined_call_operand.vmem [shape: f32[1,32], index: 5, kind: input, shape index: {}]   ;;  %s1232_s6 = inlined_call_operand.vmem [shape: f32[32,32], index: 6, kind: input, shape index: {}]   ;;  %s1233_s7 = inlined_call_operand.vmem [shape: f32[32,32], index: 7, kind: input, shape index: {}]   ;;  %s1234_s8 = inlined_call_operand.vmem [shape: f32[32,32], index: 8, kind: input, shape index: {}]   ;;  %s1235_s9 = inlined_call_operand.vmem [shape: f32[1,32], index: 9, kind: input, shape index: {}]   ;;  %s1236_s10 = inlined_call_operand.vmem [shape: f32[32,32], index: 10, kind: input, shape index: {}]   ;;  %s1237_s11 = inlined_call_operand.vmem [shape: f32[1,32], index: 11, kind: input, shape index: {}]   ;;  %s1238_s12 = inlined_call_operand.vmem [shape: f32[32,5], index: 12, kind: input, shape index: {}]   ;;  %s1239_s13 = inlined_call_operand.vmem [shape: f32[1,5], index: 13, kind: input, shape index: {}]   ;;  %s1240_s14 = inlined_call_operand.hbm [shape: f32[2,5], index: 14, kind: output, shape index: {0}]   ;;  %s1241_s15 = inlined_call_operand.hbm [shape: f32[2,32], index: 15, kind: output, shape index: {1}]  }
   0x1   :  { %v60_v0 = vld [vmem:[%s1229_s3 + $0x38] sm:$0xff]  ;;  %v59_v1 = vld [vmem:[%s1229_s3 + $0x30] sm:$0xff]  ;;  %911 = vset.pattern.permute.xlu1 %v958_v4  ;;  %v58_v5 = vld [vmem:[%s1229_s3 + $0x28] sm:$0xff] }
   0x2   :  { %829 = vmatprep.subr.mxu1 %v60_v0  ;;  %v66_v2 = vld [vmem:[%s1230_s4 + $0x18] sm:$0xff]  ;;  %v65_v3 = vld [vmem:[%s1230_s4 + $0x10] sm:$0xff]  ;;  %v64_v6 = vld [vmem:[%s1230_s4 + $0x8] sm:$0xff] }
   0x3   :  { %830 = vmatpush3.msra.mxu1 %v60_v0  ;;  %818 = vmatprep.subr.mxu0 %v66_v2  ;;  %v57_v7 = vld [vmem:[%s1229_s3 + $0x20] sm:$0xff]  ;;  %v56_v10 = vld [vmem:[%s1229_s3 + $0x18] sm:$0xff] }
   0x4   :  { %831 = vmatprep.subr.mxu1 %v59_v1  ;;  %819 = vmatpush3.msra.mxu0 %v66_v2  ;;  %v63_v8 = vld [vmem:[%s1230_s4] sm:$0xff] }
   0x5   :  { %832 = vmatpush3.msra.mxu1 %v59_v1  ;;  %820 = vmatprep.subr.mxu0 %v65_v3  ;;  %v240_v9 = vld [vmem:[%s1228_s2] sm:$0xff] }
   0x6   :  { %833 = vmatprep.subr.mxu1 %v58_v5  ;;  %821 = vmatpush3.msra.mxu0 %v65_v3 }
   0x7   :  { %834 = vmatpush3.msra.mxu1 %v58_v5  ;;  %822 = vmatprep.subr.mxu0 %v64_v6 }
   0x8   :  { %22 = vsyncpa [#allocation5], 0  ;;  %835 = vmatprep.subr.mxu1 %v57_v7  ;;  %823 = vmatpush3.msra.mxu0 %v64_v6  ;;  %v61_v11 = vld [vmem:[%s1227_s1] sm:$0xff]  ;;  %vm67_vm0 = vcmask 261120   ;;  %vm242_vm1 = vcmp.gt.f32.partialorder %v240_v9, 0.5  ;;  %v55_v12 = vld [vmem:[%s1229_s3 + $0x10] sm:$0xff] }
   0x9   :  { %836 = vmatpush3.msra.mxu1 %v57_v7  ;;  %824 = vmatprep.subr.mxu0 %v63_v8  ;;  %v62_v13 = vld [vmem:[%s1227_s1 + $0x8] sm:$0xff]  ;;  %v51_v15 = vld [vmem:[%s1226_s0] sm:$0xff]  ;;  %vm149_vm2 = vcmask 523264   ;;  %v243_v17 = vsel %vm242_vm1, 1, %v958_v4  ;;  %v959_v20 = vmov 1   ;;  %v960_v22 = vmov 2  }
   0xa   :  { %v241_v14 = vld [vmem:[%s1228_s2 + $0x8] sm:$0xff]  ;;  %837 = vmatprep.subr.mxu1 %v56_v10  ;;  %825 = vmatpush3.msra.mxu0 %v63_v8  ;;  %v53_v18 = vld [vmem:[%s1229_s3] sm:$0xff]  ;;  %v961_v23 = vmov 0.0   ;;  %v331_v24 = vld [vmem:[%s1233_s7 + $0x18] sm:$0xff]  ;;  %vm962_vm4 = vmmov 0   ;;  %vm318_vm11 = vcmask 1040384  }
   0xb   :  { %838 = vmatpush3.msra.mxu1 %v56_v10  ;;  %v54_v16 = vld [vmem:[%s1229_s3 + $0x8] sm:$0xff]  ;;  %826 = vmatprep.mubr.msk.f32.mxu0 %vm67_vm0, %v61_v11  ;;  %vm280_vm3 = vcmp.gt.f32.partialorder %v241_v14, 0.5  ;;  %v481_v25 = vld [vmem:[%s1234_s8 + $0x18] sm:$0xff]  ;;  %v330_v26 = vld [vmem:[%s1233_s7 + $0x10] sm:$0xff]  ;;  %vm322_vm12 = vcmask 254976   ;;  %s963_s2 = smov [#allocation4]  }
   0xc   :  { %839 = vmatprep.subr.mxu1 %v55_v12  ;;  %827 = vmatmul.mubr.msk.f32.vlgmr.msra.gmra.mxu0 %vm67_vm0, %v62_v13  ;;  %v52_v19 = vld [vmem:[%s1226_s0 + $0x8] sm:$0xff]  ;;  %v281_v21 = vsel %vm280_vm3, 1, %v958_v4  ;;  %v480_v27 = vld [vmem:[%s1234_s8 + $0x10] sm:$0xff]  ;;  %v328_v30 = vld [vmem:[%s1233_s7] sm:$0xff]  ;;  %s752_s19 = sshll.u32 %s963_s2, 4  ;;  %s753_s19 = int_to_ptr.vmem [resolvable:$true] %s752_s19 }
   0xd   :  { %840 = vmatpush3.msra.mxu1 %v55_v12  ;;  %845 = vmatprep.mubr.msk.f32.mxu1 %vm149_vm2, %v51_v15  ;;  %v329_v28 = vld [vmem:[%s1233_s7 + $0x8] sm:$0xff]  ;;  %v478_v31 = vld [vmem:[%s1234_s8] sm:$0xff]  ;;  %s914_s20 = scalar_lea.vmem %s753_s19, 32  ;;  %p919_p1 = scmp.lt.s32.totalorder %s753_s19, %s753_s19 }
   0xe   :  { %841 = vmatprep.subr.mxu1 %v54_v16  ;;  %245 = vperm.xlu1 %911, %v243_v17   ;;  %v479_v29 = vld [vmem:[%s1234_s8 + $0x8] sm:$0xff]  ;;  %v768_v39 = vld [vmem:[%s1231_s5] ss:$0 sm:$0xff]  ;;  %p915_p0 = scmp.ne.s32.totalorder %s753_s19, %s914_s20  ;;  %p920_p2 = scmp.lt.s32.totalorder %s914_s20, %s914_s20 }
   0xf   :  { %842 = vmatpush3.msra.mxu1 %v54_v16  ;;  %910 = vset.pattern.permute.xlu0 %v959_v20 }
  0x10   :  { %843 = vmatprep.subr.mxu1 %v53_v18  ;;  %257 = vperm.xlu0 %910, %v243_v17   ;;  %p921_p3 = por %p920_p2, %p919_p1 }
  0x11   :  { %844 = vmatpush3.msra.mxu1 %v53_v18  ;;  %848 = vmatprep.subr.mxu0 %v961_v23 }
  0x12   :  { %846 = vmatmul.mubr.msk.f32.vlgmr.msra.gmra.mxu1 %vm149_vm2, %v52_v19  ;;  %283 = vperm.xlu1 %911, %v281_v21   ;;  %p922_p4 = pnand %p921_p3, %p915_p0 }
  0x13   :  { %870 = vmatprep.subr.mxu1 %v961_v23  ;;  %849 = vmatpush3.msra.mxu0 %v331_v24 }
  0x14   :  { %295 = vperm.xlu0 %910, %v281_v21   ;;  %850 = vmatprep.subr.mxu0 %v961_v23 }
  0x15   :  { %871 = vmatpush3.msra.mxu1 %v481_v25  ;;  %851 = vmatpush3.msra.mxu0 %v330_v26 }
  0x16   :  { %913 = vset.pattern.permute.xlu1 %v960_v22  ;;  %872 = vmatprep.subr.mxu1 %v961_v23 }
  0x17   :  { %307 = vperm.xlu1 %913, %v281_v21   ;;  %852 = vmatprep.subr.mxu0 %v961_v23 }
  0x18   :  { %912 = vset.pattern.permute.xlu0 %v960_v22  ;;  %873 = vmatpush3.msra.mxu1 %v480_v27 }
  0x19   :  { %269 = vperm.xlu0 %912, %v243_v17   ;;  %853 = vmatpush3.msra.mxu0 %v329_v28 }
  0x1a   :  { %874 = vmatprep.subr.mxu1 %v961_v23  ;;  %854 = vmatprep.subr.mxu0 %v961_v23 }
  0x1b   :  { %875 = vmatpush3.msra.mxu1 %v479_v29  ;;  %855 = vmatpush3.msra.mxu0 %v328_v30  ;;  %v327_v30 = vld [vmem:[%s1232_s6 + $0x18] sm:$0xff] }
  0x1c   :  { %876 = vmatprep.subr.mxu1 %v961_v23  ;;  %856 = vmatprep.mubr.msk.f32.mxu0 %vm962_vm4, %v961_v23 }
  0x1d   :  { %859 = vmatprep.subr.mxu0 %v961_v23  ;;  %877 = vmatpush3.msra.mxu1 %v478_v31 }
  0x1e   :  { %878 = vmatprep.mubr.msk.f32.mxu1 %vm962_vm4, %v961_v23  ;;  %892 = vmatprep.subr.mxu1 %v961_v23 }
  0x89   :  { %v246_v32 = vpop.permute.xlu1 %245 }
  0x8a   :  { %vm247_vm7 = vcmp.eq.s32.totalorder %v246_v32, 1 }
  0x8b   :  { %v258_v33 = vpop.permute.xlu0 %257 }
  0x8c   :  { %vm259_vm10 = vcmp.eq.s32.totalorder %v258_v33, 1 }
  0x8d   :  { %v284_v34 = vpop.permute.xlu1 %283 }
  0x8e   :  { %vm285_vm5 = vcmp.eq.s32.totalorder %v284_v34, 1 }
  0x8f   :  { %v296_v35 = vpop.permute.xlu0 %295 }
  0x90   :  { %vm297_vm8 = vcmp.eq.s32.totalorder %v296_v35, 1  ;;  %v326_v35 = vld [vmem:[%s1232_s6 + $0x10] sm:$0xff] }
  0x92   :  { %v308_v37 = vpop.permute.xlu1 %307 }
  0x93   :  { %vm309_vm6 = vcmp.eq.s32.totalorder %v308_v37, 1  ;;  %v325_v37 = vld [vmem:[%s1232_s6 + $0x8] sm:$0xff] }
  0x94   :  { %v270_v41 = vpop.permute.xlu0 %269 }
  0x95   :  { %vm271_vm9 = vcmp.eq.s32.totalorder %v270_v41, 1  ;;  %v566_v41 = vld [vmem:[%s1236_s10 + $0x8] sm:$0xff] }
  0xcc   :  { %v828_v36 = vpop.f32.mrf.mxu0 }
  0xce   :  { %v140_v42 = vpop.f32.mrf.mxu0 }
  0xd2   :  { %v847_v38 = vpop.f32.mrf.mxu1 }
  0xd3   :  { %v228_v40 = vadd.f32 %v847_v38, %v828_v36  ;;  %v324_v38 = vld [vmem:[%s1232_s6] sm:$0xff] }
  0xd4   :  { %v222_v43 = vpop.f32.mrf.mxu1 }
  0xd5   :  { %v239_v44 = vadd.f32 %v768_v39, %v228_v40  ;;  %v223_v45 = vadd.f32 %v222_v43, %v140_v42  ;;  %v567_v40 = vld [vmem:[%s1236_s10 + $0x10] sm:$0xff]  ;;  %v565_v42 = vld [vmem:[%s1236_s10] sm:$0xff]  ;;  %v653_v43 = vld [vmem:[%s1238_s12 + $0x18] sm:$0xff] }
  0xd7   :  { %v286_v46 = vsel %vm285_vm5, -1e+12, %v239_v44  ;;  %v298_v47 = vsel %vm297_vm8, -1e+12, %v239_v44  ;;  %v238_v48 = vadd.f32 %v768_v39, %v223_v45  ;;  %v310_v49 = vsel %vm309_vm6, -1e+12, %v239_v44 }
  0xd8   :  { %v287_v50 = vsel %vm67_vm0, %v286_v46, -inf  ;;  %v299_v51 = vsel %vm67_vm0, %v298_v47, -inf  ;;  %v311_v52 = vsel %vm67_vm0, %v310_v49, -inf  ;;  %v568_v39 = vld [vmem:[%s1236_s10 + $0x18] sm:$0xff] }
  0xd9   :  { %v288_v53 = vrot.slane %v287_v50, 4  ;;  %v300_v54 = vrot.slane %v299_v51, 4  ;;  %v248_v55 = vsel %vm247_vm7, -1e+12, %v238_v48  ;;  %v260_v56 = vsel %vm259_vm10, -1e+12, %v238_v48 }
  0xda   :  { %v249_v57 = vsel %vm67_vm0, %v248_v55, -inf  ;;  %v261_v58 = vsel %vm67_vm0, %v260_v56, -inf  ;;  %v312_v59 = vrot.slane %v311_v52, 4  ;;  %v272_v60 = vsel %vm271_vm9, -1e+12, %v238_v48  ;;  %v652_v55 = vld [vmem:[%s1238_s12 + $0x10] sm:$0xff] }
  0xdb   :  { %v289_v61 = vmax.f32 %v287_v50, %v288_v53  ;;  %v301_v62 = vmax.f32 %v299_v51, %v300_v54  ;;  %v250_v63 = vrot.slane %v249_v57, 4  ;;  %v262_v0 = vrot.slane %v261_v58, 4  ;;  %v772_v50 = vld [vmem:[%s1235_s9] ss:$0 sm:$0xff]  ;;  %v651_v56 = vld [vmem:[%s1238_s12 + $0x8] sm:$0xff] }
  0xdc   :  { %v313_v1 = vmax.f32 %v311_v52, %v312_v59  ;;  %v273_v2 = vsel %vm67_vm0, %v272_v60, -inf }
  0xdd   :  { %v290_v3 = vrot.slane %v289_v61, 2  ;;  %v302_v4 = vrot.slane %v301_v62, 2  ;;  %v251_v5 = vmax.f32 %v249_v57, %v250_v63  ;;  %v263_v6 = vmax.f32 %v261_v58, %v262_v0  ;;  %v650_v57 = vld [vmem:[%s1238_s12] sm:$0xff] }
  0xde   :  { %v314_v7 = vrot.slane %v313_v1, 2  ;;  %v274_v8 = vrot.slane %v273_v2, 4  ;;  %v773_v58 = vld [vmem:[%s1237_s11] ss:$0 sm:$0xff] }
  0xdf   :  { %v291_v9 = vmax.f32 %v289_v61, %v290_v3  ;;  %v303_v10 = vmax.f32 %v301_v62, %v302_v4  ;;  %v252_v11 = vrot.slane %v251_v5, 2  ;;  %v264_v12 = vrot.slane %v263_v6, 2 }
  0xe0   :  { %v315_v13 = vmax.f32 %v313_v1, %v314_v7  ;;  %v275_v14 = vmax.f32 %v273_v2, %v274_v8 }
  0xe1   :  { %v304_v15 = vrot.slane %v303_v10, 1  ;;  %v253_v16 = vmax.f32 %v251_v5, %v252_v11  ;;  %v265_v17 = vmax.f32 %v263_v6, %v264_v12  ;;  %v292_v18 = vrot.slane %v291_v9, 1 }
  0xe2   :  { %v276_v19 = vrot.slane %v275_v14, 2  ;;  %v316_v22 = vrot.slane %v315_v13, 1 }
  0xe3   :  { %v266_v20 = vrot.slane %v265_v17, 1  ;;  %v254_v21 = vrot.slane %v253_v16, 1  ;;  %v305_v25 = vmax.f32 %v303_v10, %v304_v15  ;;  %v293_v28 = vmax.f32 %v291_v9, %v292_v18 }
  0xe4   :  { %v277_v24 = vmax.f32 %v275_v14, %v276_v19  ;;  %v317_v33 = vmax.f32 %v315_v13, %v316_v22 }
  0xe5   :  { %v267_v26 = vmax.f32 %v265_v17, %v266_v20  ;;  %v255_v27 = vmax.f32 %v253_v16, %v254_v21 }
  0xe6   :  { %v278_v29 = vrot.slane %v277_v24, 1 }
  0xe7   :  { %v320_v31 = vsel %vm318_vm11, %v267_v26, %v305_v25  ;;  %v319_v32 = vsel %vm318_vm11, %v255_v27, %v293_v28 }
  0xe8   :  { %v279_v34 = vmax.f32 %v277_v24, %v278_v29  ;;  %857 = vmatmul.mubr.msk.f32.vlgmr.msra.gmra.mxu0 %vm67_vm0, %v320_v31  ;;  %323 = vst.msk [vmem:[#allocation4] sm:$0x3] %vm322_vm12, %v319_v32 }
  0xe9   :  { %860 = vmatpush3.msra.mxu0 %v327_v30  ;;  %867 = vmatprep.mubr.msk.f32.mxu0 %vm962_vm4, %v961_v23 }
  0xea   :  { %v321_v36 = vsel %vm318_vm11, %v279_v34, %v317_v33  ;;  %861 = vmatprep.subr.mxu0 %v961_v23 }
  0xeb   :  { %879 = vmatmul.mubr.msk.f32.vlgmr.msra.gmra.mxu1 %vm67_vm0, %v321_v36  ;;  %862 = vmatpush3.msra.mxu0 %v326_v35 }
  0xec   :  { %863 = vmatprep.subr.mxu0 %v961_v23  ;;  %900 = vmatprep.mubr.msk.f32.mxu1 %vm962_vm4, %v961_v23 }
  0xed   :  { %864 = vmatpush3.msra.mxu0 %v325_v37  ;;  %893 = vmatpush3.msra.mxu1 %v653_v43 }
  0xee   :  { %865 = vmatprep.subr.mxu0 %v961_v23  ;;  %894 = vmatprep.subr.mxu1 %v961_v23 }
  0xef   :  { %866 = vmatpush3.msra.mxu0 %v324_v38  ;;  %895 = vmatpush3.msra.mxu1 %v652_v55 }
  0xf0   :  { %868 = vmatmul.mubr.msk.f32.vlgmr.msra.gmra.mxu0 %vm67_vm0, %v319_v32  ;;  %881 = vmatprep.subr.mxu0 %v961_v23 }
  0xf1   :  { %889 = vmatprep.mubr.msk.f32.mxu0 %vm962_vm4, %v961_v23  ;;  %882 = vmatpush3.msra.mxu0 %v568_v39 }
  0xf2   :  { %883 = vmatprep.subr.mxu0 %v961_v23  ;;  %896 = vmatprep.subr.mxu1 %v961_v23 }
  0xf3   :  { %884 = vmatpush3.msra.mxu0 %v567_v40  ;;  %897 = vmatpush3.msra.mxu1 %v651_v56 }
  0xf4   :  { %885 = vmatprep.subr.mxu0 %v961_v23  ;;  %898 = vmatprep.subr.mxu1 %v961_v23 }
  0xf5   :  { %886 = vmatpush3.msra.mxu0 %v566_v41  ;;  %899 = vmatpush3.msra.mxu1 %v650_v57 }
  0xf6   :  { %887 = vmatprep.subr.mxu0 %v961_v23 }
  0xf7   :  { %888 = vmatpush3.msra.mxu0 %v565_v42 }
 0x1a8   :  { %v401_v44 = vpop.f32.mrf.mxu0 }
 0x1aa   :  { %v858_v45 = vpop.f32.mrf.mxu0 }
 0x1ab   :  { %v551_v46 = vpop.f32.mrf.mxu1 }
 0x1ad   :  { %v880_v47 = vpop.f32.mrf.mxu1 }
 0x1b0   :  { %v474_v48 = vpop.f32.mrf.mxu0 }
 0x1b1   :  { %v475_v49 = vadd.f32 %v474_v48, %v401_v44 }
 0x1b2   :  { %v869_v51 = vpop.f32.mrf.mxu0 }
 0x1b3   :  { %v555_v52 = vadd.f32 %v551_v46, %v475_v49 }
 0x1b5   :  { %v563_v53 = vadd.f32 %v772_v50, %v555_v52 }
 0x1b7   :  { %v564_v54 = vmax.f32 %v563_v53, 0.0 }
 0x1b9   :  { %890 = vmatmul.mubr.msk.f32.vlgmr.msra.gmra.mxu0 %vm67_vm0, %v564_v54 }
 0x279   :  { %v645_v59 = vpop.f32.mrf.mxu0 }
 0x27a   :  { %v646_v60 = vadd.f32 %v773_v58, %v645_v59 }
 0x27b   :  { %v891_v61 = vpop.f32.mrf.mxu0 }
 0x27c   :  { %v649_v62 = vmax.f32 %v646_v60, 0.0 }
 0x27e   :  { %901 = vmatmul.mubr.msk.f32.vlgmr.msra.gmra.mxu1 %vm67_vm0, %v649_v62 }
 0x27f   :  { %925 = shalt.err (!%p922_p4)
}
 0x280   :  { %755 = dma.vmem_to_hbm [thread:$0]  %s753_s19, 32, %s1241_s15, [#allocation5]   ;;  %v775_v23 = vld [vmem:[%s1239_s13] ss:$0 sm:$0xff]  ;;  %vm734_vm13 = vcmask 33792  }
 0x281   :  { %s964_s21 = smov [#allocation2]  }
 0x282   :  { %s742_s22 = sshll.u32 %s964_s21, 4  ;;  %s743_s22 = int_to_ptr.vmem [resolvable:$true] %s742_s22 }
 0x283   :  { %s934_s23 = scalar_lea.vmem %s743_s22, 32  ;;  %p939_p6 = scmp.lt.s32.totalorder %s743_s22, %s743_s22 }
 0x284   :  { %p935_p5 = scmp.ne.s32.totalorder %s743_s22, %s934_s23  ;;  %p940_p7 = scmp.lt.s32.totalorder %s934_s23, %s934_s23 }
 0x286   :  { %p941_p8 = por %p940_p7, %p939_p6 }
 0x288   :  { %p942_p9 = pnand %p941_p8, %p935_p5 }
 0x33e   :  { %v730_v63 = vpop.f32.mrf.mxu1 }
 0x33f   :  { %v731_v0 = vadd.f32 %v775_v23, %v730_v63 }
 0x340   :  { %v902_v1 = vpop.f32.mrf.mxu1 }
 0x341   :  { %735 = vst.msk [vmem:[#allocation2] sm:$0x3] %vm734_vm13, %v731_v0 }
 0x342   :  { %945 = shalt.err (!%p942_p9)
}
 0x343   :  { %745 = dma.vmem_to_hbm [thread:$0]  %s743_s22, 32, %s1240_s14, [#allocation3]  }
 0x344   :  { %954 = dma.done.wait [#allocation3], 32  }
 0x345   :  { %955 = vsyncadd [#allocation3], 4294967264 }
 0x346   :  { %956 = dma.done.wait [#allocation5], 32  }
 0x347   :  { %957 = vsyncadd [#allocation5], 4294967264 }
 0x348   :  { %762 = vsyncpa [#allocation3], 1 }
 0x349   :  { %763 = vsyncpa [#allocation5], 1 }

// kernel: gcn_classifier_forward.6
= control target key start
LH: loop header
LB: loop body
LE: loop exit
PB: predicated region body
PF: predicated region fallthrough
CT: control target
= control target key end

     0   :  { %s6354_s3 = smov 5   ;;  %v6355_v0 = vmov 0   ;;  %v6356_v1 = vmov 0.0   ;;  %s6357_s10 = smov 1   ;;  %vm252_vm0 = vcmask 261120   ;;  %vm6360_vm1 = vmmov 0   ;;  %s7240_s0 = inlined_call_operand.smem [shape: u32[42], index: -1, kind: input, shape index: {}] }
   0x1   :  { %s5241_s6 = sld [smem:[%s7240_s0 + %s6354_s3]]   ;;  %6294 = vset.pattern.permute.xlu0 %v6355_v0  ;;  %6295 = vset.pattern.permute.xlu1 %v6355_v0  ;;  %s6358_s14 = smov 2   ;;  %v180_v17 = vlaneseq  ;;  %vm334_vm5 = vcmask 130048   ;;  %vm706_vm9 = vcmask 1040384   ;;  %vm696_vm10 = vcmask 7168  }
   0x2   :  { %s6409_s9 = sld [smem:[%s7240_s0]]   ;;  %5700 = vmatprep.subr.mxu1 %v6356_v1  ;;  %s6359_s18 = smov 3   ;;  %5704 = vmatprep.mubr.msk.f32.mxu1 %vm6360_vm1, %v6356_v1 }
   0x3   :  { %s5237_s13 = sld [smem:[%s7240_s0 + %s6357_s10]]   ;;  %v181_v20 = vand.u32 127, %v180_v17  ;;  %s6361_s22 = smov 6  }
   0x4   :  { %s6418_s17 = sld [smem:[%s7240_s0 + %s6358_s14]]   ;;  %s6362_s26 = smov 7  }
   0x5   :  { %s6423_s21 = sld [smem:[%s7240_s0 + %s6359_s18]]   ;;  %s6363_s30 = smov 8  }
   0x6   :  { %s6459_s25 = sld [smem:[%s7240_s0 + %s6361_s22]]   ;;  %s6364_s4 = smov 4  }
   0x7   :  { %v251_v2 = vld [vmem:[%s5241_s6 + $0x18] sm:$0xff]  ;;  %v250_v3 = vld [vmem:[%s5241_s6 + $0x10] sm:$0xff]  ;;  %v249_v5 = vld [vmem:[%s5241_s6 + $0x8] sm:$0xff]  ;;  %s6480_s29 = sld [smem:[%s7240_s0 + %s6362_s26]]   ;;  %s6365_s8 = smov 9  }
   0x8   :  { %5689 = vmatprep.subr.mxu0 %v251_v2  ;;  %v6426_v4 = vld [vmem:[%s6409_s9] sm:$0xff]  ;;  %v6432_v11 = vld [vmem:[%s6409_s9 + $0x8] sm:$0xff]  ;;  %s5244_s3 = sld [smem:[%s7240_s0 + %s6363_s30]]   ;;  %s6368_s22 = smov 13  }
   0x9   :  { %5690 = vmatpush3.msra.mxu0 %v251_v2  ;;  %5697 = vmatprep.mubr.msk.f32.mxu0 %vm252_vm0, %v6426_v4  ;;  %v185_v6 = vld [vmem:[%s5237_s13] sm:$0xff]  ;;  %v187_v7 = vld [vmem:[%s5237_s13 + $0x10] sm:$0xff]  ;;  %v186_v9 = vld [vmem:[%s5237_s13 + $0x8] sm:$0xff]  ;;  %s6533_s7 = sld [smem:[%s7240_s0 + %s6364_s4]]   ;;  %s6366_s13 = smov 10  }
   0xa   :  { %5691 = vmatprep.subr.mxu0 %v250_v3  ;;  %189 = vperm.xlu0 %6294, %v185_v6   ;;  %v248_v8 = vld [vmem:[%s5241_s6] sm:$0xff]  ;;  %v207_v13 = vld [vmem:[%s6418_s17 + $0x8] sm:$0xff]  ;;  %v208_v15 = vld [vmem:[%s6418_s17 + $0x10] sm:$0xff]  ;;  %s5245_s12 = sld [smem:[%s7240_s0 + %s6365_s8]]   ;;  %s6369_s26 = smov 11  }
   0xb   :  { %5692 = vmatpush3.msra.mxu0 %v250_v3  ;;  %195 = vperm.xlu1 %6295, %v187_v7   ;;  %v206_v10 = vld [vmem:[%s6418_s17] sm:$0xff]  ;;  %v6443_v14 = vld [vmem:[%s6423_s21 + $0x8] sm:$0xff]  ;;  %v6448_v16 = vld [vmem:[%s6423_s21 + $0x10] sm:$0xff]  ;;  %s5246_s16 = sld [smem:[%s7240_s0 + %s6366_s13]]   ;;  %s6367_s17 = smov 12  }
   0xc   :  { %5693 = vmatprep.subr.mxu0 %v249_v5  ;;  %v6435_v12 = vld [vmem:[%s6423_s21] sm:$0xff]  ;;  %v514_v35 = vld [vmem:[%s6459_s25 + $0x8] sm:$0xff]  ;;  %s5248_s20 = sld [smem:[%s7240_s0 + %s6367_s17]]   ;;  %s6370_s30 = smov 15  }
   0xd   :  { %5694 = vmatpush3.msra.mxu0 %v249_v5  ;;  %v516_v40 = vld [vmem:[%s6480_s29 + $0x8] sm:$0xff]  ;;  %v515_v41 = vld [vmem:[%s6480_s29] sm:$0xff]  ;;  %s5247_s29 = sld [smem:[%s7240_s0 + %s6369_s26]]   ;;  %s6371_s4 = smov 14  }
   0xe   :  { %5695 = vmatprep.subr.mxu0 %v248_v8  ;;  %192 = vperm.xlu0 %6294, %v186_v9   ;;  %v513_v42 = vld [vmem:[%s6459_s25] sm:$0xff]  ;;  %v88_v43 = vstv %s5244_s3  ;;  %s5249_s25 = sld [smem:[%s7240_s0 + %s6368_s22]]   ;;  %s6372_s10 = smov 16  }
   0xf   :  { %5696 = vmatpush3.msra.mxu0 %v248_v8  ;;  %210 = vperm.xlu1 %6295, %v206_v10   ;;  %89 = vst [vmem:[#allocation2] sm:$0x1] %v88_v43  ;;  %v6554_v55 = vld [vmem:[%s6533_s7] sm:$0xff]  ;;  %v6562_v58 = vld [vmem:[%s6533_s7 + $0x8] sm:$0xff]  ;;  %v6569_v59 = vld [vmem:[%s6533_s7 + $0x10] sm:$0xff]  ;;  %s6679_s3 = sld [smem:[%s7240_s0 + %s6370_s30]]   ;;  %s6373_s14 = smov 17  }
  0x10   :  { %5698 = vmatmul.mubr.msk.f32.vlgmr.msra.gmra.mxu0 %vm252_vm0, %v6432_v11  ;;  %5713 = vmatprep.subr.mxu0 %v6356_v1  ;;  %s6684_s8 = sld [smem:[%s7240_s0 + %s6371_s4]]   ;;  %s6374_s18 = smov 18  }
  0x11   :  { %5717 = vmatprep.mubr.msk.f32.mxu0 %vm6360_vm1, %v6356_v1  ;;  %s5252_s13 = sld [smem:[%s7240_s0 + %s6372_s10]]   ;;  %s6375_s23 = smov 20  }
  0x12   :  { %229 = vperm.xlu0 %6294, %v6435_v12   ;;  %s5253_s17 = sld [smem:[%s7240_s0 + %s6373_s14]]   ;;  %s6376_s27 = smov 22  }
  0x13   :  { %213 = vperm.xlu1 %6295, %v207_v13   ;;  %s5254_s22 = sld [smem:[%s7240_s0 + %s6374_s18]]   ;;  %s6377_s1 = smov 21  }
  0x14   :  { %s5256_s26 = sld [smem:[%s7240_s0 + %s6375_s23]]   ;;  %s6378_s5 = smov 23  }
  0x15   :  { %s6846_s30 = sld [smem:[%s7240_s0 + %s6376_s27]]   ;;  %s6397_s23 = smov 41  }
  0x16   :  { %234 = vperm.xlu0 %6294, %v6443_v14   ;;  %v695_v45 = vld [vmem:[#allocation2] sm:$0x1]  ;;  %s6851_s4 = sld [smem:[%s7240_s0 + %s6377_s1]]  }
  0x17   :  { %216 = vperm.xlu1 %6295, %v208_v15   ;;  %s5259_s10 = sld [smem:[%s7240_s0 + %s6378_s5]]  }
  0x1a   :  { %239 = vperm.xlu0 %6294, %v6448_v16  }
  0x85   :  { %v190_v18 = vpop.permute.xlu0 %189 }
  0x86   :  { %v196_v19 = vpop.permute.xlu1 %195  ;;  %vm197_vm3 = vcmp.eq.s32.totalorder %v181_v20, %v190_v18 }
  0x87   :  { %v6462_v27 = vsel %vm197_vm3, 1.0, %v6356_v1  ;;  %vm199_vm7 = vcmp.eq.s32.totalorder %v181_v20, %v196_v19  ;;  %vm890_vm3 = vcmask 195584  }
  0x88   :  { %v6501_v36 = vsel %vm199_vm7, 1.0, %v6356_v1 }
  0x89   :  { %v193_v21 = vpop.permute.xlu0 %192 }
  0x8a   :  { %v211_v22 = vpop.permute.xlu1 %210  ;;  %vm198_vm6 = vcmp.eq.s32.totalorder %v181_v20, %v193_v21 }
  0x8b   :  { %vm218_vm2 = vcmp.eq.s32.totalorder %v181_v20, %v211_v22  ;;  %v6483_v33 = vsel %vm198_vm6, 1.0, %v6356_v1 }
  0x8c   :  { %v5281_v23 = vsel %vm218_vm2, 1.0, %v6356_v1 }
  0x8d   :  { %v230_v24 = vpop.permute.xlu0 %229 }
  0x8e   :  { %v214_v25 = vpop.permute.xlu1 %213  ;;  %v6464_v28 = vmul.f32 %v5281_v23, %v230_v24 }
  0x8f   :  { %vm219_vm4 = vcmp.eq.s32.totalorder %v181_v20, %v214_v25 }
  0x90   :  { %v5282_v30 = vsel %vm219_vm4, 1.0, %v6356_v1  ;;  %vm802_vm14 = vcmp.gt.f32.partialorder %v6464_v28, 0.5 }
  0x91   :  { %v235_v31 = vpop.permute.xlu0 %234 }
  0x92   :  { %v217_v32 = vpop.permute.xlu1 %216  ;;  %v6485_v34 = vmul.f32 %v5282_v30, %v235_v31 }
  0x93   :  { %vm220_vm8 = vcmp.eq.s32.totalorder %v181_v20, %v217_v32 }
  0x94   :  { %v5283_v37 = vsel %vm220_vm8, 1.0, %v6356_v1  ;;  %vm803_vm15 = vcmp.gt.f32.partialorder %v6485_v34, 0.5 }
  0x95   :  { %v240_v38 = vpop.permute.xlu0 %239 }
  0x96   :  { %v6509_v39 = vmul.f32 %v5283_v37, %v240_v38 }
  0x98   :  { %vm804_vm2 = vcmp.gt.f32.partialorder %v6509_v39, 0.5 }
  0xd0   :  { %v5699_v26 = vpop.f32.mrf.mxu0 }
  0xd1   :  { %5701 = vmatpush3.msra.mxu1 %v5699_v26  ;;  %5714 = vmatpush3.msra.mxu0 %v5699_v26 }
  0xd2   :  { %v325_v29 = vpop.f32.mrf.mxu0  ;;  %5702 = vmatprep.subr.mxu1 %v6356_v1  ;;  %5715 = vmatprep.subr.mxu0 %v6356_v1 }
  0xd3   :  { %5703 = vmatpush3.msra.mxu1 %v325_v29  ;;  %5716 = vmatpush3.msra.mxu0 %v325_v29 }
  0xd4   :  { %5705 = vmatmul.mubr.msk.f32.vlgmr.msra.gmra.mxu1 %vm334_vm5, %v6462_v27  ;;  %6246 = vmatprep.subr.mxu1 %v6356_v1 }
  0xd5   :  { %5718 = vmatmul.mubr.msk.f32.vlgmr.msra.gmra.mxu0 %vm334_vm5, %v6464_v28  ;;  %6248 = vmatpush3.msra.mxu1 %v5699_v26 }
  0xd6   :  { %6247 = vmatprep.subr.mxu1 %v6356_v1  ;;  %5707 = vmatprep.mubr.msk.f32.mxu1 %vm6360_vm1, %v6356_v1 }
  0xd7   :  { %6249 = vmatpush3.msra.mxu1 %v325_v29  ;;  %5720 = vmatprep.mubr.msk.f32.mxu0 %vm6360_vm1, %v6356_v1 }
  0xd8   :  { %5708 = vmatmul.mubr.msk.f32.gmra.mxu1 %vm334_vm5, %v6483_v33  ;;  %5726 = vmatprep.subr.mxu1 %v6356_v1 }
  0xd9   :  { %5721 = vmatmul.mubr.msk.f32.gmra.mxu0 %vm334_vm5, %v6485_v34  ;;  %5710 = vmatprep.mubr.msk.f32.mxu1 %vm6360_vm1, %v6356_v1 }
  0xda   :  { %5739 = vmatprep.subr.mxu0 %v6356_v1  ;;  %5743 = vmatprep.mubr.msk.f32.mxu0 %vm6360_vm1, %v6356_v1 }
  0xdb   :  { %5740 = vmatpush3.msra.mxu0 %v514_v35 }
  0xdc   :  { %5711 = vmatmul.mubr.msk.f32.gmra.mxu1 %vm334_vm5, %v6501_v36  ;;  %5741 = vmatprep.subr.mxu0 %v6356_v1 }
  0xdd   :  { %5723 = vmatprep.mubr.msk.f32.mxu1 %vm6360_vm1, %v6356_v1  ;;  %5742 = vmatpush3.msra.mxu0 %v513_v42 }
  0xe0   :  { %5724 = vmatmul.mubr.msk.f32.vlgmr.msra.gmra.mxu1 %vm334_vm5, %v6509_v39 }
  0xe1   :  { %5727 = vmatpush3.msra.mxu1 %v516_v40  ;;  %5730 = vmatprep.mubr.msk.f32.mxu1 %vm6360_vm1, %v6356_v1 }
  0xe2   :  { %5728 = vmatprep.subr.mxu1 %v6356_v1 }
  0xe3   :  { %5729 = vmatpush3.msra.mxu1 %v515_v41 }
  0xe4   :  { %5752 = vmatprep.subr.mxu1 %v6356_v1 }
 0x194   :  { %v6523_v44 = vpop.f32.mrf.mxu1 }
 0x195   :  { %v499_v46 = vpop.f32.mrf.mxu0  ;;  %5731 = vmatmul.mubr.msk.f32.vlgmr.msra.gmra.mxu1 %vm334_vm5, %v6523_v44 }
 0x196   :  { %5744 = vmatmul.mubr.msk.f32.vlgmr.msra.gmra.mxu0 %vm334_vm5, %v499_v46  ;;  %v5706_v47 = vpop.f32.mrf.mxu1  ;;  %5733 = vmatprep.mubr.msk.f32.mxu1 %vm6360_vm1, %v6356_v1 }
 0x197   :  { %v5719_v48 = vpop.f32.mrf.mxu0  ;;  %5746 = vmatprep.mubr.msk.f32.mxu0 %vm6360_vm1, %v6356_v1  ;;  %5753 = vmatpush3.msk.msra.mxu1 %vm706_vm9, %v695_v45 }
 0x198   :  { %v6538_v49 = vpop.f32.mrf.mxu1 }
 0x199   :  { %v504_v50 = vpop.f32.mrf.mxu0  ;;  %5734 = vmatmul.mubr.msk.f32.gmra.mxu1 %vm334_vm5, %v6538_v49 }
 0x19a   :  { %5747 = vmatmul.mubr.msk.f32.gmra.mxu0 %vm334_vm5, %v504_v50  ;;  %v5709_v51 = vpop.f32.mrf.mxu1  ;;  %5736 = vmatprep.mubr.msk.f32.mxu1 %vm6360_vm1, %v6356_v1 }
 0x19b   :  { %v5722_v52 = vpop.f32.mrf.mxu0  ;;  %5749 = vmatprep.mubr.msk.f32.mxu0 %vm6360_vm1, %v6356_v1 }
 0x19c   :  { %v6547_v53 = vpop.f32.mrf.mxu1 }
 0x19d   :  { %5737 = vmatmul.mubr.msk.f32.gmra.mxu1 %vm334_vm5, %v6547_v53 }
 0x19e   :  { %v5712_v54 = vpop.f32.mrf.mxu1  ;;  %5754 = vmatprep.mubr.msk.f32.mxu1 %vm6360_vm1, %v6356_v1 }
 0x1a0   :  { %v509_v56 = vpop.f32.mrf.mxu1 }
 0x1a1   :  { %5750 = vmatmul.mubr.msk.f32.gmra.mxu0 %vm334_vm5, %v509_v56  ;;  %5755 = vmatmul.mubr.msk.f32.vlgmr.msra.gmra.mxu1 %vm696_vm10, %v6554_v55 }
 0x1a2   :  { %v5725_v57 = vpop.f32.mrf.mxu1  ;;  %5757 = vmatprep.mubr.msk.f32.mxu1 %vm6360_vm1, %v6356_v1 }
 0x1a5   :  { %5758 = vmatmul.mubr.msk.f32.gmra.mxu1 %vm696_vm10, %v6562_v58 }
 0x1a6   :  { %5760 = vmatprep.mubr.msk.f32.mxu1 %vm6360_vm1, %v6356_v1 }
 0x1a9   :  { %5761 = vmatmul.mubr.msk.f32.gmra.mxu1 %vm696_vm10, %v6569_v59 }
 0x255   :  { %v592_v60 = vpop.f32.mrf.mxu1 }
 0x256   :  { %v681_v61 = vpop.f32.mrf.mxu0 }
 0x257   :  { %v5732_v62 = vpop.f32.mrf.mxu1  ;;  %v682_v8 = vadd.f32 %v681_v61, %v592_v60 }
 0x258   :  { %v5745_v63 = vpop.f32.mrf.mxu0 }
 0x259   :  { %v597_v0 = vpop.f32.mrf.mxu1 }
 0x25a   :  { %v686_v2 = vpop.f32.mrf.mxu0 }
 0x25b   :  { %v5735_v3 = vpop.f32.mrf.mxu1  ;;  %v687_v18 = vadd.f32 %v686_v2, %v597_v0 }
 0x25c   :  { %v5748_v5 = vpop.f32.mrf.mxu0 }
 0x25d   :  { %v602_v6 = vpop.f32.mrf.mxu1 }
 0x25f   :  { %v5738_v7 = vpop.f32.mrf.mxu1 }
 0x261   :  { %v691_v9 = vpop.f32.mrf.mxu0  ;;  %v776_v10 = vpop.f32.mrf.mxu1 }
 0x262   :  { %v790_v13 = vadd.f32 %v776_v10, %v682_v8  ;;  %v692_v24 = vadd.f32 %v691_v9, %v602_v6 }
 0x263   :  { %v5751_v15 = vpop.f32.mrf.mxu0  ;;  %v5756_v17 = vpop.f32.mrf.mxu1 }
 0x264   :  { %v796_v19 = vmul.f32 0.2, %v790_v13  ;;  %vm793_vm11 = vcmp.ge.f32.partialorder %v790_v13, 0.0 }
 0x265   :  { %v781_v20 = vpop.f32.mrf.mxu1 }
 0x266   :  { %v791_v21 = vadd.f32 %v781_v20, %v687_v18  ;;  %v799_v22 = vsel %vm793_vm11, %v790_v13, %v796_v19 }
 0x267   :  { %807 = vperm.xlu1 %6295, %v799_v22   ;;  %v5759_v23 = vpop.f32.mrf.mxu1 }
 0x268   :  { %v797_v25 = vmul.f32 0.2, %v791_v21  ;;  %vm794_vm12 = vcmp.ge.f32.partialorder %v791_v21, 0.0 }
 0x269   :  { %v786_v26 = vpop.f32.mrf.mxu1 }
 0x26a   :  { %v792_v29 = vadd.f32 %v786_v26, %v692_v24  ;;  %v800_v30 = vsel %vm794_vm12, %v791_v21, %v797_v25 }
 0x26b   :  { %812 = vperm.xlu0 %6294, %v800_v30   ;;  %v5762_v31 = vpop.f32.mrf.mxu1 }
 0x26c   :  { %v798_v32 = vmul.f32 0.2, %v792_v29  ;;  %vm795_vm13 = vcmp.ge.f32.partialorder %v792_v29, 0.0 }
 0x26e   :  { %v801_v35 = vsel %vm795_vm13, %v792_v29, %v798_v32 }
 0x26f   :  { %817 = vperm.xlu1 %6295, %v801_v35  }
 0x2e2   :  { %v808_v37 = vpop.permute.xlu1 %807 }
 0x2e3   :  { %v820_v40 = vsel %vm802_vm14, %v808_v37, -1e+30 }
 0x2e4   :  { %v823_v43 = vsel %vm334_vm5, %v820_v40, -inf }
 0x2e6   :  { %v813_v38 = vpop.permute.xlu0 %812 }
 0x2e7   :  { %v821_v41 = vsel %vm803_vm15, %v813_v38, -1e+30 }
 0x2e8   :  { %v824_v42 = vsel %vm334_vm5, %v821_v41, -inf }
 0x2e9   :  { %v826_v46 = vmax.f32 %v823_v43, %v824_v42 }
 0x2ea   :  { %v818_v45 = vpop.permute.xlu1 %817 }
 0x2eb   :  { %v822_v47 = vsel %vm804_vm2, %v818_v45, -1e+30 }
 0x2ec   :  { %v825_v48 = vsel %vm334_vm5, %v822_v47, -inf }
 0x2ed   :  { %v827_v50 = vmax.f32 %v826_v46, %v825_v48 }
 0x2ef   :  { %v828_v51 = vrot.slane %v827_v50, 4 }
 0x2f1   :  { %v829_v52 = vmax.f32 %v827_v50, %v828_v51 }
 0x2f3   :  { %v830_v54 = vrot.slane %v829_v52, 2 }
 0x2f5   :  { %v831_v56 = vmax.f32 %v829_v52, %v830_v54 }
 0x2f7   :  { %v832_v57 = vrot.slane %v831_v56, 1 }
 0x2f9   :  { %v833_v60 = vmax.f32 %v831_v56, %v832_v57 }
 0x2fb   :  { %v836_v61 = vmul.f32 %v833_v60, %v6509_v39  ;;  %v835_v62 = vmul.f32 %v833_v60, %v6485_v34  ;;  %v834_v2 = vmul.f32 %v833_v60, %v6464_v28 }
 0x2fd   :  { %v843_v63 = vsel %vm334_vm5, %v836_v61, 0.0  ;;  %v840_v0 = vsel %vm334_vm5, %v835_v62, 0.0  ;;  %v837_v3 = vsel %vm334_vm5, %v834_v2, 0.0 }
 0x2fe   :  { %844 = vadd.xlane.f32.xlu0 %v843_v63  ;;  %841 = vadd.xlane.f32.xlu1 %v840_v0  ;;  %v1231_v63 = vld [vmem:[%s5246_s16] sm:$0x1] }
 0x302   :  { %838 = vadd.xlane.f32.xlu0 %v837_v3 }
 0x32f   :  { %858 = vxpose.xlu0.b32.start [1/3] (short) (narrow) %v6464_v28, 16 }
 0x333   :  { %859 = vxpose.xlu0.b32.cont [2/3] (short) (narrow) %v6485_v34, 16 }
 0x337   :  { %860 = vxpose.xlu0.b32.end [3/3] (short) (narrow) %v6509_v39, 16 }
 0x387   :  { %v845_v5 = vpop.xlane.xlu0 %844  ;;  %v842_v6 = vpop.xlane.xlu1 %841 }
 0x388   :  { %v848_v7 = vsub.f32 %v801_v35, %v845_v5  ;;  %v847_v8 = vsub.f32 %v800_v30, %v842_v6  ;;  %v1411_v6 = vld [vmem:[%s5248_s20 + $0x18] sm:$0xff] }
 0x38a   :  { %v853_v9 = vmul.f32 1.442695, %v848_v7  ;;  %v851_v10 = vmul.f32 1.442695, %v847_v8  ;;  %v1409_v7 = vld [vmem:[%s5248_s20 + $0x8] sm:$0xff] }
 0x38b   :  { %v839_v13 = vpop.xlane.xlu0 %838  ;;  %v1413_v8 = vld [vmem:[%s5249_s25 + $0x8] sm:$0xff] }
 0x38c   :  { %6296 = vpow2.f32 %v853_v9  ;;  %v846_v15 = vsub.f32 %v799_v22, %v839_v13  ;;  %v1408_v9 = vld [vmem:[%s5248_s20] sm:$0xff] }
 0x38d   :  { %6298 = vpow2.f32 %v851_v10  ;;  %v1412_v10 = vld [vmem:[%s5249_s25] sm:$0xff] }
 0x38e   :  { %v849_v17 = vmul.f32 1.442695, %v846_v15 }
 0x390   :  { %6300 = vpow2.f32 %v849_v17 }
 0x399   :  { %v6297_v18 = vpop.eup %6296 }
 0x39a   :  { %v6299_v19 = vpop.eup %6298  ;;  %v857_v20 = vmul.f32 %v6297_v18, %v6448_v16  ;;  %v5316_v18 = vld [vmem:[%s5247_s29] ss:$0 sm:$0xff] }
 0x39b   :  { %v856_v21 = vmul.f32 %v6299_v19, %v6443_v14 }
 0x39c   :  { %5763 = vmatprep.subr.mxu0 %v857_v20 }
 0x39d   :  { %v6301_v23 = vpop.eup %6300  ;;  %5764 = vmatpush3.msra.mxu0 %v857_v20 }
 0x39e   :  { %5765 = vmatprep.subr.mxu0 %v856_v21  ;;  %v855_v24 = vmul.f32 %v6301_v23, %v6435_v12 }
 0x39f   :  { %5766 = vmatpush3.msra.mxu0 %v856_v21 }
 0x3a0   :  { %5767 = vmatprep.subr.mxu0 %v855_v24 }
 0x3a1   :  { %5768 = vmatpush3.msra.mxu0 %v855_v24 }
 0x3a2   :  { %5772 = vmatprep.subr.mxu0 %v6356_v1 }
 0x3ab   :  { %v6598_v22 = vpop.trf.xlu0 }
 0x3ac   :  { %5769 = vmatprep.mubr.msk.f32.mxu0 %vm890_vm3, %v6598_v22  ;;  %5791 = vmatprep.mubr.msk.f32.mxu1 %vm890_vm3, %v6598_v22 }
 0x3af   :  { %v6604_v25 = vpop.trf.xlu0 }
 0x3b0   :  { %5770 = vmatmul.mubr.msk.f32.vlgmr.msra.gmra.mxu0 %vm890_vm3, %v6604_v25 }
 0x3b1   :  { %5776 = vmatprep.mubr.msk.f32.mxu0 %vm6360_vm1, %v6356_v1 }
 0x470   :  { %v5771_v26 = vpop.f32.mrf.mxu0 }
 0x471   :  { %5773 = vmatpush3.msra.mxu0 %v5771_v26 }
 0x472   :  { %v963_v29 = vpop.f32.mrf.mxu0  ;;  %5774 = vmatprep.subr.mxu0 %v6356_v1 }
 0x473   :  { %5775 = vmatpush3.msra.mxu0 %v963_v29 }
 0x474   :  { %5777 = vmatmul.mubr.msk.f32.vlgmr.msra.gmra.mxu0 %vm334_vm5, %v6464_v28 }
 0x475   :  { %5779 = vmatprep.mubr.msk.f32.mxu0 %vm6360_vm1, %v6356_v1 }
 0x478   :  { %5780 = vmatmul.mubr.msk.f32.gmra.mxu0 %vm334_vm5, %v6485_v34 }
 0x479   :  { %5782 = vmatprep.mubr.msk.f32.mxu0 %vm6360_vm1, %v6356_v1 }
 0x47c   :  { %5783 = vmatmul.mubr.msk.f32.gmra.mxu0 %vm334_vm5, %v6509_v39 }
 0x534   :  { %v1038_v30 = vpop.f32.mrf.mxu0 }
 0x535   :  { %v1039_v40 = vadd.f32 1e-16, %v1038_v30 }
 0x536   :  { %v5778_v31 = vpop.f32.mrf.mxu0 }
 0x538   :  { %v1043_v32 = vpop.f32.mrf.mxu0 }
 0x539   :  { %v1044_v35 = vadd.f32 1e-16, %v1043_v32 }
 0x53a   :  { %v5781_v37 = vpop.f32.mrf.mxu0 }
 0x53b   :  { %6302 = vrcp.f32 %v1044_v35 }
 0x53c   :  { %v1048_v38 = vpop.f32.mrf.mxu0 }
 0x53d   :  { %v1049_v41 = vadd.f32 1e-16, %v1048_v38  ;;  %v1733_v38 = vld [vmem:[%s6679_s3 + $0x8] sm:$0xff] }
 0x53e   :  { %v5784_v42 = vpop.f32.mrf.mxu0 }
 0x53f   :  { %6304 = vrcp.f32 %v1049_v41  ;;  %v1732_v41 = vld [vmem:[%s6679_s3] sm:$0xff] }
 0x540   :  { %6306 = vrcp.f32 %v1039_v40  ;;  %v1731_v40 = vld [vmem:[%s6684_s8 + $0x8] sm:$0xff]  ;;  %v1730_v42 = vld [vmem:[%s6684_s8] sm:$0xff] }
 0x548   :  { %v6303_v43 = vpop.eup %6302 }
 0x549   :  { %v1055_v45 = vmul.f32 %v6303_v43, %v856_v21  ;;  %v90_v43 = vstv %s5252_s13  ;;  %s6380_s13 = smov 25  }
 0x54a   :  { %91 = vst [vmem:[#allocation3] sm:$0x1] %v90_v43  ;;  %s5261_s16 = sld [smem:[%s7240_s0 + %s6380_s13]]  }
 0x54b   :  { %1065 = vperm.xlu1 %6295, %v1055_v45   ;;  %v1152_v62 = vmul.f32 %v1055_v45, %v6562_v58 }
 0x54c   :  { %v6305_v46 = vpop.eup %6304 }
 0x54d   :  { %v1057_v47 = vmul.f32 %v6305_v46, %v857_v20  ;;  %v6307_v48 = vpop.eup %6306 }
 0x54e   :  { %v1053_v50 = vmul.f32 %v6307_v48, %v855_v24 }
 0x54f   :  { %1070 = vperm.xlu1 %6295, %v1057_v47   ;;  %v1153_v61 = vmul.f32 %v1057_v47, %v6569_v59 }
 0x551   :  { %v1912_v47 = vld [vmem:[#allocation3] sm:$0x1] }
 0x553   :  { %1060 = vperm.xlu1 %6295, %v1053_v50  }
 0x5c6   :  { %v1066_v51 = vpop.permute.xlu1 %1065 }
 0x5c7   :  { %v1074_v56 = vmul.f32 %v1066_v51, %v6538_v49  ;;  %v1151_v49 = vmul.f32 %v1053_v50, %v6554_v55 }
 0x5ca   :  { %v1071_v52 = vpop.permute.xlu1 %1070 }
 0x5cb   :  { %v1075_v54 = vmul.f32 %v1071_v52, %v6547_v53  ;;  %v1229_v53 = vld [vmem:[%s5245_s12] sm:$0xff] }
 0x5cd   :  { %5785 = vmatprep.subr.mxu1 %v1075_v54 }
 0x5ce   :  { %5786 = vmatpush3.msra.mxu1 %v1075_v54  ;;  %v1061_v57 = vpop.permute.xlu1 %1060 }
 0x5cf   :  { %v1073_v60 = vmul.f32 %v1061_v57, %v6523_v44  ;;  %5787 = vmatprep.subr.mxu1 %v1074_v56  ;;  %v1230_v44 = vld [vmem:[%s5245_s12 + $0x8] sm:$0xff] }
 0x5d0   :  { %5788 = vmatpush3.msra.mxu1 %v1074_v56  ;;  %5808 = vmatprep.subr.mxu0 %v1230_v44 }
 0x5d1   :  { %5789 = vmatprep.subr.mxu1 %v1073_v60  ;;  %5809 = vmatpush3.msra.mxu0 %v1230_v44 }
 0x5d2   :  { %5790 = vmatpush3.msra.mxu1 %v1073_v60  ;;  %5810 = vmatprep.subr.mxu0 %v1229_v53 }
 0x5d3   :  { %5792 = vmatmul.mubr.msk.f32.vlgmr.msra.gmra.mxu1 %vm890_vm3, %v6604_v25  ;;  %5794 = vmatprep.subr.mxu1 %v1153_v61 }
 0x5d4   :  { %5795 = vmatpush3.msra.mxu1 %v1153_v61  ;;  %5800 = vmatprep.mubr.msk.f32.mxu1 %vm890_vm3, %v6598_v22 }
 0x5d5   :  { %5796 = vmatprep.subr.mxu1 %v1152_v62  ;;  %5811 = vmatpush3.msra.mxu0 %v1229_v53 }
 0x5d6   :  { %5797 = vmatpush3.msra.mxu1 %v1152_v62  ;;  %5822 = vmatprep.subr.mxu0 %v1411_v6 }
 0x5d7   :  { %5798 = vmatprep.subr.mxu1 %v1151_v49 }
 0x5d8   :  { %5799 = vmatpush3.msra.mxu1 %v1151_v49 }
 0x5d9   :  { %5801 = vmatmul.mubr.msk.f32.vlgmr.msra.gmra.mxu1 %vm890_vm3, %v6604_v25  ;;  %5803 = vmatprep.subr.msk.mxu1 %vm706_vm9, %v1231_v63 }
 0x5da   :  { %5804 = vmatpush3.msk.msra.mxu1 %vm706_vm9, %v1231_v63 }
 0x5db   :  { %5815 = vmatprep.subr.mxu1 %v1413_v8 }
 0x693   :  { %v5793_v0 = vpop.f32.mrf.mxu1 }
 0x695   :  { %v1142_v2 = vpop.f32.mrf.mxu1 }
 0x696   :  { %5812 = vmatprep.mubr.msk.f32.mxu0 %vm334_vm5, %v1142_v2 }
 0x697   :  { %5813 = vmatmul.mubr.msk.f32.vlgmr.msra.gmra.mxu0 %vm334_vm5, %v5793_v0 }
 0x698   :  { %5830 = vmatprep.mubr.msk.f32.mxu0 %vm252_vm0, %v6426_v4  ;;  %5823 = vmatpush3.msra.mxu0 %v1411_v6  ;;  %v1410_v4 = vld [vmem:[%s5248_s20 + $0x10] sm:$0xff] }
 0x699   :  { %v5802_v3 = vpop.f32.mrf.mxu1  ;;  %5824 = vmatprep.subr.mxu0 %v1410_v4 }
 0x69a   :  { %5825 = vmatpush3.msra.mxu0 %v1410_v4 }
 0x69b   :  { %v1220_v5 = vpop.f32.mrf.mxu1  ;;  %5826 = vmatprep.subr.mxu0 %v1409_v7 }
 0x69c   :  { %5805 = vmatprep.mubr.msk.f32.mxu1 %vm696_vm10, %v1220_v5  ;;  %5827 = vmatpush3.msra.mxu0 %v1409_v7 }
 0x69d   :  { %5806 = vmatmul.mubr.msk.f32.vlgmr.msra.gmra.mxu1 %vm696_vm10, %v5802_v3  ;;  %5828 = vmatprep.subr.mxu0 %v1408_v9 }
 0x69e   :  { %5816 = vmatpush3.msra.mxu1 %v1413_v8  ;;  %5829 = vmatpush3.msra.mxu0 %v1408_v9 }
 0x69f   :  { %5817 = vmatprep.subr.mxu1 %v1412_v10  ;;  %5831 = vmatmul.mubr.msk.f32.vlgmr.msra.gmra.mxu0 %vm252_vm0, %v6432_v11 }
 0x6a0   :  { %5818 = vmatpush3.msra.mxu1 %v1412_v10  ;;  %5846 = vmatprep.subr.mxu0 %v6356_v1 }
 0x6a1   :  { %5833 = vmatprep.subr.mxu1 %v6356_v1  ;;  %5850 = vmatprep.mubr.msk.f32.mxu0 %vm6360_vm1, %v6356_v1 }
 0x757   :  { %v5814_v13 = vpop.f32.mrf.mxu0 }
 0x759   :  { %v1388_v19 = vpop.f32.mrf.mxu0 }
 0x75d   :  { %v5807_v15 = vpop.f32.mrf.mxu1 }
 0x75e   :  { %v1394_v17 = vadd.f32 %v5814_v13, %v5807_v15 }
 0x75f   :  { %v1307_v20 = vpop.f32.mrf.mxu1  ;;  %v5832_v29 = vpop.f32.mrf.mxu0 }
 0x760   :  { %v1389_v11 = vadd.f32 %v1388_v19, %v1307_v20  ;;  %v6662_v21 = vadd.f32 %v5316_v18, %v1394_v17 }
 0x761   :  { %v1561_v32 = vpop.f32.mrf.mxu0 }
 0x762   :  { %v6664_v23 = vadd.f32 %v5316_v18, %v1389_v11  ;;  %v1407_v26 = vmax.f32 %v6662_v21, 0.0  ;;  %v6352_v21 = vld [vmem:[%s6409_s9] sm:$0xff] }
 0x764   :  { %v1406_v24 = vmax.f32 %v6664_v23, 0.0 }
 0x766   :  { %5819 = vmatprep.mubr.msk.f32.mxu1 %vm334_vm5, %v1406_v24 }
 0x767   :  { %5820 = vmatmul.mubr.msk.f32.vlgmr.msra.gmra.mxu1 %vm334_vm5, %v1407_v26 }
 0x768   :  { %5837 = vmatprep.mubr.msk.f32.mxu1 %vm6360_vm1, %v6356_v1 }
 0x827   :  { %v5821_v30 = vpop.f32.mrf.mxu1 }
 0x828   :  { %v1567_v31 = vadd.f32 %v5832_v29, %v5821_v30 }
 0x829   :  { %v1486_v35 = vpop.f32.mrf.mxu1 }
 0x82a   :  { %v1562_v37 = vadd.f32 %v1561_v32, %v1486_v35  ;;  %5834 = vmatpush3.msra.mxu1 %v1567_v31  ;;  %5847 = vmatpush3.msra.mxu0 %v1567_v31 }
 0x82b   :  { %5835 = vmatprep.subr.mxu1 %v6356_v1  ;;  %5848 = vmatprep.subr.mxu0 %v6356_v1 }
 0x82c   :  { %5836 = vmatpush3.msra.mxu1 %v1562_v37  ;;  %5849 = vmatpush3.msra.mxu0 %v1562_v37 }
 0x82d   :  { %5838 = vmatmul.mubr.msk.f32.vlgmr.msra.gmra.mxu1 %vm334_vm5, %v6462_v27  ;;  %5851 = vmatmul.mubr.msk.f32.vlgmr.msra.gmra.mxu0 %vm334_vm5, %v6464_v28 }
 0x82e   :  { %5840 = vmatprep.mubr.msk.f32.mxu1 %vm6360_vm1, %v6356_v1  ;;  %5853 = vmatprep.mubr.msk.f32.mxu0 %vm6360_vm1, %v6356_v1 }
 0x82f   :  { %5859 = vmatprep.subr.mxu1 %v6356_v1  ;;  %5872 = vmatprep.subr.mxu0 %v6356_v1 }
 0x830   :  { %5860 = vmatpush3.msra.mxu1 %v1733_v38  ;;  %5873 = vmatpush3.msra.mxu0 %v1731_v40 }
 0x831   :  { %5841 = vmatmul.mubr.msk.f32.gmra.mxu1 %vm334_vm5, %v6483_v33  ;;  %5854 = vmatmul.mubr.msk.f32.gmra.mxu0 %vm334_vm5, %v6485_v34 }
 0x832   :  { %5843 = vmatprep.mubr.msk.f32.mxu1 %vm6360_vm1, %v6356_v1  ;;  %5856 = vmatprep.mubr.msk.f32.mxu0 %vm6360_vm1, %v6356_v1 }
 0x833   :  { %5861 = vmatprep.subr.mxu1 %v6356_v1  ;;  %5874 = vmatprep.subr.mxu0 %v6356_v1 }
 0x834   :  { %5862 = vmatpush3.msra.mxu1 %v1732_v41  ;;  %5875 = vmatpush3.msra.mxu0 %v1730_v42 }
 0x835   :  { %5844 = vmatmul.mubr.msk.f32.gmra.mxu1 %vm334_vm5, %v6501_v36  ;;  %5857 = vmatmul.mubr.msk.f32.gmra.mxu0 %vm334_vm5, %v6509_v39 }
 0x836   :  { %5863 = vmatprep.mubr.msk.f32.mxu1 %vm6360_vm1, %v6356_v1  ;;  %5876 = vmatprep.mubr.msk.f32.mxu0 %vm6360_vm1, %v6356_v1 }
 0x837   :  { %5885 = vmatprep.subr.mxu1 %v6356_v1 }
 0x8ed   :  { %v6724_v45 = vpop.f32.mrf.mxu1  ;;  %v1716_v46 = vpop.f32.mrf.mxu0 }
 0x8ee   :  { %5864 = vmatmul.mubr.msk.f32.vlgmr.msra.gmra.mxu1 %vm334_vm5, %v6724_v45  ;;  %5877 = vmatmul.mubr.msk.f32.vlgmr.msra.gmra.mxu0 %vm334_vm5, %v1716_v46 }
 0x8ef   :  { %v5839_v48 = vpop.f32.mrf.mxu1  ;;  %v5852_v50 = vpop.f32.mrf.mxu0  ;;  %5866 = vmatprep.mubr.msk.f32.mxu1 %vm6360_vm1, %v6356_v1  ;;  %5879 = vmatprep.mubr.msk.f32.mxu0 %vm6360_vm1, %v6356_v1 }
 0x8f0   :  { %5886 = vmatpush3.msk.msra.mxu1 %vm706_vm9, %v1912_v47 }
 0x8f1   :  { %v6734_v51 = vpop.f32.mrf.mxu1  ;;  %v1721_v52 = vpop.f32.mrf.mxu0 }
 0x8f2   :  { %5867 = vmatmul.mubr.msk.f32.gmra.mxu1 %vm334_vm5, %v6734_v51  ;;  %5880 = vmatmul.mubr.msk.f32.gmra.mxu0 %vm334_vm5, %v1721_v52 }
 0x8f3   :  { %v5842_v54 = vpop.f32.mrf.mxu1  ;;  %v5855_v56 = vpop.f32.mrf.mxu0  ;;  %5869 = vmatprep.mubr.msk.f32.mxu1 %vm6360_vm1, %v6356_v1  ;;  %5882 = vmatprep.mubr.msk.f32.mxu0 %vm6360_vm1, %v6356_v1 }
 0x8f5   :  { %v6743_v57 = vpop.f32.mrf.mxu1  ;;  %v1726_v60 = vpop.f32.mrf.mxu0 }
 0x8f6   :  { %5870 = vmatmul.mubr.msk.f32.gmra.mxu1 %vm334_vm5, %v6743_v57  ;;  %5883 = vmatmul.mubr.msk.f32.gmra.mxu0 %vm334_vm5, %v1726_v60 }
 0x8f7   :  { %v5845_v61 = vpop.f32.mrf.mxu1  ;;  %v5858_v62 = vpop.f32.mrf.mxu0  ;;  %5902 = vmatprep.mubr.msk.f32.mxu0 %vm890_vm3, %v6598_v22  ;;  %5887 = vmatprep.mubr.msk.f32.mxu1 %vm6360_vm1, %v6356_v1 }
 0x8fa   :  { %5888 = vmatmul.mubr.msk.f32.vlgmr.msra.gmra.mxu1 %vm696_vm10, %v6554_v55 }
 0x8fb   :  { %5890 = vmatprep.mubr.msk.f32.mxu1 %vm6360_vm1, %v6356_v1 }
 0x8fe   :  { %5891 = vmatmul.mubr.msk.f32.gmra.mxu1 %vm696_vm10, %v6562_v58 }
 0x8ff   :  { %5893 = vmatprep.mubr.msk.f32.mxu1 %vm6360_vm1, %v6356_v1 }
 0x902   :  { %5894 = vmatmul.mubr.msk.f32.gmra.mxu1 %vm696_vm10, %v6569_v59 }
 0x903   :  { %5924 = vmatprep.mubr.msk.f32.mxu1 %vm890_vm3, %v6598_v22 }
 0x9ae   :  { %v1809_v49 = vpop.f32.mrf.mxu1  ;;  %v1898_v44 = vpop.f32.mrf.mxu0 }
 0x9af   :  { %v1899_v9 = vadd.f32 %v1898_v44, %v1809_v49 }
 0x9b0   :  { %v5865_v53 = vpop.f32.mrf.mxu1  ;;  %v5878_v63 = vpop.f32.mrf.mxu0 }
 0x9b2   :  { %v1814_v0 = vpop.f32.mrf.mxu1  ;;  %v1903_v2 = vpop.f32.mrf.mxu0 }
 0x9b3   :  { %v1904_v17 = vadd.f32 %v1903_v2, %v1814_v0 }
 0x9b4   :  { %v5868_v3 = vpop.f32.mrf.mxu1  ;;  %v5881_v5 = vpop.f32.mrf.mxu0 }
 0x9b6   :  { %v1819_v6 = vpop.f32.mrf.mxu1  ;;  %v1908_v4 = vpop.f32.mrf.mxu0 }
 0x9b7   :  { %v1909_v30 = vadd.f32 %v1908_v4, %v1819_v6 }
 0x9b8   :  { %v5871_v7 = vpop.f32.mrf.mxu1  ;;  %v5884_v8 = vpop.f32.mrf.mxu0 }
 0x9ba   :  { %v1982_v10 = vpop.f32.mrf.mxu1 }
 0x9bb   :  { %v1996_v13 = vadd.f32 %v1982_v10, %v1899_v9 }
 0x9bc   :  { %v5889_v15 = vpop.f32.mrf.mxu1 }
 0x9bd   :  { %v2002_v18 = vmul.f32 0.2, %v1996_v13  ;;  %vm1999_vm4 = vcmp.ge.f32.partialorder %v1996_v13, 0.0 }
 0x9be   :  { %v1987_v19 = vpop.f32.mrf.mxu1 }
 0x9bf   :  { %v1997_v20 = vadd.f32 %v1987_v19, %v1904_v17  ;;  %v2005_v11 = vsel %vm1999_vm4, %v1996_v13, %v2002_v18 }
 0x9c0   :  { %2010 = vperm.xlu1 %6295, %v2005_v11   ;;  %v5892_v29 = vpop.f32.mrf.mxu1 }
 0x9c1   :  { %v2003_v31 = vmul.f32 0.2, %v1997_v20  ;;  %vm2000_vm6 = vcmp.ge.f32.partialorder %v1997_v20, 0.0 }
 0x9c2   :  { %v1992_v32 = vpop.f32.mrf.mxu1 }
 0x9c3   :  { %v1998_v35 = vadd.f32 %v1992_v32, %v1909_v30  ;;  %v2006_v37 = vsel %vm2000_vm6, %v1997_v20, %v2003_v31 }
 0x9c4   :  { %2015 = vperm.xlu1 %6295, %v2006_v37   ;;  %v5895_v38 = vpop.f32.mrf.mxu1 }
 0x9c5   :  { %v2004_v40 = vmul.f32 0.2, %v1998_v35  ;;  %vm2001_vm7 = vcmp.ge.f32.partialorder %v1998_v35, 0.0 }
 0x9c7   :  { %v2007_v41 = vsel %vm2001_vm7, %v1998_v35, %v2004_v40 }
 0x9c8   :  { %2020 = vperm.xlu1 %6295, %v2007_v41  }
 0xa3b   :  { %v2011_v42 = vpop.permute.xlu1 %2010 }
 0xa3c   :  { %v2023_v46 = vsel %vm802_vm14, %v2011_v42, -1e+30 }
 0xa3d   :  { %v2026_v50 = vsel %vm334_vm5, %v2023_v46, -inf }
 0xa3f   :  { %v2016_v43 = vpop.permute.xlu1 %2015 }
 0xa40   :  { %v2024_v47 = vsel %vm803_vm15, %v2016_v43, -1e+30 }
 0xa41   :  { %v2027_v48 = vsel %vm334_vm5, %v2024_v47, -inf }
 0xa42   :  { %v2029_v54 = vmax.f32 %v2026_v50, %v2027_v48 }
 0xa43   :  { %v2021_v52 = vpop.permute.xlu1 %2020 }
 0xa44   :  { %v2025_v56 = vsel %vm804_vm2, %v2021_v52, -1e+30 }
 0xa45   :  { %v2028_v60 = vsel %vm334_vm5, %v2025_v56, -inf }
 0xa46   :  { %v2030_v61 = vmax.f32 %v2029_v54, %v2028_v60 }
 0xa48   :  { %v2031_v62 = vrot.slane %v2030_v61, 4 }
 0xa4a   :  { %v2032_v49 = vmax.f32 %v2030_v61, %v2031_v62 }
 0xa4c   :  { %v2033_v44 = vrot.slane %v2032_v49, 2 }
 0xa4e   :  { %v2034_v53 = vmax.f32 %v2032_v49, %v2033_v44 }
 0xa50   :  { %v2035_v63 = vrot.slane %v2034_v53, 1 }
 0xa52   :  { %v2036_v0 = vmax.f32 %v2034_v53, %v2035_v63 }
 0xa54   :  { %v2039_v2 = vmul.f32 %v2036_v0, %v6509_v39  ;;  %v2038_v3 = vmul.f32 %v2036_v0, %v6485_v34  ;;  %v2037_v4 = vmul.f32 %v2036_v0, %v6464_v28 }
 0xa56   :  { %v2046_v5 = vsel %vm334_vm5, %v2039_v2, 0.0  ;;  %v2043_v6 = vsel %vm334_vm5, %v2038_v3, 0.0  ;;  %v2040_v7 = vsel %vm334_vm5, %v2037_v4, 0.0  ;;  %v2574_v4 = vld [vmem:[%s5256_s26 + $0x10] sm:$0xff] }
 0xa57   :  { %2047 = vadd.xlane.f32.xlu1 %v2046_v5  ;;  %2044 = vadd.xlane.f32.xlu0 %v2043_v6 }
 0xa5b   :  { %2041 = vadd.xlane.f32.xlu1 %v2040_v7  ;;  %v2573_v7 = vld [vmem:[%s5256_s26 + $0x8] sm:$0xff] }
 0xae0   :  { %v2048_v8 = vpop.xlane.xlu1 %2047  ;;  %v2045_v9 = vpop.xlane.xlu0 %2044 }
 0xae1   :  { %v2051_v10 = vsub.f32 %v2007_v41, %v2048_v8  ;;  %v2050_v13 = vsub.f32 %v2006_v37, %v2045_v9  ;;  %v6829_v8 = vld [vmem:[%s6409_s9] sm:$0xff] }
 0xae2   :  { %v2572_v9 = vld [vmem:[%s5256_s26] sm:$0xff] }
 0xae3   :  { %v2056_v15 = vmul.f32 1.442695, %v2051_v10  ;;  %v2054_v17 = vmul.f32 1.442695, %v2050_v13  ;;  %v6834_v10 = vld [vmem:[%s6409_s9 + $0x8] sm:$0xff] }
 0xae4   :  { %v2042_v18 = vpop.xlane.xlu1 %2041 }
 0xae5   :  { %6308 = vpow2.f32 %v2056_v15  ;;  %v2049_v19 = vsub.f32 %v2005_v11, %v2042_v18 }
 0xae6   :  { %6310 = vpow2.f32 %v2054_v17 }
 0xae7   :  { %v2052_v20 = vmul.f32 1.442695, %v2049_v19 }
 0xae9   :  { %6312 = vpow2.f32 %v2052_v20 }
 0xaf2   :  { %v6309_v29 = vpop.eup %6308 }
 0xaf3   :  { %v6311_v30 = vpop.eup %6310  ;;  %v2060_v31 = vmul.f32 %v6309_v29, %v6448_v16  ;;  %v2814_v29 = vld [vmem:[%s6846_s30 + $0x8] sm:$0xff] }
 0xaf4   :  { %v2059_v32 = vmul.f32 %v6311_v30, %v6443_v14  ;;  %v2812_v30 = vld [vmem:[%s6851_s4 + $0x8] sm:$0xff] }
 0xaf5   :  { %5896 = vmatprep.subr.mxu0 %v2060_v31 }
 0xaf6   :  { %v6313_v35 = vpop.eup %6312  ;;  %5897 = vmatpush3.msra.mxu0 %v2060_v31 }
 0xaf7   :  { %5898 = vmatprep.subr.mxu0 %v2059_v32  ;;  %v2058_v37 = vmul.f32 %v6313_v35, %v6435_v12  ;;  %v92_v35 = vstv %s5259_s10  ;;  %s6386_s10 = smov 31  }
 0xaf8   :  { %5899 = vmatpush3.msra.mxu0 %v2059_v32  ;;  %93 = vst [vmem:[#allocation4] sm:$0x1] %v92_v35  ;;  %s5267_s11 = sld [smem:[%s7240_s0 + %s6386_s10]]  }
 0xaf9   :  { %5900 = vmatprep.subr.mxu0 %v2058_v37 }
 0xafa   :  { %5901 = vmatpush3.msra.mxu0 %v2058_v37 }
 0xafb   :  { %5903 = vmatmul.mubr.msk.f32.vlgmr.msra.gmra.mxu0 %vm890_vm3, %v6604_v25  ;;  %5905 = vmatprep.subr.mxu0 %v6356_v1 }
 0xafc   :  { %5909 = vmatprep.mubr.msk.f32.mxu0 %vm6360_vm1, %v6356_v1 }
 0xbbb   :  { %v5904_v16 = vpop.f32.mrf.mxu0 }
 0xbbc   :  { %5906 = vmatpush3.msra.mxu0 %v5904_v16 }
 0xbbd   :  { %v2127_v11 = vpop.f32.mrf.mxu0  ;;  %5907 = vmatprep.subr.mxu0 %v6356_v1 }
 0xbbe   :  { %5908 = vmatpush3.msra.mxu0 %v2127_v11 }
 0xbbf   :  { %5910 = vmatmul.mubr.msk.f32.vlgmr.msra.gmra.mxu0 %vm334_vm5, %v6464_v28 }
 0xbc0   :  { %5912 = vmatprep.mubr.msk.f32.mxu0 %vm6360_vm1, %v6356_v1 }
 0xbc3   :  { %5913 = vmatmul.mubr.msk.f32.gmra.mxu0 %vm334_vm5, %v6485_v34 }
 0xbc4   :  { %5915 = vmatprep.mubr.msk.f32.mxu0 %vm6360_vm1, %v6356_v1 }
 0xbc7   :  { %5916 = vmatmul.mubr.msk.f32.gmra.mxu0 %vm334_vm5, %v6509_v39 }
 0xc7f   :  { %v2202_v12 = vpop.f32.mrf.mxu0 }
 0xc80   :  { %v2203_v14 = vadd.f32 1e-16, %v2202_v12  ;;  %v2993_v12 = vld [vmem:[#allocation4] sm:$0x1] }
 0xc81   :  { %v5911_v38 = vpop.f32.mrf.mxu0 }
 0xc82   :  { %6314 = vrcp.f32 %v2203_v14 }
 0xc83   :  { %v2207_v40 = vpop.f32.mrf.mxu0 }
 0xc84   :  { %v2208_v43 = vadd.f32 1e-16, %v2207_v40 }
 0xc85   :  { %v5914_v41 = vpop.f32.mrf.mxu0 }
 0xc87   :  { %v2212_v42 = vpop.f32.mrf.mxu0 }
 0xc88   :  { %v2213_v46 = vadd.f32 1e-16, %v2212_v42 }
 0xc89   :  { %v5917_v47 = vpop.f32.mrf.mxu0 }
 0xc8a   :  { %6316 = vrcp.f32 %v2213_v46 }
 0xc8b   :  { %6318 = vrcp.f32 %v2208_v43 }
 0xc8f   :  { %v6315_v48 = vpop.eup %6314 }
 0xc90   :  { %v2217_v50 = vmul.f32 %v6315_v48, %v2058_v37 }
 0xc92   :  { %2224 = vperm.xlu0 %6294, %v2217_v50  }
 0xc97   :  { %v6317_v52 = vpop.eup %6316 }
 0xc98   :  { %v2221_v54 = vmul.f32 %v6317_v52, %v2060_v31  ;;  %v6319_v56 = vpop.eup %6318  ;;  %v2813_v31 = vld [vmem:[%s6846_s30] sm:$0xff]  ;;  %s6384_s30 = smov 30  }
 0xc99   :  { %v2219_v60 = vmul.f32 %v6319_v56, %v2059_v32  ;;  %v2811_v32 = vld [vmem:[%s6851_s4] sm:$0xff]  ;;  %v6938_v56 = vld [vmem:[%s6533_s7 + $0x10] sm:$0xff]  ;;  %s7045_s3 = sld [smem:[%s7240_s0 + %s6384_s30]]   ;;  %s6385_s4 = smov 29  }
 0xc9a   :  { %2234 = vperm.xlu1 %6295, %v2221_v54   ;;  %v2317_v0 = vmul.f32 %v2221_v54, %v6569_v59  ;;  %v2394_v59 = vld [vmem:[%s5253_s17 + $0x8] sm:$0xff]  ;;  %v6924_v52 = vld [vmem:[%s6533_s7] sm:$0xff]  ;;  %s7050_s8 = sld [smem:[%s7240_s0 + %s6385_s4]]  }
 0xc9b   :  { %v6931_v54 = vld [vmem:[%s6533_s7 + $0x8] sm:$0xff] }
 0xc9e   :  { %2229 = vperm.xlu1 %6295, %v2219_v60  }
 0xd0d   :  { %v2225_v49 = vpop.permute.xlu0 %2224 }
 0xd0e   :  { %v2237_v63 = vmul.f32 %v2225_v49, %v6724_v45  ;;  %v2575_v45 = vld [vmem:[%s5256_s26 + $0x18] sm:$0xff]  ;;  %s6383_s26 = smov 26  }
 0xd0f   :  { %s5262_s29 = sld [smem:[%s7240_s0 + %s6383_s26]]  }
 0xd10   :  { %s5277_s26 = sld [smem:[%s7240_s0 + %s6397_s23]]  }
 0xd15   :  { %v2235_v61 = vpop.permute.xlu1 %2234 }
 0xd16   :  { %v2239_v62 = vmul.f32 %v2235_v61, %v6743_v57  ;;  %v2316_v57 = vmul.f32 %v2219_v60, %v6562_v58  ;;  %v2395_v58 = vld [vmem:[%s5254_s22] sm:$0x1]  ;;  %s6382_s22 = smov 28  }
 0xd17   :  { %5936 = vmatprep.subr.msk.mxu0 %vm706_vm9, %v2395_v58  ;;  %s5264_s25 = sld [smem:[%s7240_s0 + %s6382_s22]]  }
 0xd18   :  { %5918 = vmatprep.subr.mxu1 %v2239_v62  ;;  %5937 = vmatpush3.msk.msra.mxu0 %vm706_vm9, %v2395_v58 }
 0xd19   :  { %5919 = vmatpush3.msra.mxu1 %v2239_v62  ;;  %v2230_v44 = vpop.permute.xlu1 %2229  ;;  %5948 = vmatprep.subr.mxu0 %v2575_v45 }
 0xd1a   :  { %v2238_v53 = vmul.f32 %v2230_v44, %v6734_v51  ;;  %v2315_v51 = vmul.f32 %v2217_v50, %v6554_v55  ;;  %v2393_v55 = vld [vmem:[%s5253_s17] sm:$0xff]  ;;  %s6381_s17 = smov 27  }
 0xd1b   :  { %s5263_s20 = sld [smem:[%s7240_s0 + %s6381_s17]]  }
 0xd1c   :  { %5920 = vmatprep.subr.mxu1 %v2238_v53 }
 0xd1d   :  { %5921 = vmatpush3.msra.mxu1 %v2238_v53 }
 0xd1e   :  { %5922 = vmatprep.subr.mxu1 %v2237_v63 }
 0xd1f   :  { %5923 = vmatpush3.msra.mxu1 %v2237_v63 }
 0xd20   :  { %5925 = vmatmul.mubr.msk.f32.vlgmr.msra.gmra.mxu1 %vm890_vm3, %v6604_v25  ;;  %5927 = vmatprep.subr.mxu1 %v2317_v0 }
 0xd21   :  { %5928 = vmatpush3.msra.mxu1 %v2317_v0  ;;  %5933 = vmatprep.mubr.msk.f32.mxu1 %vm890_vm3, %v6598_v22 }
 0xd22   :  { %5929 = vmatprep.subr.mxu1 %v2316_v57 }
 0xd23   :  { %5930 = vmatpush3.msra.mxu1 %v2316_v57 }
 0xd24   :  { %5931 = vmatprep.subr.mxu1 %v2315_v51 }
 0xd25   :  { %5932 = vmatpush3.msra.mxu1 %v2315_v51 }
 0xd26   :  { %5934 = vmatmul.mubr.msk.f32.vlgmr.msra.gmra.mxu1 %vm890_vm3, %v6604_v25  ;;  %5941 = vmatprep.subr.mxu1 %v2394_v59 }
 0xd27   :  { %5942 = vmatpush3.msra.mxu1 %v2394_v59 }
 0xd28   :  { %5943 = vmatprep.subr.mxu1 %v2393_v55 }
 0xd29   :  { %5944 = vmatpush3.msra.mxu1 %v2393_v55 }
 0xd2a   :  { %5959 = vmatprep.subr.mxu1 %v6356_v1 }
 0xde0   :  { %v5926_v2 = vpop.f32.mrf.mxu1 }
 0xde2   :  { %v2306_v3 = vpop.f32.mrf.mxu1 }
 0xde3   :  { %5945 = vmatprep.mubr.msk.f32.mxu1 %vm334_vm5, %v2306_v3 }
 0xde4   :  { %5946 = vmatmul.mubr.msk.f32.vlgmr.msra.gmra.mxu1 %vm334_vm5, %v5926_v2 }
 0xde5   :  { %5963 = vmatprep.mubr.msk.f32.mxu1 %vm6360_vm1, %v6356_v1 }
 0xde6   :  { %v5935_v5 = vpop.f32.mrf.mxu1 }
 0xde8   :  { %v2384_v6 = vpop.f32.mrf.mxu1 }
 0xde9   :  { %5938 = vmatprep.mubr.msk.f32.mxu0 %vm696_vm10, %v2384_v6 }
 0xdea   :  { %5939 = vmatmul.mubr.msk.f32.vlgmr.msra.gmra.mxu0 %vm696_vm10, %v5935_v5 }
 0xdeb   :  { %5949 = vmatpush3.msra.mxu0 %v2575_v45  ;;  %5956 = vmatprep.mubr.msk.f32.mxu0 %vm252_vm0, %v6829_v8 }
 0xdec   :  { %5950 = vmatprep.subr.mxu0 %v2574_v4 }
 0xded   :  { %5951 = vmatpush3.msra.mxu0 %v2574_v4 }
 0xdee   :  { %5952 = vmatprep.subr.mxu0 %v2573_v7 }
 0xdef   :  { %5953 = vmatpush3.msra.mxu0 %v2573_v7 }
 0xdf0   :  { %5954 = vmatprep.subr.mxu0 %v2572_v9 }
 0xdf1   :  { %5955 = vmatpush3.msra.mxu0 %v2572_v9 }
 0xdf2   :  { %5957 = vmatmul.mubr.msk.f32.vlgmr.msra.gmra.mxu0 %vm252_vm0, %v6834_v10  ;;  %5972 = vmatprep.subr.mxu0 %v6356_v1 }
 0xdf3   :  { %5976 = vmatprep.mubr.msk.f32.mxu0 %vm6360_vm1, %v6356_v1 }
 0xea4   :  { %v5947_v13 = vpop.f32.mrf.mxu1 }
 0xea6   :  { %v6893_v37 = vpop.f32.mrf.mxu1 }
 0xeaa   :  { %v5940_v15 = vpop.f32.mrf.mxu0 }
 0xeab   :  { %v6841_v17 = vadd.f32 %v5947_v13, %v5940_v15 }
 0xeac   :  { %v6853_v18 = vpop.f32.mrf.mxu0 }
 0xeb2   :  { %v5958_v19 = vpop.f32.mrf.mxu0 }
 0xeb3   :  { %5960 = vmatpush3.msra.mxu1 %v5958_v19  ;;  %5973 = vmatpush3.msra.mxu0 %v5958_v19 }
 0xeb4   :  { %v2642_v20 = vpop.f32.mrf.mxu0  ;;  %5961 = vmatprep.subr.mxu1 %v6356_v1  ;;  %5974 = vmatprep.subr.mxu0 %v6356_v1 }
 0xeb5   :  { %5962 = vmatpush3.msra.mxu1 %v2642_v20  ;;  %5975 = vmatpush3.msra.mxu0 %v2642_v20 }
 0xeb6   :  { %5964 = vmatmul.mubr.msk.f32.vlgmr.msra.gmra.mxu1 %vm334_vm5, %v6462_v27  ;;  %5977 = vmatmul.mubr.msk.f32.vlgmr.msra.gmra.mxu0 %vm334_vm5, %v6464_v28 }
 0xeb7   :  { %5966 = vmatprep.mubr.msk.f32.mxu1 %vm6360_vm1, %v6356_v1  ;;  %5979 = vmatprep.mubr.msk.f32.mxu0 %vm6360_vm1, %v6356_v1 }
 0xeb8   :  { %5985 = vmatprep.subr.mxu1 %v6356_v1  ;;  %5998 = vmatprep.subr.mxu0 %v6356_v1 }
 0xeb9   :  { %5986 = vmatpush3.msra.mxu1 %v2814_v29  ;;  %5999 = vmatpush3.msra.mxu0 %v2812_v30 }
 0xeba   :  { %5967 = vmatmul.mubr.msk.f32.gmra.mxu1 %vm334_vm5, %v6483_v33  ;;  %5980 = vmatmul.mubr.msk.f32.gmra.mxu0 %vm334_vm5, %v6485_v34 }
 0xebb   :  { %5969 = vmatprep.mubr.msk.f32.mxu1 %vm6360_vm1, %v6356_v1  ;;  %5982 = vmatprep.mubr.msk.f32.mxu0 %vm6360_vm1, %v6356_v1 }
 0xebc   :  { %5987 = vmatprep.subr.mxu1 %v6356_v1  ;;  %6000 = vmatprep.subr.mxu0 %v6356_v1 }
 0xebd   :  { %5988 = vmatpush3.msra.mxu1 %v2813_v31  ;;  %6001 = vmatpush3.msra.mxu0 %v2811_v32 }
 0xebe   :  { %5970 = vmatmul.mubr.msk.f32.gmra.mxu1 %vm334_vm5, %v6501_v36  ;;  %5983 = vmatmul.mubr.msk.f32.gmra.mxu0 %vm334_vm5, %v6509_v39 }
 0xebf   :  { %5989 = vmatprep.mubr.msk.f32.mxu1 %vm6360_vm1, %v6356_v1  ;;  %6002 = vmatprep.mubr.msk.f32.mxu0 %vm6360_vm1, %v6356_v1 }
 0xec0   :  { %6011 = vmatprep.subr.mxu1 %v6356_v1 }
 0xf76   :  { %v6895_v16 = vpop.f32.mrf.mxu1  ;;  %v2797_v11 = vpop.f32.mrf.mxu0 }
 0xf77   :  { %5990 = vmatmul.mubr.msk.f32.vlgmr.msra.gmra.mxu1 %vm334_vm5, %v6895_v16  ;;  %6003 = vmatmul.mubr.msk.f32.vlgmr.msra.gmra.mxu0 %vm334_vm5, %v2797_v11 }
 0xf78   :  { %v5965_v14 = vpop.f32.mrf.mxu1  ;;  %v5978_v38 = vpop.f32.mrf.mxu0  ;;  %5992 = vmatprep.mubr.msk.f32.mxu1 %vm6360_vm1, %v6356_v1  ;;  %6005 = vmatprep.mubr.msk.f32.mxu0 %vm6360_vm1, %v6356_v1 }
 0xf79   :  { %6012 = vmatpush3.msk.msra.mxu1 %vm706_vm9, %v2993_v12 }
 0xf7a   :  { %v6905_v40 = vpop.f32.mrf.mxu1  ;;  %v2802_v41 = vpop.f32.mrf.mxu0 }
 0xf7b   :  { %5993 = vmatmul.mubr.msk.f32.gmra.mxu1 %vm334_vm5, %v6905_v40  ;;  %6006 = vmatmul.mubr.msk.f32.gmra.mxu0 %vm334_vm5, %v2802_v41 }
 0xf7c   :  { %v5968_v42 = vpop.f32.mrf.mxu1  ;;  %v5981_v43 = vpop.f32.mrf.mxu0  ;;  %5995 = vmatprep.mubr.msk.f32.mxu1 %vm6360_vm1, %v6356_v1  ;;  %6008 = vmatprep.mubr.msk.f32.mxu0 %vm6360_vm1, %v6356_v1 }
 0xf7e   :  { %v6914_v46 = vpop.f32.mrf.mxu1  ;;  %v2807_v47 = vpop.f32.mrf.mxu0 }
 0xf7f   :  { %5996 = vmatmul.mubr.msk.f32.gmra.mxu1 %vm334_vm5, %v6914_v46  ;;  %6009 = vmatmul.mubr.msk.f32.gmra.mxu0 %vm334_vm5, %v2807_v47 }
 0xf80   :  { %v5971_v48 = vpop.f32.mrf.mxu1  ;;  %v5984_v50 = vpop.f32.mrf.mxu0  ;;  %6028 = vmatprep.mubr.msk.f32.mxu0 %vm890_vm3, %v6598_v22  ;;  %6013 = vmatprep.mubr.msk.f32.mxu1 %vm6360_vm1, %v6356_v1 }
 0xf83   :  { %6014 = vmatmul.mubr.msk.f32.vlgmr.msra.gmra.mxu1 %vm696_vm10, %v6924_v52 }
 0xf84   :  { %6016 = vmatprep.mubr.msk.f32.mxu1 %vm6360_vm1, %v6356_v1 }
 0xf87   :  { %6017 = vmatmul.mubr.msk.f32.gmra.mxu1 %vm696_vm10, %v6931_v54 }
 0xf88   :  { %6019 = vmatprep.mubr.msk.f32.mxu1 %vm6360_vm1, %v6356_v1 }
 0xf8b   :  { %6020 = vmatmul.mubr.msk.f32.gmra.mxu1 %vm696_vm10, %v6938_v56 }
 0xf8c   :  { %6050 = vmatprep.mubr.msk.f32.mxu1 %vm890_vm3, %v6598_v22 }
0x1037   :  { %v2890_v60 = vpop.f32.mrf.mxu1  ;;  %v2979_v61 = vpop.f32.mrf.mxu0 }
0x1038   :  { %v2980_v58 = vadd.f32 %v2979_v61, %v2890_v60 }
0x1039   :  { %v5991_v62 = vpop.f32.mrf.mxu1  ;;  %v6004_v49 = vpop.f32.mrf.mxu0 }
0x103b   :  { %v2895_v44 = vpop.f32.mrf.mxu1  ;;  %v2984_v53 = vpop.f32.mrf.mxu0 }
0x103c   :  { %v2985_v5 = vadd.f32 %v2984_v53, %v2895_v44 }
0x103d   :  { %v5994_v63 = vpop.f32.mrf.mxu1  ;;  %v6007_v0 = vpop.f32.mrf.mxu0 }
0x103f   :  { %v2900_v57 = vpop.f32.mrf.mxu1  ;;  %v2989_v51 = vpop.f32.mrf.mxu0 }
0x1040   :  { %v2990_v15 = vadd.f32 %v2989_v51, %v2900_v57 }
0x1041   :  { %v5997_v59 = vpop.f32.mrf.mxu1  ;;  %v6010_v55 = vpop.f32.mrf.mxu0 }
0x1043   :  { %v3063_v45 = vpop.f32.mrf.mxu1 }
0x1044   :  { %v3077_v2 = vadd.f32 %v3063_v45, %v2980_v58 }
0x1045   :  { %v6015_v3 = vpop.f32.mrf.mxu1 }
0x1046   :  { %v3083_v6 = vmul.f32 0.2, %v3077_v2  ;;  %vm3080_vm8 = vcmp.ge.f32.partialorder %v3077_v2, 0.0 }
0x1047   :  { %v3068_v4 = vpop.f32.mrf.mxu1 }
0x1048   :  { %v3078_v7 = vadd.f32 %v3068_v4, %v2985_v5  ;;  %v3086_v9 = vsel %vm3080_vm8, %v3077_v2, %v3083_v6 }
0x1049   :  { %3091 = vperm.xlu1 %6295, %v3086_v9   ;;  %v6018_v13 = vpop.f32.mrf.mxu1 }
0x104a   :  { %v3084_v19 = vmul.f32 0.2, %v3078_v7  ;;  %vm3081_vm11 = vcmp.ge.f32.partialorder %v3078_v7, 0.0 }
0x104b   :  { %v3073_v20 = vpop.f32.mrf.mxu1 }
0x104c   :  { %v3079_v29 = vadd.f32 %v3073_v20, %v2990_v15  ;;  %v3087_v30 = vsel %vm3081_vm11, %v3078_v7, %v3084_v19 }
0x104d   :  { %3096 = vperm.xlu1 %6295, %v3087_v30   ;;  %v6021_v31 = vpop.f32.mrf.mxu1 }
0x104e   :  { %v3085_v32 = vmul.f32 0.2, %v3079_v29  ;;  %vm3082_vm12 = vcmp.ge.f32.partialorder %v3079_v29, 0.0 }
0x1050   :  { %v3088_v35 = vsel %vm3082_vm12, %v3079_v29, %v3085_v32  ;;  %v6960_v29 = vld [vmem:[%s6423_s21 + $0x10] sm:$0xff]  ;;  %v6964_v32 = vld [vmem:[%s6423_s21 + $0x8] sm:$0xff] }
0x1051   :  { %3101 = vperm.xlu1 %6295, %v3088_v35  }
0x10c4   :  { %v3092_v11 = vpop.permute.xlu1 %3091 }
0x10c5   :  { %v3104_v14 = vsel %vm802_vm14, %v3092_v11, -1e+30  ;;  %v6968_v11 = vld [vmem:[%s6423_s21] sm:$0xff]  ;;  %s6379_s21 = smov 24  }
0x10c6   :  { %v3107_v42 = vsel %vm334_vm5, %v3104_v14, -inf  ;;  %s5260_s12 = sld [smem:[%s7240_s0 + %s6379_s21]]  }
0x10c8   :  { %v3097_v12 = vpop.permute.xlu1 %3096 }
0x10c9   :  { %v3105_v38 = vsel %vm803_vm15, %v3097_v12, -1e+30 }
0x10ca   :  { %v3108_v41 = vsel %vm334_vm5, %v3105_v38, -inf }
0x10cb   :  { %v3110_v47 = vmax.f32 %v3107_v42, %v3108_v41 }
0x10cc   :  { %v3102_v43 = vpop.permute.xlu1 %3101 }
0x10cd   :  { %v3106_v48 = vsel %vm804_vm2, %v3102_v43, -1e+30 }
0x10ce   :  { %v3109_v50 = vsel %vm334_vm5, %v3106_v48, -inf }
0x10cf   :  { %v3111_v60 = vmax.f32 %v3110_v47, %v3109_v50 }
0x10d1   :  { %v3112_v61 = vrot.slane %v3111_v60, 4 }
0x10d3   :  { %v3113_v62 = vmax.f32 %v3111_v60, %v3112_v61 }
0x10d5   :  { %v3114_v49 = vrot.slane %v3113_v62, 2 }
0x10d7   :  { %v3115_v44 = vmax.f32 %v3113_v62, %v3114_v49 }
0x10d9   :  { %v3116_v53 = vrot.slane %v3115_v44, 1 }
0x10db   :  { %v3117_v63 = vmax.f32 %v3115_v44, %v3116_v53 }
0x10dd   :  { %v3120_v0 = vmul.f32 %v3117_v63, %v6509_v39  ;;  %v3119_v57 = vmul.f32 %v3117_v63, %v6485_v34  ;;  %v3118_v55 = vmul.f32 %v3117_v63, %v6464_v28 }
0x10df   :  { %v3127_v51 = vsel %vm334_vm5, %v3120_v0, 0.0  ;;  %v3124_v59 = vsel %vm334_vm5, %v3119_v57, 0.0  ;;  %v3121_v58 = vsel %vm334_vm5, %v3118_v55, 0.0 }
0x10e0   :  { %3128 = vadd.xlane.f32.xlu1 %v3127_v51  ;;  %3125 = vadd.xlane.f32.xlu0 %v3124_v59 }
0x10e4   :  { %3122 = vadd.xlane.f32.xlu1 %v3121_v58 }
0x1169   :  { %v3129_v45 = vpop.xlane.xlu1 %3128  ;;  %v3126_v2 = vpop.xlane.xlu0 %3125 }
0x116a   :  { %v3132_v3 = vsub.f32 %v3088_v35, %v3129_v45  ;;  %v3131_v5 = vsub.f32 %v3087_v30, %v3126_v2 }
0x116c   :  { %v3137_v6 = vmul.f32 1.442695, %v3132_v3  ;;  %v3135_v4 = vmul.f32 1.442695, %v3131_v5  ;;  %v3476_v5 = vld [vmem:[%s5261_s16] sm:$0x1] }
0x116d   :  { %v3123_v7 = vpop.xlane.xlu1 %3122  ;;  %s6388_s16 = smov 35  }
0x116e   :  { %6320 = vpow2.f32 %v3137_v6  ;;  %v3130_v13 = vsub.f32 %v3086_v9, %v3123_v7  ;;  %s5271_s19 = sld [smem:[%s7240_s0 + %s6388_s16]]  }
0x116f   :  { %6322 = vpow2.f32 %v3135_v4 }
0x1170   :  { %v3133_v15 = vmul.f32 1.442695, %v3130_v13 }
0x1172   :  { %6324 = vpow2.f32 %v3133_v15  ;;  %v3656_v15 = vld [vmem:[%s5263_s20 + $0x18] sm:$0xff] }
0x117b   :  { %v6321_v19 = vpop.eup %6320 }
0x117c   :  { %v6323_v20 = vpop.eup %6322  ;;  %v3141_v31 = vmul.f32 %v6960_v29, %v6321_v19  ;;  %v3654_v19 = vld [vmem:[%s5263_s20 + $0x8] sm:$0xff] }
0x117d   :  { %v3140_v30 = vmul.f32 %v6964_v32, %v6323_v20  ;;  %v3658_v20 = vld [vmem:[%s5264_s25 + $0x8] sm:$0xff] }
0x117e   :  { %6022 = vmatprep.subr.mxu0 %v3141_v31 }
0x117f   :  { %v6325_v35 = vpop.eup %6324  ;;  %6023 = vmatpush3.msra.mxu0 %v3141_v31 }
0x1180   :  { %6024 = vmatprep.subr.mxu0 %v3140_v30  ;;  %v3139_v9 = vmul.f32 %v6968_v11, %v6325_v35 }
0x1181   :  { %6025 = vmatpush3.msra.mxu0 %v3140_v30 }
0x1182   :  { %6026 = vmatprep.subr.mxu0 %v3139_v9 }
0x1183   :  { %6027 = vmatpush3.msra.mxu0 %v3139_v9 }
0x1184   :  { %6029 = vmatmul.mubr.msk.f32.vlgmr.msra.gmra.mxu0 %vm890_vm3, %v6604_v25  ;;  %6031 = vmatprep.subr.mxu0 %v6356_v1 }
0x1185   :  { %6035 = vmatprep.mubr.msk.f32.mxu0 %vm6360_vm1, %v6356_v1 }
0x1244   :  { %v6030_v12 = vpop.f32.mrf.mxu0 }
0x1245   :  { %6032 = vmatpush3.msra.mxu0 %v6030_v12 }
0x1246   :  { %v3208_v14 = vpop.f32.mrf.mxu0  ;;  %6033 = vmatprep.subr.mxu0 %v6356_v1 }
0x1247   :  { %6034 = vmatpush3.msra.mxu0 %v3208_v14  ;;  %v5384_v14 = vld [vmem:[%s5262_s29] ss:$0 sm:$0xff]  ;;  %s6391_s29 = smov 19  }
0x1248   :  { %6036 = vmatmul.mubr.msk.f32.vlgmr.msra.gmra.mxu0 %vm334_vm5, %v6464_v28  ;;  %s5255_s2 = sld [smem:[%s7240_s0 + %s6391_s29]]  }
0x1249   :  { %6038 = vmatprep.mubr.msk.f32.mxu0 %vm6360_vm1, %v6356_v1 }
0x124c   :  { %6039 = vmatmul.mubr.msk.f32.gmra.mxu0 %vm334_vm5, %v6485_v34 }
0x124d   :  { %6041 = vmatprep.mubr.msk.f32.mxu0 %vm6360_vm1, %v6356_v1 }
0x1250   :  { %6042 = vmatmul.mubr.msk.f32.gmra.mxu0 %vm334_vm5, %v6509_v39 }
0x1308   :  { %v3283_v38 = vpop.f32.mrf.mxu0 }
0x1309   :  { %v3284_v43 = vadd.f32 1e-16, %v3283_v38 }
0x130a   :  { %v6037_v41 = vpop.f32.mrf.mxu0 }
0x130c   :  { %v3288_v42 = vpop.f32.mrf.mxu0 }
0x130d   :  { %v3289_v47 = vadd.f32 1e-16, %v3288_v42 }
0x130e   :  { %v6040_v48 = vpop.f32.mrf.mxu0 }
0x130f   :  { %6326 = vrcp.f32 %v3289_v47 }
0x1310   :  { %v3293_v50 = vpop.f32.mrf.mxu0  ;;  %6328 = vrcp.f32 %v3284_v43 }
0x1311   :  { %v3294_v60 = vadd.f32 1e-16, %v3293_v50 }
0x1312   :  { %v6043_v61 = vpop.f32.mrf.mxu0 }
0x1313   :  { %6330 = vrcp.f32 %v3294_v60 }
0x131c   :  { %v6327_v62 = vpop.eup %6326 }
0x131d   :  { %v3300_v49 = vmul.f32 %v6327_v62, %v3140_v30  ;;  %v6329_v44 = vpop.eup %6328  ;;  %v3657_v30 = vld [vmem:[%s5264_s25] sm:$0xff]  ;;  %s6390_s25 = smov 36  }
0x131e   :  { %v3298_v63 = vmul.f32 %v6329_v44, %v3139_v9  ;;  %s5272_s28 = sld [smem:[%s7240_s0 + %s6390_s25]]  }
0x131f   :  { %3310 = vperm.xlu1 %6295, %v3300_v49   ;;  %v3397_v3 = vmul.f32 %v6931_v54, %v3300_v49 }
0x1320   :  { %v6331_v53 = vpop.eup %6330 }
0x1321   :  { %v3302_v0 = vmul.f32 %v6331_v53, %v3141_v31  ;;  %v3653_v31 = vld [vmem:[%s5263_s20] sm:$0xff]  ;;  %v3978_v53 = vld [vmem:[%s7045_s3 + $0x8] sm:$0xff] }
0x1323   :  { %3305 = vperm.xlu1 %6295, %v3298_v63   ;;  %3315 = vperm.xlu0 %6294, %v3302_v0   ;;  %v3398_v2 = vmul.f32 %v6938_v56, %v3302_v0 }
0x139a   :  { %v3311_v57 = vpop.permute.xlu1 %3310 }
0x139b   :  { %v3319_v58 = vmul.f32 %v3311_v57, %v6905_v40  ;;  %v3396_v40 = vmul.f32 %v6924_v52, %v3298_v63  ;;  %v3976_v63 = vld [vmem:[%s7050_s8 + $0x8] sm:$0xff] }
0x139e   :  { %v3316_v51 = vpop.permute.xlu0 %3315  ;;  %v3306_v55 = vpop.permute.xlu1 %3305 }
0x139f   :  { %v3320_v59 = vmul.f32 %v3316_v51, %v6914_v46  ;;  %v3318_v45 = vmul.f32 %v3306_v55, %v6895_v16  ;;  %v3475_v16 = vld [vmem:[%s5260_s12 + $0x8] sm:$0xff]  ;;  %v3474_v46 = vld [vmem:[%s5260_s12] sm:$0xff]  ;;  %s6387_s12 = smov 32  }
0x13a0   :  { %6067 = vmatprep.subr.mxu0 %v3475_v16  ;;  %s5268_s15 = sld [smem:[%s7240_s0 + %s6387_s12]]  }
0x13a1   :  { %6044 = vmatprep.subr.mxu1 %v3320_v59  ;;  %6068 = vmatpush3.msra.mxu0 %v3475_v16 }
0x13a2   :  { %6045 = vmatpush3.msra.mxu1 %v3320_v59  ;;  %6069 = vmatprep.subr.mxu0 %v3474_v46 }
0x13a3   :  { %6046 = vmatprep.subr.mxu1 %v3319_v58  ;;  %6070 = vmatpush3.msra.mxu0 %v3474_v46 }
0x13a4   :  { %6047 = vmatpush3.msra.mxu1 %v3319_v58  ;;  %6081 = vmatprep.subr.mxu0 %v3656_v15 }
0x13a5   :  { %6048 = vmatprep.subr.mxu1 %v3318_v45 }
0x13a6   :  { %6049 = vmatpush3.msra.mxu1 %v3318_v45 }
0x13a7   :  { %6051 = vmatmul.mubr.msk.f32.vlgmr.msra.gmra.mxu1 %vm890_vm3, %v6604_v25  ;;  %6053 = vmatprep.subr.mxu1 %v3398_v2 }
0x13a8   :  { %6054 = vmatpush3.msra.mxu1 %v3398_v2  ;;  %6059 = vmatprep.mubr.msk.f32.mxu1 %vm890_vm3, %v6598_v22 }
0x13a9   :  { %6055 = vmatprep.subr.mxu1 %v3397_v3 }
0x13aa   :  { %6056 = vmatpush3.msra.mxu1 %v3397_v3 }
0x13ab   :  { %6057 = vmatprep.subr.mxu1 %v3396_v40 }
0x13ac   :  { %6058 = vmatpush3.msra.mxu1 %v3396_v40 }
0x13ad   :  { %6060 = vmatmul.mubr.msk.f32.vlgmr.msra.gmra.mxu1 %vm890_vm3, %v6604_v25  ;;  %6062 = vmatprep.subr.msk.mxu1 %vm706_vm9, %v3476_v5 }
0x13ae   :  { %6063 = vmatpush3.msk.msra.mxu1 %vm706_vm9, %v3476_v5 }
0x13af   :  { %6074 = vmatprep.subr.mxu1 %v3658_v20 }
0x1467   :  { %v6052_v6 = vpop.f32.mrf.mxu1 }
0x1469   :  { %v3387_v4 = vpop.f32.mrf.mxu1 }
0x146a   :  { %6071 = vmatprep.mubr.msk.f32.mxu0 %vm334_vm5, %v3387_v4 }
0x146b   :  { %6072 = vmatmul.mubr.msk.f32.vlgmr.msra.gmra.mxu0 %vm334_vm5, %v6052_v6 }
0x146c   :  { %6089 = vmatprep.mubr.msk.f32.mxu0 %vm252_vm0, %v6829_v8  ;;  %6082 = vmatpush3.msra.mxu0 %v3656_v15  ;;  %v3655_v8 = vld [vmem:[%s5263_s20 + $0x10] sm:$0xff]  ;;  %s6389_s20 = smov 33  }
0x146d   :  { %v6061_v7 = vpop.f32.mrf.mxu1  ;;  %6083 = vmatprep.subr.mxu0 %v3655_v8  ;;  %s5269_s24 = sld [smem:[%s7240_s0 + %s6389_s20]]  }
0x146e   :  { %6084 = vmatpush3.msra.mxu0 %v3655_v8 }
0x146f   :  { %v3465_v13 = vpop.f32.mrf.mxu1  ;;  %6085 = vmatprep.subr.mxu0 %v3654_v19 }
0x1470   :  { %6064 = vmatprep.mubr.msk.f32.mxu1 %vm696_vm10, %v3465_v13  ;;  %6086 = vmatpush3.msra.mxu0 %v3654_v19 }
0x1471   :  { %6065 = vmatmul.mubr.msk.f32.vlgmr.msra.gmra.mxu1 %vm696_vm10, %v6061_v7  ;;  %6087 = vmatprep.subr.mxu0 %v3653_v31 }
0x1472   :  { %6075 = vmatpush3.msra.mxu1 %v3658_v20  ;;  %6088 = vmatpush3.msra.mxu0 %v3653_v31 }
0x1473   :  { %6076 = vmatprep.subr.mxu1 %v3657_v30  ;;  %6090 = vmatmul.mubr.msk.f32.vlgmr.msra.gmra.mxu0 %vm252_vm0, %v6834_v10 }
0x1474   :  { %6077 = vmatpush3.msra.mxu1 %v3657_v30  ;;  %6105 = vmatprep.subr.mxu0 %v6356_v1 }
0x1475   :  { %6092 = vmatprep.subr.mxu1 %v6356_v1  ;;  %6109 = vmatprep.mubr.msk.f32.mxu0 %vm6360_vm1, %v6356_v1 }
0x152b   :  { %v6073_v35 = vpop.f32.mrf.mxu0 }
0x152d   :  { %v3633_v38 = vpop.f32.mrf.mxu0 }
0x1531   :  { %v6066_v9 = vpop.f32.mrf.mxu1 }
0x1532   :  { %v3639_v12 = vadd.f32 %v6073_v35, %v6066_v9 }
0x1533   :  { %v3552_v41 = vpop.f32.mrf.mxu1  ;;  %v6091_v50 = vpop.f32.mrf.mxu0 }
0x1534   :  { %v3634_v10 = vadd.f32 %v3633_v38, %v3552_v41  ;;  %v7028_v42 = vadd.f32 %v5384_v14, %v3639_v12 }
0x1535   :  { %v3806_v62 = vpop.f32.mrf.mxu0 }
0x1536   :  { %v7030_v43 = vadd.f32 %v5384_v14, %v3634_v10  ;;  %v3652_v48 = vmax.f32 %v7028_v42, 0.0 }
0x1538   :  { %v3651_v47 = vmax.f32 %v7030_v43, 0.0 }
0x153a   :  { %6078 = vmatprep.mubr.msk.f32.mxu1 %vm334_vm5, %v3651_v47 }
0x153b   :  { %6079 = vmatmul.mubr.msk.f32.vlgmr.msra.gmra.mxu1 %vm334_vm5, %v3652_v48 }
0x153c   :  { %6096 = vmatprep.mubr.msk.f32.mxu1 %vm6360_vm1, %v6356_v1 }
0x15fb   :  { %v6080_v60 = vpop.f32.mrf.mxu1 }
0x15fc   :  { %v3812_v61 = vadd.f32 %v6091_v50, %v6080_v60 }
0x15fd   :  { %v3731_v49 = vpop.f32.mrf.mxu1 }
0x15fe   :  { %v3807_v44 = vadd.f32 %v3806_v62, %v3731_v49  ;;  %6093 = vmatpush3.msra.mxu1 %v3812_v61  ;;  %6106 = vmatpush3.msra.mxu0 %v3812_v61 }
0x15ff   :  { %6094 = vmatprep.subr.mxu1 %v6356_v1  ;;  %6107 = vmatprep.subr.mxu0 %v6356_v1 }
0x1600   :  { %6095 = vmatpush3.msra.mxu1 %v3807_v44  ;;  %6108 = vmatpush3.msra.mxu0 %v3807_v44 }
0x1601   :  { %6097 = vmatmul.mubr.msk.f32.vlgmr.msra.gmra.mxu1 %vm334_vm5, %v6462_v27  ;;  %6110 = vmatmul.mubr.msk.f32.vlgmr.msra.gmra.mxu0 %vm334_vm5, %v6464_v28  ;;  %v3977_v27 = vld [vmem:[%s7045_s3] sm:$0xff]  ;;  %s6392_s3 = smov 37  }
0x1602   :  { %6099 = vmatprep.mubr.msk.f32.mxu1 %vm6360_vm1, %v6356_v1  ;;  %6112 = vmatprep.mubr.msk.f32.mxu0 %vm6360_vm1, %v6356_v1  ;;  %s5273_s6 = sld [smem:[%s7240_s0 + %s6392_s3]]  }
0x1603   :  { %6118 = vmatprep.subr.mxu1 %v6356_v1  ;;  %6131 = vmatprep.subr.mxu0 %v6356_v1 }
0x1604   :  { %6119 = vmatpush3.msra.mxu1 %v3978_v53  ;;  %6132 = vmatpush3.msra.mxu0 %v3976_v63 }
0x1605   :  { %6100 = vmatmul.mubr.msk.f32.gmra.mxu1 %vm334_vm5, %v6483_v33  ;;  %6113 = vmatmul.mubr.msk.f32.gmra.mxu0 %vm334_vm5, %v6485_v34  ;;  %v3975_v33 = vld [vmem:[%s7050_s8] sm:$0xff]  ;;  %s6393_s8 = smov 39  }
0x1606   :  { %6102 = vmatprep.mubr.msk.f32.mxu1 %vm6360_vm1, %v6356_v1  ;;  %6115 = vmatprep.mubr.msk.f32.mxu0 %vm6360_vm1, %v6356_v1  ;;  %s5275_s7 = sld [smem:[%s7240_s0 + %s6393_s8]]  }
0x1607   :  { %6120 = vmatprep.subr.mxu1 %v6356_v1  ;;  %6133 = vmatprep.subr.mxu0 %v6356_v1 }
0x1608   :  { %6121 = vmatpush3.msra.mxu1 %v3977_v27  ;;  %6134 = vmatpush3.msra.mxu0 %v3975_v33  ;;  %v4978_v23 = vld [vmem:[%s5273_s6 + $0x8] sm:$0xff] }
0x1609   :  { %6103 = vmatmul.mubr.msk.f32.gmra.mxu1 %vm334_vm5, %v6501_v36  ;;  %6116 = vmatmul.mubr.msk.f32.gmra.mxu0 %vm334_vm5, %v6509_v39  ;;  %v94_v36 = vstv %s5267_s11  ;;  %s6394_s11 = smov 38  }
0x160a   :  { %6122 = vmatprep.mubr.msk.f32.mxu1 %vm6360_vm1, %v6356_v1  ;;  %6135 = vmatprep.mubr.msk.f32.mxu0 %vm6360_vm1, %v6356_v1  ;;  %95 = vst [vmem:[#allocation5] sm:$0x1] %v94_v36  ;;  %s5274_s14 = sld [smem:[%s7240_s0 + %s6394_s11]]  }
0x160b   :  { %6144 = vmatprep.subr.mxu1 %v6356_v1 }
0x160c   :  { %v5143_v42 = vld [vmem:[%s5275_s7 + $0x10] sm:$0xff] }
0x1610   :  { %v5057_v43 = vld [vmem:[%s5274_s14 + $0x8] sm:$0xff] }
0x1611   :  { %v4157_v51 = vld [vmem:[#allocation5] sm:$0x1] }
0x16c1   :  { %v7090_v0 = vpop.f32.mrf.mxu1  ;;  %v3961_v57 = vpop.f32.mrf.mxu0 }
0x16c2   :  { %6123 = vmatmul.mubr.msk.f32.vlgmr.msra.gmra.mxu1 %vm334_vm5, %v7090_v0  ;;  %6136 = vmatmul.mubr.msk.f32.vlgmr.msra.gmra.mxu0 %vm334_vm5, %v3961_v57 }
0x16c3   :  { %v6098_v59 = vpop.f32.mrf.mxu1  ;;  %v6111_v55 = vpop.f32.mrf.mxu0  ;;  %6125 = vmatprep.mubr.msk.f32.mxu1 %vm6360_vm1, %v6356_v1  ;;  %6138 = vmatprep.mubr.msk.f32.mxu0 %vm6360_vm1, %v6356_v1 }
0x16c4   :  { %6145 = vmatpush3.msk.msra.mxu1 %vm706_vm9, %v4157_v51 }
0x16c5   :  { %v7100_v58 = vpop.f32.mrf.mxu1  ;;  %v3966_v45 = vpop.f32.mrf.mxu0 }
0x16c6   :  { %6126 = vmatmul.mubr.msk.f32.gmra.mxu1 %vm334_vm5, %v7100_v58  ;;  %6139 = vmatmul.mubr.msk.f32.gmra.mxu0 %vm334_vm5, %v3966_v45 }
0x16c7   :  { %v6101_v2 = vpop.f32.mrf.mxu1  ;;  %v6114_v3 = vpop.f32.mrf.mxu0  ;;  %6128 = vmatprep.mubr.msk.f32.mxu1 %vm6360_vm1, %v6356_v1  ;;  %6141 = vmatprep.mubr.msk.f32.mxu0 %vm6360_vm1, %v6356_v1 }
0x16c9   :  { %v7109_v40 = vpop.f32.mrf.mxu1  ;;  %v3971_v16 = vpop.f32.mrf.mxu0 }
0x16ca   :  { %6129 = vmatmul.mubr.msk.f32.gmra.mxu1 %vm334_vm5, %v7109_v40  ;;  %6142 = vmatmul.mubr.msk.f32.gmra.mxu0 %vm334_vm5, %v3971_v16 }
0x16cb   :  { %v6104_v46 = vpop.f32.mrf.mxu1  ;;  %v6117_v5 = vpop.f32.mrf.mxu0  ;;  %6161 = vmatprep.mubr.msk.f32.mxu0 %vm890_vm3, %v6598_v22  ;;  %6146 = vmatprep.mubr.msk.f32.mxu1 %vm6360_vm1, %v6356_v1 }
0x16ce   :  { %6147 = vmatmul.mubr.msk.f32.vlgmr.msra.gmra.mxu1 %vm696_vm10, %v6924_v52 }
0x16cf   :  { %6149 = vmatprep.mubr.msk.f32.mxu1 %vm6360_vm1, %v6356_v1 }
0x16d2   :  { %6150 = vmatmul.mubr.msk.f32.gmra.mxu1 %vm696_vm10, %v6931_v54 }
0x16d3   :  { %6152 = vmatprep.mubr.msk.f32.mxu1 %vm6360_vm1, %v6356_v1 }
0x16d6   :  { %6153 = vmatmul.mubr.msk.f32.gmra.mxu1 %vm696_vm10, %v6938_v56 }
0x16d7   :  { %6183 = vmatprep.mubr.msk.f32.mxu1 %vm890_vm3, %v6598_v22 }
0x1782   :  { %v4054_v6 = vpop.f32.mrf.mxu1  ;;  %v4143_v4 = vpop.f32.mrf.mxu0 }
0x1783   :  { %v4144_v12 = vadd.f32 %v4143_v4, %v4054_v6 }
0x1784   :  { %v6124_v7 = vpop.f32.mrf.mxu1  ;;  %v6137_v13 = vpop.f32.mrf.mxu0 }
0x1786   :  { %v4059_v15 = vpop.f32.mrf.mxu1  ;;  %v4148_v8 = vpop.f32.mrf.mxu0 }
0x1787   :  { %v4149_v10 = vadd.f32 %v4148_v8, %v4059_v15 }
0x1788   :  { %v6127_v19 = vpop.f32.mrf.mxu1  ;;  %v6140_v20 = vpop.f32.mrf.mxu0 }
0x178a   :  { %v4064_v31 = vpop.f32.mrf.mxu1  ;;  %v4153_v30 = vpop.f32.mrf.mxu0 }
0x178b   :  { %v4154_v44 = vadd.f32 %v4153_v30, %v4064_v31 }
0x178c   :  { %v6130_v35 = vpop.f32.mrf.mxu1  ;;  %v6143_v9 = vpop.f32.mrf.mxu0 }
0x178e   :  { %v4227_v14 = vpop.f32.mrf.mxu1 }
0x178f   :  { %v4241_v38 = vadd.f32 %v4227_v14, %v4144_v12 }
0x1790   :  { %v6148_v41 = vpop.f32.mrf.mxu1 }
0x1791   :  { %v4247_v50 = vmul.f32 0.2, %v4241_v38  ;;  %vm4244_vm13 = vcmp.ge.f32.partialorder %v4241_v38, 0.0 }
0x1792   :  { %v4232_v60 = vpop.f32.mrf.mxu1 }
0x1793   :  { %v4242_v61 = vadd.f32 %v4232_v60, %v4149_v10  ;;  %v4250_v62 = vsel %vm4244_vm13, %v4241_v38, %v4247_v50 }
0x1794   :  { %4255 = vperm.xlu1 %6295, %v4250_v62   ;;  %v6151_v49 = vpop.f32.mrf.mxu1 }
0x1795   :  { %v4248_v53 = vmul.f32 0.2, %v4242_v61  ;;  %vm4245_vm4 = vcmp.ge.f32.partialorder %v4242_v61, 0.0 }
0x1796   :  { %v4237_v63 = vpop.f32.mrf.mxu1 }
0x1797   :  { %v4243_v27 = vadd.f32 %v4237_v63, %v4154_v44  ;;  %v4251_v33 = vsel %vm4245_vm4, %v4242_v61, %v4248_v53 }
0x1798   :  { %4260 = vperm.xlu0 %6294, %v4251_v33   ;;  %v6154_v36 = vpop.f32.mrf.mxu1 }
0x1799   :  { %v4249_v57 = vmul.f32 0.2, %v4243_v27  ;;  %vm4246_vm6 = vcmp.ge.f32.partialorder %v4243_v27, 0.0 }
0x179b   :  { %v4252_v51 = vsel %vm4246_vm6, %v4243_v27, %v4249_v57 }
0x179c   :  { %4265 = vperm.xlu1 %6295, %v4252_v51  }
0x180f   :  { %v4256_v59 = vpop.permute.xlu1 %4255 }
0x1810   :  { %v4268_v45 = vsel %vm802_vm14, %v4256_v59, -1e+30 }
0x1811   :  { %v4271_v16 = vsel %vm334_vm5, %v4268_v45, -inf }
0x1813   :  { %v4261_v55 = vpop.permute.xlu0 %4260 }
0x1814   :  { %v4269_v2 = vsel %vm803_vm15, %v4261_v55, -1e+30 }
0x1815   :  { %v4272_v3 = vsel %vm334_vm5, %v4269_v2, -inf }
0x1816   :  { %v4274_v5 = vmax.f32 %v4271_v16, %v4272_v3 }
0x1817   :  { %v4266_v46 = vpop.permute.xlu1 %4265 }
0x1818   :  { %v4270_v6 = vsel %vm804_vm2, %v4266_v46, -1e+30 }
0x1819   :  { %v4273_v4 = vsel %vm334_vm5, %v4270_v6, -inf }
0x181a   :  { %v4275_v7 = vmax.f32 %v4274_v5, %v4273_v4 }
0x181c   :  { %v4276_v13 = vrot.slane %v4275_v7, 4 }
0x181e   :  { %v4277_v15 = vmax.f32 %v4275_v7, %v4276_v13 }
0x1820   :  { %v4278_v8 = vrot.slane %v4277_v15, 2 }
0x1822   :  { %v4279_v19 = vmax.f32 %v4277_v15, %v4278_v8 }
0x1824   :  { %v4280_v20 = vrot.slane %v4279_v19, 1 }
0x1826   :  { %v4281_v31 = vmax.f32 %v4279_v19, %v4280_v20 }
0x1828   :  { %v4284_v30 = vmul.f32 %v4281_v31, %v6509_v39  ;;  %v4283_v35 = vmul.f32 %v4281_v31, %v6485_v34  ;;  %v4282_v14 = vmul.f32 %v4281_v31, %v6464_v28 }
0x182a   :  { %v4291_v9 = vsel %vm334_vm5, %v4284_v30, 0.0  ;;  %v4288_v12 = vsel %vm334_vm5, %v4283_v35, 0.0  ;;  %v4285_v38 = vsel %vm334_vm5, %v4282_v14, 0.0 }
0x182b   :  { %4292 = vadd.xlane.f32.xlu0 %v4291_v9  ;;  %4289 = vadd.xlane.f32.xlu1 %v4288_v12  ;;  %v4817_v9 = vld [vmem:[%s5271_s19] sm:$0xff] }
0x182c   :  { %v5351_v12 = vld [vmem:[%s5255_s2] ss:$0 sm:$0xff] }
0x182f   :  { %4286 = vadd.xlane.f32.xlu0 %v4285_v38 }
0x18b4   :  { %v4293_v41 = vpop.xlane.xlu0 %4292  ;;  %v4290_v10 = vpop.xlane.xlu1 %4289 }
0x18b5   :  { %v4296_v50 = vsub.f32 %v4252_v51, %v4293_v41  ;;  %v4295_v60 = vsub.f32 %v4251_v33, %v4290_v10  ;;  %v4819_v10 = vld [vmem:[%s5272_s28] sm:$0xff] }
0x18b7   :  { %v4301_v61 = vmul.f32 1.442695, %v4296_v50  ;;  %v4299_v49 = vmul.f32 1.442695, %v4295_v60  ;;  %v5141_v50 = vld [vmem:[%s5275_s7] sm:$0xff]  ;;  %v6353_v60 = vld [vmem:[%s6409_s9 + $0x8] sm:$0xff] }
0x18b8   :  { %v4287_v44 = vpop.xlane.xlu0 %4286  ;;  %s6396_s9 = smov 40  }
0x18b9   :  { %6332 = vpow2.f32 %v4301_v61  ;;  %v4294_v53 = vsub.f32 %v4250_v62, %v4287_v44  ;;  %s5276_s22 = sld [smem:[%s7240_s0 + %s6396_s9]]  }
0x18ba   :  { %6334 = vpow2.f32 %v4299_v49 }
0x18bb   :  { %v4297_v63 = vmul.f32 1.442695, %v4294_v53 }
0x18bd   :  { %6336 = vpow2.f32 %v4297_v63 }
0x18c6   :  { %v6333_v27 = vpop.eup %6332 }
0x18c7   :  { %v6335_v36 = vpop.eup %6334  ;;  %v4305_v57 = vmul.f32 %v6960_v29, %v6333_v27 }
0x18c8   :  { %v4304_v59 = vmul.f32 %v6964_v32, %v6335_v36 }
0x18c9   :  { %6155 = vmatprep.subr.mxu0 %v4305_v57 }
0x18ca   :  { %v6337_v55 = vpop.eup %6336  ;;  %6156 = vmatpush3.msra.mxu0 %v4305_v57 }
0x18cb   :  { %6157 = vmatprep.subr.mxu0 %v4304_v59  ;;  %v4303_v33 = vmul.f32 %v6968_v11, %v6337_v55 }
0x18cc   :  { %6158 = vmatpush3.msra.mxu0 %v4304_v59 }
0x18cd   :  { %6159 = vmatprep.subr.mxu0 %v4303_v33 }
0x18ce   :  { %6160 = vmatpush3.msra.mxu0 %v4303_v33 }
0x18cf   :  { %6162 = vmatmul.mubr.msk.f32.vlgmr.msra.gmra.mxu0 %vm890_vm3, %v6604_v25  ;;  %6164 = vmatprep.subr.mxu0 %v6356_v1 }
0x18d0   :  { %6168 = vmatprep.mubr.msk.f32.mxu0 %vm6360_vm1, %v6356_v1 }
0x198f   :  { %v6163_v29 = vpop.f32.mrf.mxu0 }
0x1990   :  { %6165 = vmatpush3.msra.mxu0 %v6163_v29 }
0x1991   :  { %v4372_v62 = vpop.f32.mrf.mxu0  ;;  %6166 = vmatprep.subr.mxu0 %v6356_v1 }
0x1992   :  { %6167 = vmatpush3.msra.mxu0 %v4372_v62 }
0x1993   :  { %6169 = vmatmul.mubr.msk.f32.vlgmr.msra.gmra.mxu0 %vm334_vm5, %v6464_v28 }
0x1994   :  { %6171 = vmatprep.mubr.msk.f32.mxu0 %vm6360_vm1, %v6356_v1 }
0x1997   :  { %6172 = vmatmul.mubr.msk.f32.gmra.mxu0 %vm334_vm5, %v6485_v34 }
0x1998   :  { %6174 = vmatprep.mubr.msk.f32.mxu0 %vm6360_vm1, %v6356_v1 }
0x199b   :  { %6175 = vmatmul.mubr.msk.f32.gmra.mxu0 %vm334_vm5, %v6509_v39 }
0x1a53   :  { %v4447_v32 = vpop.f32.mrf.mxu0 }
0x1a54   :  { %v4448_v45 = vadd.f32 1e-16, %v4447_v32 }
0x1a55   :  { %v6170_v11 = vpop.f32.mrf.mxu0 }
0x1a57   :  { %v4452_v51 = vpop.f32.mrf.mxu0 }
0x1a58   :  { %v4453_v2 = vadd.f32 1e-16, %v4452_v51 }
0x1a59   :  { %v6173_v3 = vpop.f32.mrf.mxu0 }
0x1a5a   :  { %6338 = vrcp.f32 %v4453_v2 }
0x1a5b   :  { %v4457_v28 = vpop.f32.mrf.mxu0  ;;  %6340 = vrcp.f32 %v4448_v45 }
0x1a5c   :  { %v4458_v16 = vadd.f32 1e-16, %v4457_v28 }
0x1a5d   :  { %v6176_v46 = vpop.f32.mrf.mxu0 }
0x1a5e   :  { %6342 = vrcp.f32 %v4458_v16 }
0x1a67   :  { %v6339_v5 = vpop.eup %6338 }
0x1a68   :  { %v4464_v34 = vmul.f32 %v6339_v5, %v4304_v59  ;;  %v6341_v6 = vpop.eup %6340 }
0x1a69   :  { %v4462_v4 = vmul.f32 %v6341_v6, %v4303_v33 }
0x1a6a   :  { %4474 = vperm.xlu1 %6295, %v4464_v34   ;;  %v4561_v30 = vmul.f32 %v6931_v54, %v4464_v34  ;;  %v4640_v54 = vld [vmem:[%s5269_s24] sm:$0x1] }
0x1a6b   :  { %v6343_v1 = vpop.eup %6342  ;;  %6195 = vmatprep.subr.msk.mxu0 %vm706_vm9, %v4640_v54 }
0x1a6c   :  { %v4466_v7 = vmul.f32 %v6343_v1, %v4305_v57  ;;  %6196 = vmatpush3.msk.msra.mxu0 %vm706_vm9, %v4640_v54  ;;  %v5430_v1 = vld [vmem:[%s5276_s22] ss:$0 sm:$0xff] }
0x1a6e   :  { %4469 = vperm.xlu1 %6295, %v4462_v4   ;;  %4479 = vperm.xlu0 %6294, %v4466_v7   ;;  %v4562_v31 = vmul.f32 %v6938_v56, %v4466_v7  ;;  %v4820_v56 = vld [vmem:[%s5272_s28 + $0x8] sm:$0xff] }
0x1a6f   :  { %6207 = vmatprep.subr.mxu0 %v4820_v56 }
0x1ae5   :  { %v4475_v39 = vpop.permute.xlu1 %4474 }
0x1ae6   :  { %v4483_v19 = vmul.f32 %v4475_v39, %v7100_v58  ;;  %v4560_v58 = vmul.f32 %v6924_v52, %v4462_v4  ;;  %v4638_v52 = vld [vmem:[%s5268_s15] sm:$0xff] }
0x1ae9   :  { %v4480_v13 = vpop.permute.xlu0 %4479  ;;  %v4470_v8 = vpop.permute.xlu1 %4469 }
0x1aea   :  { %v4484_v15 = vmul.f32 %v4480_v13, %v7109_v40  ;;  %v4482_v20 = vmul.f32 %v4470_v8, %v7090_v0  ;;  %v2553_v40 = vadd.f32 %v6893_v37, %v6853_v18  ;;  %v2569_v18 = vadd.f32 %v5351_v12, %v6841_v17  ;;  %v4977_v17 = vld [vmem:[%s5273_s6] sm:$0xff] }
0x1aec   :  { %6177 = vmatprep.subr.mxu1 %v4484_v15  ;;  %v2568_v14 = vadd.f32 %v5351_v12, %v2553_v40 }
0x1aed   :  { %6178 = vmatpush3.msra.mxu1 %v4484_v15 }
0x1aee   :  { %6179 = vmatprep.subr.mxu1 %v4483_v19  ;;  %v2570_v41 = vmax.f32 %v2568_v14, 0.0 }
0x1aef   :  { %6180 = vmatpush3.msra.mxu1 %v4483_v19 }
0x1af0   :  { %6181 = vmatprep.subr.mxu1 %v4482_v20 }
0x1af1   :  { %6182 = vmatpush3.msra.mxu1 %v4482_v20 }
0x1af2   :  { %6184 = vmatmul.mubr.msk.f32.vlgmr.msra.gmra.mxu1 %vm890_vm3, %v6604_v25  ;;  %6186 = vmatprep.subr.mxu1 %v4562_v31 }
0x1af3   :  { %6187 = vmatpush3.msra.mxu1 %v4562_v31  ;;  %6192 = vmatprep.mubr.msk.f32.mxu1 %vm890_vm3, %v6598_v22  ;;  %v4639_v22 = vld [vmem:[%s5268_s15 + $0x8] sm:$0xff]  ;;  %s6395_s15 = smov 34  }
0x1af4   :  { %6188 = vmatprep.subr.mxu1 %v4561_v30  ;;  %s5270_s18 = sld [smem:[%s7240_s0 + %s6395_s15]]  }
0x1af5   :  { %6189 = vmatpush3.msra.mxu1 %v4561_v30 }
0x1af6   :  { %6190 = vmatprep.subr.mxu1 %v4560_v58 }
0x1af7   :  { %6191 = vmatpush3.msra.mxu1 %v4560_v58 }
0x1af8   :  { %6193 = vmatmul.mubr.msk.f32.vlgmr.msra.gmra.mxu1 %vm890_vm3, %v6604_v25  ;;  %6200 = vmatprep.subr.mxu1 %v4639_v22  ;;  %v4818_v25 = vld [vmem:[%s5271_s19 + $0x8] sm:$0xff] }
0x1af9   :  { %6201 = vmatpush3.msra.mxu1 %v4639_v22 }
0x1afa   :  { %6202 = vmatprep.subr.mxu1 %v4638_v52  ;;  %v5419_v53 = vld [vmem:[%s5270_s18] ss:$0 sm:$0xff] }
0x1afb   :  { %6203 = vmatpush3.msra.mxu1 %v4638_v52 }
0x1afc   :  { %6214 = vmatprep.subr.mxu1 %v4818_v25 }
0x1bb2   :  { %v6185_v0 = vpop.f32.mrf.mxu1 }
0x1bb4   :  { %v4551_v35 = vpop.f32.mrf.mxu1 }
0x1bb5   :  { %6204 = vmatprep.mubr.msk.f32.mxu1 %vm334_vm5, %v4551_v35 }
0x1bb6   :  { %6205 = vmatmul.mubr.msk.f32.vlgmr.msra.gmra.mxu1 %vm334_vm5, %v6185_v0 }
0x1bb7   :  { %6215 = vmatpush3.msra.mxu1 %v4818_v25  ;;  %6218 = vmatprep.mubr.msk.f32.mxu1 %vm334_vm5, %v1406_v24  ;;  %v2571_v24 = vmax.f32 %v2569_v18, 0.0 }
0x1bb8   :  { %v6194_v38 = vpop.f32.mrf.mxu1  ;;  %6216 = vmatprep.subr.mxu1 %v4817_v9 }
0x1bb9   :  { %6217 = vmatpush3.msra.mxu1 %v4817_v9 }
0x1bba   :  { %v4629_v37 = vpop.f32.mrf.mxu1  ;;  %6219 = vmatmul.mubr.msk.f32.vlgmr.msra.gmra.mxu1 %vm334_vm5, %v1407_v26  ;;  %v5144_v26 = vld [vmem:[%s5275_s7 + $0x18] sm:$0xff]  ;;  %6228 = vmatprep.subr.mxu1 %v5057_v43 }
0x1bbb   :  { %6197 = vmatprep.mubr.msk.f32.mxu0 %vm696_vm10, %v4629_v37  ;;  %6229 = vmatpush3.msra.mxu1 %v5057_v43 }
0x1bbc   :  { %6198 = vmatmul.mubr.msk.f32.vlgmr.msra.gmra.mxu0 %vm696_vm10, %v6194_v38 }
0x1bbd   :  { %6208 = vmatpush3.msra.mxu0 %v4820_v56  ;;  %6211 = vmatprep.mubr.msk.f32.mxu0 %vm334_vm5, %v2570_v41 }
0x1bbe   :  { %6209 = vmatprep.subr.mxu0 %v4819_v10 }
0x1bbf   :  { %6210 = vmatpush3.msra.mxu0 %v4819_v10 }
0x1bc0   :  { %6212 = vmatmul.mubr.msk.f32.vlgmr.msra.gmra.mxu0 %vm334_vm5, %v2571_v24  ;;  %6221 = vmatprep.subr.mxu0 %v4978_v23 }
0x1bc1   :  { %6222 = vmatpush3.msra.mxu0 %v4978_v23  ;;  %6225 = vmatprep.mubr.msk.f32.mxu0 %vm334_vm5, %v3651_v47  ;;  %v5142_v47 = vld [vmem:[%s5275_s7 + $0x8] sm:$0xff] }
0x1bc2   :  { %6223 = vmatprep.subr.mxu0 %v4977_v17 }
0x1bc3   :  { %6224 = vmatpush3.msra.mxu0 %v4977_v17 }
0x1bc4   :  { %6226 = vmatmul.mubr.msk.f32.vlgmr.msra.gmra.mxu0 %vm334_vm5, %v3652_v48  ;;  %6235 = vmatprep.subr.mxu0 %v5144_v26  ;;  %v5056_v48 = vld [vmem:[%s5274_s14] sm:$0xff] }
0x1bc5   :  { %6243 = vmatprep.mubr.msk.f32.mxu0 %vm252_vm0, %v6352_v21  ;;  %6236 = vmatpush3.msra.mxu0 %v5144_v26 }
0x1bc6   :  { %6237 = vmatprep.subr.mxu0 %v5143_v42  ;;  %6230 = vmatprep.subr.mxu1 %v5056_v48 }
0x1bc7   :  { %6238 = vmatpush3.msra.mxu0 %v5143_v42  ;;  %6231 = vmatpush3.msra.mxu1 %v5056_v48 }
0x1bc8   :  { %6239 = vmatprep.subr.mxu0 %v5142_v47 }
0x1bc9   :  { %6240 = vmatpush3.msra.mxu0 %v5142_v47 }
0x1bca   :  { %6241 = vmatprep.subr.mxu0 %v5141_v50 }
0x1bcb   :  { %6242 = vmatpush3.msra.mxu0 %v5141_v50 }
0x1bcc   :  { %6244 = vmatmul.mubr.msk.f32.vlgmr.msra.gmra.mxu0 %vm252_vm0, %v6353_v60 }
0x1c76   :  { %v6206_v61 = vpop.f32.mrf.mxu1 }
0x1c78   :  { %v4797_v63 = vpop.f32.mrf.mxu1 }
0x1c7a   :  { %v6220_v32 = vpop.f32.mrf.mxu1 }
0x1c7c   :  { %v6199_v49 = vpop.f32.mrf.mxu0  ;;  %v4968_v45 = vpop.f32.mrf.mxu1 }
0x1c7d   :  { %v4803_v44 = vadd.f32 %v6206_v61, %v6199_v49 }
0x1c7e   :  { %v4716_v27 = vpop.f32.mrf.mxu0 }
0x1c7f   :  { %v4798_v36 = vadd.f32 %v4797_v63, %v4716_v27  ;;  %v4814_v57 = vadd.f32 %v5419_v53, %v4803_v44 }
0x1c80   :  { %v6213_v29 = vpop.f32.mrf.mxu0 }
0x1c81   :  { %v4813_v59 = vadd.f32 %v5419_v53, %v4798_v36  ;;  %v4816_v33 = vmax.f32 %v4814_v57, 0.0  ;;  %v4974_v51 = vadd.f32 %v6220_v32, %v6213_v29 }
0x1c82   :  { %v4893_v62 = vpop.f32.mrf.mxu0 }
0x1c83   :  { %v4815_v55 = vmax.f32 %v4813_v59, 0.0  ;;  %v4969_v3 = vadd.f32 %v4968_v45, %v4893_v62 }
0x1c84   :  { %v6227_v11 = vpop.f32.mrf.mxu0 }
0x1c85   :  { %6232 = vmatprep.mubr.msk.f32.mxu1 %vm334_vm5, %v4815_v55  ;;  %v5055_v28 = vadd.f32 %v6227_v11, %v4974_v51 }
0x1c86   :  { %6233 = vmatmul.mubr.msk.f32.vlgmr.msra.gmra.mxu1 %vm334_vm5, %v4816_v33  ;;  %v5045_v2 = vpop.f32.mrf.mxu0 }
0x1c87   :  { %v5054_v5 = vadd.f32 %v5045_v2, %v4969_v3 }
0x1c8c   :  { %v6245_v46 = vpop.f32.mrf.mxu0 }
0x1c8e   :  { %v5211_v39 = vpop.f32.mrf.mxu0 }
0x1d46   :  { %v6234_v16 = vpop.f32.mrf.mxu1 }
0x1d47   :  { %v5140_v34 = vadd.f32 %v6234_v16, %v5055_v28 }
0x1d48   :  { %v5130_v6 = vpop.f32.mrf.mxu1 }
0x1d49   :  { %v5139_v4 = vadd.f32 %v5130_v6, %v5054_v5  ;;  %v5221_v7 = vadd.f32 %v6245_v46, %v5140_v34 }
0x1d4b   :  { %v5230_v13 = vadd.f32 %v5430_v1, %v5221_v7  ;;  %v5220_v15 = vadd.f32 %v5211_v39, %v5139_v4 }
0x1d4d   :  { %5232 = vst.msk [vmem:[%s5277_s26 + $0x8] sm:$0xff] %vm252_vm0, %v5230_v13  ;;  %v5229_v8 = vadd.f32 %v5430_v1, %v5220_v15 }
0x1d4f   :  { %5231 = vst.msk [vmem:[%s5277_s26] sm:$0xff] %vm252_vm0, %v5229_v8 }

</bundles_post_ra>
